<compile_context>
chip_gen: v7x
topology: tpu7x:2x2x1
jax: 0.10.0
libtpu: 0.0.40
codegen_flags: <defaults>
</compile_context>

<pallas_src>
import functools

import jax
import jax.numpy as jnp
from jax import lax
from jax.experimental import pallas as pl
from jax.experimental.pallas import tpu as pltpu


def _round_up(x, m):
    return (x + m - 1) // m * m


# ---------------------------------------------------------------------------
# Kernel.  Grid = (batch blocks, feature blocks).  The feature axis is an
# online-softmax reduction ("arbitrary"); per-(head, batch, query) running
# max / denominator / PV accumulators live in VMEM scratch across steps.
# ---------------------------------------------------------------------------
def _perceiver_attn_kernel(feat_ref, lat_ref, ln_ref,
                           w_lat_ref, w_feat_ref, w_out_ref,
                           out_ref,
                           q_scr, m_scr, d_scr, acc_scr,
                           *, heads, dim_head, eps, matmul_dtype):
    f32 = jnp.float32
    md = matmul_dtype
    exact_div = jnp.dtype(md) == jnp.dtype(jnp.float32)

    TB, TF, dim = feat_ref.shape
    Q = lat_ref.shape[1]
    inner = heads * dim_head

    f_idx = pl.program_id(1)
    n_f = pl.num_programs(1)

    gm, bm, gl, bl = ln_ref[0:1], ln_ref[1:2], ln_ref[2:3], ln_ref[3:4]

    def layer_norm(x, gamma, beta):
        mu = jnp.mean(x, axis=-1, keepdims=True)
        xc = x - mu
        var = jnp.mean(xc * xc, axis=-1, keepdims=True)
        return (xc * lax.rsqrt(var + eps)) * gamma + beta

    def head_cols(t, h, s):
        # Lazy per-head column slice (no head-major copy of the full tensor).
        return t[:, h * dim_head:(h + 1) * dim_head].reshape(TB, s, dim_head)

    # -- step 0: latent stream initialises the online-softmax state --------
    @pl.when(f_idx == 0)
    def _init_latents():
        lat = lat_ref[...].reshape(TB * Q, dim).astype(f32)
        l = layer_norm(lat, gl, bl).astype(md)
        # Fused q / k_lat / v_lat projection (attention scale folded into Wq).
        l_proj = jnp.dot(l, w_lat_ref[...], preferred_element_type=f32)
        q = l_proj[:, :inner].astype(md)
        k_l = l_proj[:, inner:2 * inner].astype(md)
        v_l = l_proj[:, 2 * inner:3 * inner].astype(md)
        q_scr[...] = q
        # The reference attends over [features ; latents]; seed the running
        # max / denom / PV accumulator with the latent keys and values.
        for h in range(heads):
            q_h = head_cols(q, h, Q)
            k_h = head_cols(k_l, h, Q)
            v_h = head_cols(v_l, h, Q)
            sim = jnp.einsum('bqd,bkd->bqk', q_h, k_h,
                             preferred_element_type=f32)           # (TB, Q, Q)
            m0 = jnp.max(sim, axis=-1, keepdims=True)
            p = jnp.exp(sim - m0)
            d0 = jnp.sum(p, axis=-1, keepdims=True)
            pv = jnp.einsum('bqk,bkd->bqd', p.astype(md), v_h,
                            preferred_element_type=f32)            # (TB, Q, Dh)
            m_scr[h] = m0.reshape(TB * Q, 1)
            d_scr[h] = d0.reshape(TB * Q, 1)
            acc_scr[h] = pv.reshape(TB * Q, dim_head)

    # -- every step: one block of the feature (key/value) stream -----------
    feat = feat_ref[...].reshape(TB * TF, dim).astype(f32)
    x = layer_norm(feat, gm, bm).astype(md)
    x_proj = jnp.dot(x, w_feat_ref[...], preferred_element_type=f32)  # (TB*TF, 2*inner)
    k_x = x_proj[:, :inner].astype(md)
    v_x = x_proj[:, inner:2 * inner].astype(md)
    q_all = q_scr[...]

    for h in range(heads):
        q_h = head_cols(q_all, h, Q)
        k_h = head_cols(k_x, h, TF)
        v_h = head_cols(v_x, h, TF)
        sim = jnp.einsum('bqd,bkd->bqk', q_h, k_h,
                         preferred_element_type=f32)                # (TB, Q, TF)
        m_old = m_scr[h].reshape(TB, Q, 1)
        d_old = d_scr[h].reshape(TB, Q, 1)
        acc_old = acc_scr[h].reshape(TB, Q, dim_head)
        m_new = jnp.maximum(m_old, jnp.max(sim, axis=-1, keepdims=True))
        alpha = jnp.exp(m_old - m_new)
        p = jnp.exp(sim - m_new)
        d_new = alpha * d_old + jnp.sum(p, axis=-1, keepdims=True)
        acc_new = alpha * acc_old + jnp.einsum(
            'bqk,bkd->bqd', p.astype(md), v_h, preferred_element_type=f32)
        m_scr[h] = m_new.reshape(TB * Q, 1)
        d_scr[h] = d_new.reshape(TB * Q, 1)
        acc_scr[h] = acc_new.reshape(TB * Q, dim_head)

    # -- last step: normalise, reassemble heads once, project, store -------
    @pl.when(f_idx == n_f - 1)
    def _finalize():
        outs = []
        for h in range(heads):
            d_h = d_scr[h]                                          # (TB*Q, 1)
            inv = (1.0 / d_h) if exact_div else pl.reciprocal(d_h, approx=True)
            outs.append((acc_scr[h] * inv).astype(md))
        o = outs[0] if heads == 1 else jnp.concatenate(outs, axis=-1)  # (TB*Q, inner)
        res = jnp.dot(o, w_out_ref[...], preferred_element_type=f32)   # (TB*Q, dim_pad)
        out_ref[...] = res.reshape(out_ref.shape).astype(out_ref.dtype)


# ---------------------------------------------------------------------------
# VMEM-aware tile planning
# ---------------------------------------------------------------------------
def _vmem_capacity_bytes():
    try:
        info = pltpu.get_tpu_info()
        cap = getattr(info, "vmem_capacity_bytes", None)
        if cap:
            return int(cap)
    except Exception:
        pass
    return 64 << 20     # assume the smallest current part (v7x) if unknown


def _plan_tiles(B, F, Q, dim, dim_pad, inner, heads,
                in_itemsize, md_itemsize, out_itemsize, budget_bytes,
                max_q_rows=512):
    """Pick (TB, TF).  Budgets the double-buffered blocks *and* in-kernel
    intermediates / scratch (the attention intermediates dominate, not the
    input blocks).  Keeps at least 2 batch grid steps (4 when B allows) so
    both v7x TensorCores get work and the feature DMA overlaps compute."""

    def est(tb, tf):
        rf, rq = tb * tf, tb * Q
        b = 2 * rf * dim * in_itemsize             # feature block (double-buffered)
        b += 2 * rq * dim * in_itemsize            # latents block
        b += 2 * rq * dim_pad * out_itemsize       # output block
        b += rf * dim * (4 + md_itemsize)          # LayerNorm(x) f32 + cast copy
        b += rf * 2 * inner * (4 + md_itemsize)    # fused K/V projection + cast
        b += rq * (dim + 3 * inner) * (4 + md_itemsize)   # latent LN + projection
        b += 2 * rq * tf * 4                       # one head's sim / p (f32)
        b += rq * inner * (md_itemsize + 4)        # q scratch + PV accumulator
        b += 4 * heads * rq * 4                    # running max / denom (+ slack)
        return b

    tf_cands = sorted({d for d in range(8, F + 1, 8) if F % d == 0} | {F})
    tf = tf_cands[0]
    for c in tf_cands:
        if c <= 2048 and est(1, c) <= budget_bytes:
            tf = c

    min_steps_b = min(B, 2) if B < 8 else 4
    tb = 1
    for c in range(1, B + 1):
        if B % c or (B // c) < min_steps_b:
            continue
        if c * Q <= max_q_rows and est(c, tf) <= budget_bytes:
            tb = c
    return tb, tf


# ---------------------------------------------------------------------------
# Wrapper
# ---------------------------------------------------------------------------
def perceiver_attention_layer(features, latents, params, *, heads, dim_head,
                              eps=1e-5, matmul_dtype=jnp.bfloat16,
                              block_b=None, block_f=None,
                              single_buffer_weights=True):
    """features: (B, F, dim), latents: (B, Q, dim) -> (B, Q, dim)."""
    assert features.ndim == 3 and latents.ndim == 3
    assert features.shape[0] == latents.shape[0]
    assert features.shape[2] == latents.shape[2]

    B, F, dim = features.shape
    Q = latents.shape[1]
    inner = heads * dim_head
    scale = dim_head ** (-0.5)
    f32 = jnp.float32
    md = jnp.dtype(matmul_dtype)
    out_dtype = features.dtype
    dim_pad = _round_up(dim, 128)            # lane-dense output stores

    # LayerNorm params fused into a single (4, dim) f32 input.
    ln = jnp.stack([params["norm_media_w"], params["norm_media_b"],
                    params["norm_latents_w"], params["norm_latents_b"]],
                   axis=0).reshape(4, dim).astype(f32)

    # nn.Linear weights are (out, in); pre-transpose so the kernel does x @ W.
    # Fused projection weights: latent stream [Wq*scale | Wk | Wv], feature
    # stream [Wk | Wv].  Wout is zero-padded to a lane-dense width.
    wq = params["to_q_w"].T * scale
    wk = params["to_k_w"].T
    wv = params["to_v_w"].T
    w_lat = jnp.concatenate([wq, wk, wv], axis=-1).astype(md)     # (dim, 3*inner)
    w_feat = jnp.concatenate([wk, wv], axis=-1).astype(md)        # (dim, 2*inner)
    wo = params["to_out_w"].T                                     # (inner, dim)
    if dim_pad != dim:
        wo = jnp.concatenate(
            [wo, jnp.zeros((inner, dim_pad - dim), wo.dtype)], axis=-1)
    w_out = wo.astype(md)                                         # (inner, dim_pad)

    # bf16 path: cast the streamed inputs (halves HBM->VMEM DMA bytes);
    # LayerNorm statistics are still computed in f32 inside the kernel.
    if md == jnp.dtype(jnp.bfloat16):
        features = features.astype(jnp.bfloat16)
        latents = latents.astype(jnp.bfloat16)

    # VMEM-aware tile selection + explicit scoped-VMEM limit.
    vmem_cap = _vmem_capacity_bytes()
    vmem_limit = min(int(vmem_cap * 3 // 4), 112 << 20)
    w_bytes = ((w_lat.size + w_feat.size + w_out.size) * md.itemsize * 2
               + ln.size * 4 * 2)
    budget = max(int(vmem_limit * 0.8) - w_bytes, 4 << 20)
    tb, tf = _plan_tiles(B, F, Q, dim, dim_pad, inner, heads,
                         jnp.dtype(features.dtype).itemsize, md.itemsize,
                         jnp.dtype(out_dtype).itemsize, budget)
    if block_b is not None:
        tb = block_b
    if block_f is not None:
        tf = block_f
    assert B % tb == 0, f"block_b={tb} must divide batch={B}"
    assert F % tf == 0, f"block_f={tf} must divide n_features={F}"

    kernel = functools.partial(_perceiver_attn_kernel, heads=heads,
                               dim_head=dim_head, eps=eps, matmul_dtype=md)

    def build(single_buffer):
        def const_spec(shape):
            idx = lambda g, f: (0,) * len(shape)
            if single_buffer:
                # Constant-index weights never change blocks; a second
                # pipeline buffer is pure VMEM waste on v7x.
                return pl.BlockSpec(shape, idx, pipeline_mode=pl.Buffered(1))
            return pl.BlockSpec(shape, idx)

        return pl.pallas_call(
            kernel,
            out_shape=jax.ShapeDtypeStruct((B, Q, dim_pad), out_dtype),
            grid_spec=pltpu.PrefetchScalarGridSpec(
                num_scalar_prefetch=0,
                grid=(B // tb, F // tf),
                in_specs=[
                    pl.BlockSpec((tb, tf, dim), lambda g, f: (g, f, 0)),   # features
                    pl.BlockSpec((tb, Q, dim), lambda g, f: (g, 0, 0)),    # latents
                    const_spec((4, dim)),                                  # LN params
                    const_spec((dim, 3 * inner)),                          # [Wq*s|Wk|Wv]
                    const_spec((dim, 2 * inner)),                          # [Wk|Wv]
                    const_spec((inner, dim_pad)),                          # Wout (padded)
                ],
                out_specs=pl.BlockSpec((tb, Q, dim_pad), lambda g, f: (g, 0, 0)),
                scratch_shapes=[
                    pltpu.VMEM((tb * Q, inner), md),                    # q
                    pltpu.VMEM((heads, tb * Q, 1), jnp.float32),        # running max
                    pltpu.VMEM((heads, tb * Q, 1), jnp.float32),        # running denom
                    pltpu.VMEM((heads, tb * Q, dim_head), jnp.float32), # PV accumulator
                ],
            ),
            compiler_params=pltpu.CompilerParams(
                dimension_semantics=("parallel", "arbitrary"),
                vmem_limit_bytes=vmem_limit),
        )

    args = (features, latents, ln, w_lat, w_feat, w_out)
    out = None
    if single_buffer_weights and hasattr(pl, "Buffered"):
        try:
            out = build(True)(*args)
        except Exception:
            out = None     # fall back to default double-buffered weights
    if out is None:
        out = build(False)(*args)

    return out[:, :, :dim] if dim_pad != dim else out


# ---------------------------------------------------------------------------
# Pure-JAX reference (mirrors the PyTorch forward) for correctness checks.
# ---------------------------------------------------------------------------
def perceiver_attention_ref(features, latents, params, *, heads, dim_head,
                            eps=1e-5):
    def layer_norm(x, g, b):
        mu = jnp.mean(x, axis=-1, keepdims=True)
        var = jnp.mean((x - mu) ** 2, axis=-1, keepdims=True)
        return (x - mu) / jnp.sqrt(var + eps) * g + b

    B, F, dim = features.shape
    Q = latents.shape[1]
    scale = dim_head ** (-0.5)

    x = layer_norm(features, params["norm_media_w"], params["norm_media_b"])
    l = layer_norm(latents, params["norm_latents_w"], params["norm_latents_b"])
    q = l @ params["to_q_w"].T
    kv = jnp.concatenate([x, l], axis=1)
    k = kv @ params["to_k_w"].T
    v = kv @ params["to_v_w"].T

    def split_heads(t):  # (B, S, H*Dh) -> (B, H, S, Dh)
        B_, S, _ = t.shape
        return t.reshape(B_, S, heads, dim_head).transpose(0, 2, 1, 3)

    q, k, v = split_heads(q) * scale, split_heads(k), split_heads(v)
    sim = jnp.einsum("bhqd,bhfd->bhqf", q, k)
    sim = sim - jnp.max(sim, axis=-1, keepdims=True)
    alphas = jax.nn.softmax(sim, axis=-1)
    out = jnp.einsum("bhqf,bhfd->bhqd", alphas, v)
    out = out.transpose(0, 2, 1, 3).reshape(B, Q, heads * dim_head)
    return out @ params["to_out_w"].T


# ---------------------------------------------------------------------------
if __name__ == "__main__":
    B, F, Q = 2, 16, 8
    dim, heads, dim_head = 32, 4, 16
    inner = heads * dim_head

    key = jax.random.PRNGKey(0)
    keys = jax.random.split(key, 10)

    features = jax.random.normal(keys[0], (B, F, dim), dtype=jnp.float32)
    latents = jax.random.normal(keys[1], (B, Q, dim), dtype=jnp.float32)

    params = {
        "norm_media_w": 1.0 + 0.05 * jax.random.normal(keys[2], (dim,), jnp.float32),
        "norm_media_b": 0.05 * jax.random.normal(keys[3], (dim,), jnp.float32),
        "norm_latents_w": 1.0 + 0.05 * jax.random.normal(keys[4], (dim,), jnp.float32),
        "norm_latents_b": 0.05 * jax.random.normal(keys[5], (dim,), jnp.float32),
        # Linear weights, PyTorch convention (out_features, in_features).
        "to_q_w": 0.1 * jax.random.normal(keys[6], (inner, dim), jnp.float32),
        "to_k_w": 0.1 * jax.random.normal(keys[7], (inner, dim), jnp.float32),
        "to_v_w": 0.1 * jax.random.normal(keys[8], (inner, dim), jnp.float32),
        "to_out_w": 0.1 * jax.random.normal(keys[9], (dim, inner), jnp.float32),
    }

    ref = perceiver_attention_ref(features, latents, params,
                                  heads=heads, dim_head=dim_head)

    # f32 matmul path, single feature block: tight check.
    out_f32 = jax.block_until_ready(perceiver_attention_layer(
        features, latents, params, heads=heads, dim_head=dim_head,
        matmul_dtype=jnp.float32))
    assert out_f32.shape == (B, Q, dim)
    err = float(jnp.max(jnp.abs(out_f32 - ref)))
    assert err < 1e-4, f"f32 path max err {err}"

    # f32 path with the feature axis tiled (exercises the online softmax).
    out_tiled = jax.block_until_ready(perceiver_attention_layer(
        features, latents, params, heads=heads, dim_head=dim_head,
        matmul_dtype=jnp.float32, block_b=1, block_f=8))
    err = float(jnp.max(jnp.abs(out_tiled - ref)))
    assert err < 1e-4, f"tiled f32 path max err {err}"

    # bf16 matmul path (production default): bf16 inputs/weights, loose check.
    out_bf16 = jax.block_until_ready(perceiver_attention_layer(
        features, latents, params, heads=heads, dim_head=dim_head,
        matmul_dtype=jnp.bfloat16))
    assert out_bf16.shape == (B, Q, dim)
    err = float(jnp.max(jnp.abs(out_bf16.astype(jnp.float32) - ref)))
    assert err < 1e-1, f"bf16 path max err {err}"

    print("KERNEL_OK")
</pallas_src>

<mosaic_0001>
module attributes {stable_mosaic.version = 11 : i64} {
  func.func @_perceiver_attn_kernel(%arg0: i32, %arg1: i32, %arg2: memref<1x16x32xf32, #tpu.memory_space<vmem>>, %arg3: memref<1x8x32xf32, #tpu.memory_space<vmem>>, %arg4: memref<4x32xf32, #tpu.memory_space<vmem>>, %arg5: memref<32x192xf32, #tpu.memory_space<vmem>>, %arg6: memref<32x128xf32, #tpu.memory_space<vmem>>, %arg7: memref<64x128xf32, #tpu.memory_space<vmem>>, %arg8: memref<1x8x128xf32, #tpu.memory_space<vmem>>, %arg9: memref<8x64xf32, #tpu.memory_space<vmem>>, %arg10: memref<4x8x1xf32, #tpu.memory_space<vmem>>, %arg11: memref<4x8x1xf32, #tpu.memory_space<vmem>>, %arg12: memref<4x8x16xf32, #tpu.memory_space<vmem>>) attributes {dimension_semantics = [#tpu.dimension_semantics<parallel>, #tpu.dimension_semantics<arbitrary>], iteration_bounds = array<i64: 2, 1>, scalar_prefetch = 0 : i64, scratch_operands = 4 : i64, tpu.core_type = #tpu.core_type<tc>, window_params = [{transform_indices = @transform_0, window_bounds = array<i64: 1, 16, 32>}, {transform_indices = @transform_1, window_bounds = array<i64: 1, 8, 32>}, {pipeline_mode = #tpu.pipeline_mode<synchronous>, transform_indices = @transform_2, window_bounds = array<i64: 4, 32>}, {pipeline_mode = #tpu.pipeline_mode<synchronous>, transform_indices = @transform_3, window_bounds = array<i64: 32, 192>}, {pipeline_mode = #tpu.pipeline_mode<synchronous>, transform_indices = @transform_4, window_bounds = array<i64: 32, 128>}, {pipeline_mode = #tpu.pipeline_mode<synchronous>, transform_indices = @transform_5, window_bounds = array<i64: 64, 128>}, {transform_indices = @transform_6, window_bounds = array<i64: 1, 8, 128>}]} {
    %c0 = arith.constant 0 : index
    %c0_0 = arith.constant 0 : index
    %0 = vector.load %arg4[%c0, %c0_0] : memref<4x32xf32, #tpu.memory_space<vmem>>, vector<1x32xf32>
    %c1 = arith.constant 1 : index
    %c0_1 = arith.constant 0 : index
    %1 = vector.load %arg4[%c1, %c0_1] : memref<4x32xf32, #tpu.memory_space<vmem>>, vector<1x32xf32>
    %c2 = arith.constant 2 : index
    %c0_2 = arith.constant 0 : index
    %2 = vector.load %arg4[%c2, %c0_2] : memref<4x32xf32, #tpu.memory_space<vmem>>, vector<1x32xf32>
    %c3 = arith.constant 3 : index
    %c0_3 = arith.constant 0 : index
    %3 = vector.load %arg4[%c3, %c0_3] : memref<4x32xf32, #tpu.memory_space<vmem>>, vector<1x32xf32>
    %c0_i32 = arith.constant 0 : i32
    %4 = arith.cmpi eq, %arg1, %c0_i32 : i32
    %5 = arith.extui %4 : i1 to i32
    %c0_i32_4 = arith.constant 0 : i32
    %6 = arith.cmpi ne, %5, %c0_i32_4 : i32
    scf.if %6 {
      %c0_107 = arith.constant 0 : index
      %c0_108 = arith.constant 0 : index
      %c0_109 = arith.constant 0 : index
      %213 = vector.load %arg3[%c0_107, %c0_108, %c0_109] : memref<1x8x32xf32, #tpu.memory_space<vmem>>, vector<1x8x32xf32>
      %214 = vector.shape_cast %213 : vector<1x8x32xf32> to vector<8x32xf32>
      %cst_110 = arith.constant dense<0.000000e+00> : vector<8xf32>
      %215 = vector.multi_reduction <add>, %214, %cst_110 [1] : vector<8x32xf32> to vector<8xf32>
      %216 = vector.shape_cast %215 : vector<8xf32> to vector<8x1xf32>
      %cst_111 = arith.constant 3.200000e+01 : f32
      %217 = vector.broadcast %cst_111 : f32 to vector<8x1xf32>
      %218 = arith.divf %216, %217 : vector<8x1xf32>
      %219 = vector.broadcast %218 : vector<8x1xf32> to vector<8x32xf32>
      %220 = arith.subf %214, %219 : vector<8x32xf32>
      %221 = arith.mulf %220, %220 : vector<8x32xf32>
      %cst_112 = arith.constant dense<0.000000e+00> : vector<8xf32>
      %222 = vector.multi_reduction <add>, %221, %cst_112 [1] : vector<8x32xf32> to vector<8xf32>
      %223 = vector.shape_cast %222 : vector<8xf32> to vector<8x1xf32>
      %cst_113 = arith.constant 3.200000e+01 : f32
      %224 = vector.broadcast %cst_113 : f32 to vector<8x1xf32>
      %225 = arith.divf %223, %224 : vector<8x1xf32>
      %cst_114 = arith.constant 9.99999974E-6 : f32
      %226 = vector.broadcast %cst_114 : f32 to vector<8x1xf32>
      %227 = arith.addf %225, %226 : vector<8x1xf32>
      %228 = math.rsqrt %227 : vector<8x1xf32>
      %229 = vector.broadcast %228 : vector<8x1xf32> to vector<8x32xf32>
      %230 = arith.mulf %220, %229 : vector<8x32xf32>
      %231 = vector.broadcast %2 : vector<1x32xf32> to vector<8x32xf32>
      %232 = arith.mulf %230, %231 : vector<8x32xf32>
      %233 = vector.broadcast %3 : vector<1x32xf32> to vector<8x32xf32>
      %234 = arith.addf %232, %233 : vector<8x32xf32>
      %c0_115 = arith.constant 0 : index
      %c0_116 = arith.constant 0 : index
      %235 = vector.load %arg5[%c0_115, %c0_116] : memref<32x192xf32, #tpu.memory_space<vmem>>, vector<32x192xf32>
      %cst_117 = arith.constant dense<0.000000e+00> : vector<8x192xf32>
      %236 = tpu.matmul %234, %235, %cst_117 {dimension_numbers = #tpu.dot_dimension_numbers<[1], [0], [0], [1], [0, 0, 1, 1], [], []>} : vector<8x32xf32>, vector<32x192xf32>, vector<8x192xf32> -> vector<8x192xf32>
      %237 = vector.extract_strided_slice %236 {offsets = [0, 0], sizes = [8, 64], strides = [1, 1]} : vector<8x192xf32> to vector<8x64xf32>
      %238 = vector.extract_strided_slice %236 {offsets = [0, 64], sizes = [8, 64], strides = [1, 1]} : vector<8x192xf32> to vector<8x64xf32>
      %239 = vector.extract_strided_slice %236 {offsets = [0, 128], sizes = [8, 64], strides = [1, 1]} : vector<8x192xf32> to vector<8x64xf32>
      %c0_118 = arith.constant 0 : index
      %c0_119 = arith.constant 0 : index
      %240 = vector.load %arg9[%c0_118, %c0_119] : memref<8x64xf32, #tpu.memory_space<vmem>>, vector<8x64xf32>
      tpu.vector_store %arg9[%c0_118, %c0_119], %237 {strides = array<i32>} : memref<8x64xf32, #tpu.memory_space<vmem>>, vector<8x64xf32>,
      %241 = vector.extract_strided_slice %237 {offsets = [0, 0], sizes = [8, 16], strides = [1, 1]} : vector<8x64xf32> to vector<8x16xf32>
      %242 = vector.shape_cast %241 : vector<8x16xf32> to vector<1x8x16xf32>
      %243 = vector.extract_strided_slice %238 {offsets = [0, 0], sizes = [8, 16], strides = [1, 1]} : vector<8x64xf32> to vector<8x16xf32>
      %244 = vector.shape_cast %243 : vector<8x16xf32> to vector<1x8x16xf32>
      %245 = vector.extract_strided_slice %239 {offsets = [0, 0], sizes = [8, 16], strides = [1, 1]} : vector<8x64xf32> to vector<8x16xf32>
      %246 = vector.shape_cast %245 : vector<8x16xf32> to vector<1x8x16xf32>
      "tpu.trace_start"() <{level = 10 : i32, message = "bqd,bkd->bqk"}> : () -> ()
      %cst_120 = arith.constant dense<0.000000e+00> : vector<1x8x8xf32>
      %247 = tpu.matmul %242, %244, %cst_120 {dimension_numbers = #tpu.dot_dimension_numbers<[2], [2], [1], [1], [0, 0, 0, 1, 1, 1], [0], [0]>} : vector<1x8x16xf32>, vector<1x8x16xf32>, vector<1x8x8xf32> -> vector<1x8x8xf32>
      "tpu.trace_stop"() : () -> ()
      %cst_121 = arith.constant dense<0xFF800000> : vector<1x8xf32>
      %248 = vector.multi_reduction <maximumf>, %247, %cst_121 [2] : vector<1x8x8xf32> to vector<1x8xf32>
      %249 = vector.shape_cast %248 : vector<1x8xf32> to vector<1x8x1xf32>
      %250 = vector.broadcast %249 : vector<1x8x1xf32> to vector<1x8x8xf32>
      %251 = arith.subf %247, %250 : vector<1x8x8xf32>
      %252 = math.exp %251 : vector<1x8x8xf32>
      %cst_122 = arith.constant dense<0.000000e+00> : vector<1x8xf32>
      %253 = vector.multi_reduction <add>, %252, %cst_122 [2] : vector<1x8x8xf32> to vector<1x8xf32>
      %254 = vector.shape_cast %253 : vector<1x8xf32> to vector<1x8x1xf32>
      "tpu.trace_start"() <{level = 10 : i32, message = "bqk,bkd->bqd"}> : () -> ()
      %cst_123 = arith.constant dense<0.000000e+00> : vector<1x8x16xf32>
      %255 = tpu.matmul %252, %246, %cst_123 {dimension_numbers = #tpu.dot_dimension_numbers<[2], [1], [1], [2], [0, 0, 0, 1, 1, 2], [0], [0]>} : vector<1x8x8xf32>, vector<1x8x16xf32>, vector<1x8x16xf32> -> vector<1x8x16xf32>
      "tpu.trace_stop"() : () -> ()
      %256 = vector.shape_cast %249 : vector<1x8x1xf32> to vector<8x1xf32>
      %c0_124 = arith.constant 0 : index
      %c0_125 = arith.constant 0 : index
      %c0_126 = arith.constant 0 : index
      %257 = vector.load %arg10[%c0_124, %c0_125, %c0_126] : memref<4x8x1xf32, #tpu.memory_space<vmem>>, vector<1x8x1xf32>
      %258 = vector.shape_cast %257 : vector<1x8x1xf32> to vector<8x1xf32>
      %259 = vector.shape_cast %256 : vector<8x1xf32> to vector<1x8x1xf32>
      tpu.vector_store %arg10[%c0_124, %c0_125, %c0_126], %259 {strides = array<i32>} : memref<4x8x1xf32, #tpu.memory_space<vmem>>, vector<1x8x1xf32>,
      %260 = vector.shape_cast %254 : vector<1x8x1xf32> to vector<8x1xf32>
      %c0_127 = arith.constant 0 : index
      %c0_128 = arith.constant 0 : index
      %c0_129 = arith.constant 0 : index
      %261 = vector.load %arg11[%c0_127, %c0_128, %c0_129] : memref<4x8x1xf32, #tpu.memory_space<vmem>>, vector<1x8x1xf32>
      %262 = vector.shape_cast %261 : vector<1x8x1xf32> to vector<8x1xf32>
      %263 = vector.shape_cast %260 : vector<8x1xf32> to vector<1x8x1xf32>
      tpu.vector_store %arg11[%c0_127, %c0_128, %c0_129], %263 {strides = array<i32>} : memref<4x8x1xf32, #tpu.memory_space<vmem>>, vector<1x8x1xf32>,
      %264 = vector.shape_cast %255 : vector<1x8x16xf32> to vector<8x16xf32>
      %c0_130 = arith.constant 0 : index
      %c0_131 = arith.constant 0 : index
      %c0_132 = arith.constant 0 : index
      %265 = vector.load %arg12[%c0_130, %c0_131, %c0_132] : memref<4x8x16xf32, #tpu.memory_space<vmem>>, vector<1x8x16xf32>
      %266 = vector.shape_cast %265 : vector<1x8x16xf32> to vector<8x16xf32>
      %267 = vector.shape_cast %264 : vector<8x16xf32> to vector<1x8x16xf32>
      tpu.vector_store %arg12[%c0_130, %c0_131, %c0_132], %267 {strides = array<i32>} : memref<4x8x16xf32, #tpu.memory_space<vmem>>, vector<1x8x16xf32>,
      %268 = vector.extract_strided_slice %237 {offsets = [0, 16], sizes = [8, 16], strides = [1, 1]} : vector<8x64xf32> to vector<8x16xf32>
      %269 = vector.shape_cast %268 : vector<8x16xf32> to vector<1x8x16xf32>
      %270 = vector.extract_strided_slice %238 {offsets = [0, 16], sizes = [8, 16], strides = [1, 1]} : vector<8x64xf32> to vector<8x16xf32>
      %271 = vector.shape_cast %270 : vector<8x16xf32> to vector<1x8x16xf32>
      %272 = vector.extract_strided_slice %239 {offsets = [0, 16], sizes = [8, 16], strides = [1, 1]} : vector<8x64xf32> to vector<8x16xf32>
      %273 = vector.shape_cast %272 : vector<8x16xf32> to vector<1x8x16xf32>
      "tpu.trace_start"() <{level = 10 : i32, message = "bqd,bkd->bqk"}> : () -> ()
      %cst_133 = arith.constant dense<0.000000e+00> : vector<1x8x8xf32>
      %274 = tpu.matmul %269, %271, %cst_133 {dimension_numbers = #tpu.dot_dimension_numbers<[2], [2], [1], [1], [0, 0, 0, 1, 1, 1], [0], [0]>} : vector<1x8x16xf32>, vector<1x8x16xf32>, vector<1x8x8xf32> -> vector<1x8x8xf32>
      "tpu.trace_stop"() : () -> ()
      %cst_134 = arith.constant dense<0xFF800000> : vector<1x8xf32>
      %275 = vector.multi_reduction <maximumf>, %274, %cst_134 [2] : vector<1x8x8xf32> to vector<1x8xf32>
      %276 = vector.shape_cast %275 : vector<1x8xf32> to vector<1x8x1xf32>
      %277 = vector.broadcast %276 : vector<1x8x1xf32> to vector<1x8x8xf32>
      %278 = arith.subf %274, %277 : vector<1x8x8xf32>
      %279 = math.exp %278 : vector<1x8x8xf32>
      %cst_135 = arith.constant dense<0.000000e+00> : vector<1x8xf32>
      %280 = vector.multi_reduction <add>, %279, %cst_135 [2] : vector<1x8x8xf32> to vector<1x8xf32>
      %281 = vector.shape_cast %280 : vector<1x8xf32> to vector<1x8x1xf32>
      "tpu.trace_start"() <{level = 10 : i32, message = "bqk,bkd->bqd"}> : () -> ()
      %cst_136 = arith.constant dense<0.000000e+00> : vector<1x8x16xf32>
      %282 = tpu.matmul %279, %273, %cst_136 {dimension_numbers = #tpu.dot_dimension_numbers<[2], [1], [1], [2], [0, 0, 0, 1, 1, 2], [0], [0]>} : vector<1x8x8xf32>, vector<1x8x16xf32>, vector<1x8x16xf32> -> vector<1x8x16xf32>
      "tpu.trace_stop"() : () -> ()
      %283 = vector.shape_cast %276 : vector<1x8x1xf32> to vector<8x1xf32>
      %c1_137 = arith.constant 1 : index
      %c0_138 = arith.constant 0 : index
      %c0_139 = arith.constant 0 : index
      %284 = vector.load %arg10[%c1_137, %c0_138, %c0_139] : memref<4x8x1xf32, #tpu.memory_space<vmem>>, vector<1x8x1xf32>
      %285 = vector.shape_cast %284 : vector<1x8x1xf32> to vector<8x1xf32>
      %286 = vector.shape_cast %283 : vector<8x1xf32> to vector<1x8x1xf32>
      tpu.vector_store %arg10[%c1_137, %c0_138, %c0_139], %286 {strides = array<i32>} : memref<4x8x1xf32, #tpu.memory_space<vmem>>, vector<1x8x1xf32>,
      %287 = vector.shape_cast %281 : vector<1x8x1xf32> to vector<8x1xf32>
      %c1_140 = arith.constant 1 : index
      %c0_141 = arith.constant 0 : index
      %c0_142 = arith.constant 0 : index
      %288 = vector.load %arg11[%c1_140, %c0_141, %c0_142] : memref<4x8x1xf32, #tpu.memory_space<vmem>>, vector<1x8x1xf32>
      %289 = vector.shape_cast %288 : vector<1x8x1xf32> to vector<8x1xf32>
      %290 = vector.shape_cast %287 : vector<8x1xf32> to vector<1x8x1xf32>
      tpu.vector_store %arg11[%c1_140, %c0_141, %c0_142], %290 {strides = array<i32>} : memref<4x8x1xf32, #tpu.memory_space<vmem>>, vector<1x8x1xf32>,
      %291 = vector.shape_cast %282 : vector<1x8x16xf32> to vector<8x16xf32>
      %c1_143 = arith.constant 1 : index
      %c0_144 = arith.constant 0 : index
      %c0_145 = arith.constant 0 : index
      %292 = vector.load %arg12[%c1_143, %c0_144, %c0_145] : memref<4x8x16xf32, #tpu.memory_space<vmem>>, vector<1x8x16xf32>
      %293 = vector.shape_cast %292 : vector<1x8x16xf32> to vector<8x16xf32>
      %294 = vector.shape_cast %291 : vector<8x16xf32> to vector<1x8x16xf32>
      tpu.vector_store %arg12[%c1_143, %c0_144, %c0_145], %294 {strides = array<i32>} : memref<4x8x16xf32, #tpu.memory_space<vmem>>, vector<1x8x16xf32>,
      %295 = vector.extract_strided_slice %237 {offsets = [0, 32], sizes = [8, 16], strides = [1, 1]} : vector<8x64xf32> to vector<8x16xf32>
      %296 = vector.shape_cast %295 : vector<8x16xf32> to vector<1x8x16xf32>
      %297 = vector.extract_strided_slice %238 {offsets = [0, 32], sizes = [8, 16], strides = [1, 1]} : vector<8x64xf32> to vector<8x16xf32>
      %298 = vector.shape_cast %297 : vector<8x16xf32> to vector<1x8x16xf32>
      %299 = vector.extract_strided_slice %239 {offsets = [0, 32], sizes = [8, 16], strides = [1, 1]} : vector<8x64xf32> to vector<8x16xf32>
      %300 = vector.shape_cast %299 : vector<8x16xf32> to vector<1x8x16xf32>
      "tpu.trace_start"() <{level = 10 : i32, message = "bqd,bkd->bqk"}> : () -> ()
      %cst_146 = arith.constant dense<0.000000e+00> : vector<1x8x8xf32>
      %301 = tpu.matmul %296, %298, %cst_146 {dimension_numbers = #tpu.dot_dimension_numbers<[2], [2], [1], [1], [0, 0, 0, 1, 1, 1], [0], [0]>} : vector<1x8x16xf32>, vector<1x8x16xf32>, vector<1x8x8xf32> -> vector<1x8x8xf32>
      "tpu.trace_stop"() : () -> ()
      %cst_147 = arith.constant dense<0xFF800000> : vector<1x8xf32>
      %302 = vector.multi_reduction <maximumf>, %301, %cst_147 [2] : vector<1x8x8xf32> to vector<1x8xf32>
      %303 = vector.shape_cast %302 : vector<1x8xf32> to vector<1x8x1xf32>
      %304 = vector.broadcast %303 : vector<1x8x1xf32> to vector<1x8x8xf32>
      %305 = arith.subf %301, %304 : vector<1x8x8xf32>
      %306 = math.exp %305 : vector<1x8x8xf32>
      %cst_148 = arith.constant dense<0.000000e+00> : vector<1x8xf32>
      %307 = vector.multi_reduction <add>, %306, %cst_148 [2] : vector<1x8x8xf32> to vector<1x8xf32>
      %308 = vector.shape_cast %307 : vector<1x8xf32> to vector<1x8x1xf32>
      "tpu.trace_start"() <{level = 10 : i32, message = "bqk,bkd->bqd"}> : () -> ()
      %cst_149 = arith.constant dense<0.000000e+00> : vector<1x8x16xf32>
      %309 = tpu.matmul %306, %300, %cst_149 {dimension_numbers = #tpu.dot_dimension_numbers<[2], [1], [1], [2], [0, 0, 0, 1, 1, 2], [0], [0]>} : vector<1x8x8xf32>, vector<1x8x16xf32>, vector<1x8x16xf32> -> vector<1x8x16xf32>
      "tpu.trace_stop"() : () -> ()
      %310 = vector.shape_cast %303 : vector<1x8x1xf32> to vector<8x1xf32>
      %c2_150 = arith.constant 2 : index
      %c0_151 = arith.constant 0 : index
      %c0_152 = arith.constant 0 : index
      %311 = vector.load %arg10[%c2_150, %c0_151, %c0_152] : memref<4x8x1xf32, #tpu.memory_space<vmem>>, vector<1x8x1xf32>
      %312 = vector.shape_cast %311 : vector<1x8x1xf32> to vector<8x1xf32>
      %313 = vector.shape_cast %310 : vector<8x1xf32> to vector<1x8x1xf32>
      tpu.vector_store %arg10[%c2_150, %c0_151, %c0_152], %313 {strides = array<i32>} : memref<4x8x1xf32, #tpu.memory_space<vmem>>, vector<1x8x1xf32>,
      %314 = vector.shape_cast %308 : vector<1x8x1xf32> to vector<8x1xf32>
      %c2_153 = arith.constant 2 : index
      %c0_154 = arith.constant 0 : index
      %c0_155 = arith.constant 0 : index
      %315 = vector.load %arg11[%c2_153, %c0_154, %c0_155] : memref<4x8x1xf32, #tpu.memory_space<vmem>>, vector<1x8x1xf32>
      %316 = vector.shape_cast %315 : vector<1x8x1xf32> to vector<8x1xf32>
      %317 = vector.shape_cast %314 : vector<8x1xf32> to vector<1x8x1xf32>
      tpu.vector_store %arg11[%c2_153, %c0_154, %c0_155], %317 {strides = array<i32>} : memref<4x8x1xf32, #tpu.memory_space<vmem>>, vector<1x8x1xf32>,
      %318 = vector.shape_cast %309 : vector<1x8x16xf32> to vector<8x16xf32>
      %c2_156 = arith.constant 2 : index
      %c0_157 = arith.constant 0 : index
      %c0_158 = arith.constant 0 : index
      %319 = vector.load %arg12[%c2_156, %c0_157, %c0_158] : memref<4x8x16xf32, #tpu.memory_space<vmem>>, vector<1x8x16xf32>
      %320 = vector.shape_cast %319 : vector<1x8x16xf32> to vector<8x16xf32>
      %321 = vector.shape_cast %318 : vector<8x16xf32> to vector<1x8x16xf32>
      tpu.vector_store %arg12[%c2_156, %c0_157, %c0_158], %321 {strides = array<i32>} : memref<4x8x16xf32, #tpu.memory_space<vmem>>, vector<1x8x16xf32>,
      %322 = vector.extract_strided_slice %237 {offsets = [0, 48], sizes = [8, 16], strides = [1, 1]} : vector<8x64xf32> to vector<8x16xf32>
      %323 = vector.shape_cast %322 : vector<8x16xf32> to vector<1x8x16xf32>
      %324 = vector.extract_strided_slice %238 {offsets = [0, 48], sizes = [8, 16], strides = [1, 1]} : vector<8x64xf32> to vector<8x16xf32>
      %325 = vector.shape_cast %324 : vector<8x16xf32> to vector<1x8x16xf32>
      %326 = vector.extract_strided_slice %239 {offsets = [0, 48], sizes = [8, 16], strides = [1, 1]} : vector<8x64xf32> to vector<8x16xf32>
      %327 = vector.shape_cast %326 : vector<8x16xf32> to vector<1x8x16xf32>
      "tpu.trace_start"() <{level = 10 : i32, message = "bqd,bkd->bqk"}> : () -> ()
      %cst_159 = arith.constant dense<0.000000e+00> : vector<1x8x8xf32>
      %328 = tpu.matmul %323, %325, %cst_159 {dimension_numbers = #tpu.dot_dimension_numbers<[2], [2], [1], [1], [0, 0, 0, 1, 1, 1], [0], [0]>} : vector<1x8x16xf32>, vector<1x8x16xf32>, vector<1x8x8xf32> -> vector<1x8x8xf32>
      "tpu.trace_stop"() : () -> ()
      %cst_160 = arith.constant dense<0xFF800000> : vector<1x8xf32>
      %329 = vector.multi_reduction <maximumf>, %328, %cst_160 [2] : vector<1x8x8xf32> to vector<1x8xf32>
      %330 = vector.shape_cast %329 : vector<1x8xf32> to vector<1x8x1xf32>
      %331 = vector.broadcast %330 : vector<1x8x1xf32> to vector<1x8x8xf32>
      %332 = arith.subf %328, %331 : vector<1x8x8xf32>
      %333 = math.exp %332 : vector<1x8x8xf32>
      %cst_161 = arith.constant dense<0.000000e+00> : vector<1x8xf32>
      %334 = vector.multi_reduction <add>, %333, %cst_161 [2] : vector<1x8x8xf32> to vector<1x8xf32>
      %335 = vector.shape_cast %334 : vector<1x8xf32> to vector<1x8x1xf32>
      "tpu.trace_start"() <{level = 10 : i32, message = "bqk,bkd->bqd"}> : () -> ()
      %cst_162 = arith.constant dense<0.000000e+00> : vector<1x8x16xf32>
      %336 = tpu.matmul %333, %327, %cst_162 {dimension_numbers = #tpu.dot_dimension_numbers<[2], [1], [1], [2], [0, 0, 0, 1, 1, 2], [0], [0]>} : vector<1x8x8xf32>, vector<1x8x16xf32>, vector<1x8x16xf32> -> vector<1x8x16xf32>
      "tpu.trace_stop"() : () -> ()
      %337 = vector.shape_cast %330 : vector<1x8x1xf32> to vector<8x1xf32>
      %c3_163 = arith.constant 3 : index
      %c0_164 = arith.constant 0 : index
      %c0_165 = arith.constant 0 : index
      %338 = vector.load %arg10[%c3_163, %c0_164, %c0_165] : memref<4x8x1xf32, #tpu.memory_space<vmem>>, vector<1x8x1xf32>
      %339 = vector.shape_cast %338 : vector<1x8x1xf32> to vector<8x1xf32>
      %340 = vector.shape_cast %337 : vector<8x1xf32> to vector<1x8x1xf32>
      tpu.vector_store %arg10[%c3_163, %c0_164, %c0_165], %340 {strides = array<i32>} : memref<4x8x1xf32, #tpu.memory_space<vmem>>, vector<1x8x1xf32>,
      %341 = vector.shape_cast %335 : vector<1x8x1xf32> to vector<8x1xf32>
      %c3_166 = arith.constant 3 : index
      %c0_167 = arith.constant 0 : index
      %c0_168 = arith.constant 0 : index
      %342 = vector.load %arg11[%c3_166, %c0_167, %c0_168] : memref<4x8x1xf32, #tpu.memory_space<vmem>>, vector<1x8x1xf32>
      %343 = vector.shape_cast %342 : vector<1x8x1xf32> to vector<8x1xf32>
      %344 = vector.shape_cast %341 : vector<8x1xf32> to vector<1x8x1xf32>
      tpu.vector_store %arg11[%c3_166, %c0_167, %c0_168], %344 {strides = array<i32>} : memref<4x8x1xf32, #tpu.memory_space<vmem>>, vector<1x8x1xf32>,
      %345 = vector.shape_cast %336 : vector<1x8x16xf32> to vector<8x16xf32>
      %c3_169 = arith.constant 3 : index
      %c0_170 = arith.constant 0 : index
      %c0_171 = arith.constant 0 : index
      %346 = vector.load %arg12[%c3_169, %c0_170, %c0_171] : memref<4x8x16xf32, #tpu.memory_space<vmem>>, vector<1x8x16xf32>
      %347 = vector.shape_cast %346 : vector<1x8x16xf32> to vector<8x16xf32>
      %348 = vector.shape_cast %345 : vector<8x16xf32> to vector<1x8x16xf32>
      tpu.vector_store %arg12[%c3_169, %c0_170, %c0_171], %348 {strides = array<i32>} : memref<4x8x16xf32, #tpu.memory_space<vmem>>, vector<1x8x16xf32>,
    } else {
    }
    %c0_5 = arith.constant 0 : index
    %c0_6 = arith.constant 0 : index
    %c0_7 = arith.constant 0 : index
    %7 = vector.load %arg2[%c0_5, %c0_6, %c0_7] : memref<1x16x32xf32, #tpu.memory_space<vmem>>, vector<1x16x32xf32>
    %8 = vector.shape_cast %7 : vector<1x16x32xf32> to vector<16x32xf32>
    %cst = arith.constant dense<0.000000e+00> : vector<16xf32>
    %9 = vector.multi_reduction <add>, %8, %cst [1] : vector<16x32xf32> to vector<16xf32>
    %10 = vector.shape_cast %9 : vector<16xf32> to vector<16x1xf32>
    %cst_8 = arith.constant 3.200000e+01 : f32
    %11 = vector.broadcast %cst_8 : f32 to vector<16x1xf32>
    %12 = arith.divf %10, %11 : vector<16x1xf32>
    %13 = vector.broadcast %12 : vector<16x1xf32> to vector<16x32xf32>
    %14 = arith.subf %8, %13 : vector<16x32xf32>
    %15 = arith.mulf %14, %14 : vector<16x32xf32>
    %cst_9 = arith.constant dense<0.000000e+00> : vector<16xf32>
    %16 = vector.multi_reduction <add>, %15, %cst_9 [1] : vector<16x32xf32> to vector<16xf32>
    %17 = vector.shape_cast %16 : vector<16xf32> to vector<16x1xf32>
    %cst_10 = arith.constant 3.200000e+01 : f32
    %18 = vector.broadcast %cst_10 : f32 to vector<16x1xf32>
    %19 = arith.divf %17, %18 : vector<16x1xf32>
    %cst_11 = arith.constant 9.99999974E-6 : f32
    %20 = vector.broadcast %cst_11 : f32 to vector<16x1xf32>
    %21 = arith.addf %19, %20 : vector<16x1xf32>
    %22 = math.rsqrt %21 : vector<16x1xf32>
    %23 = vector.broadcast %22 : vector<16x1xf32> to vector<16x32xf32>
    %24 = arith.mulf %14, %23 : vector<16x32xf32>
    %25 = vector.broadcast %0 : vector<1x32xf32> to vector<16x32xf32>
    %26 = arith.mulf %24, %25 : vector<16x32xf32>
    %27 = vector.broadcast %1 : vector<1x32xf32> to vector<16x32xf32>
    %28 = arith.addf %26, %27 : vector<16x32xf32>
    %c0_12 = arith.constant 0 : index
    %c0_13 = arith.constant 0 : index
    %29 = vector.load %arg6[%c0_12, %c0_13] : memref<32x128xf32, #tpu.memory_space<vmem>>, vector<32x128xf32>
    %cst_14 = arith.constant dense<0.000000e+00> : vector<16x128xf32>
    %30 = tpu.matmul %28, %29, %cst_14 {dimension_numbers = #tpu.dot_dimension_numbers<[1], [0], [0], [1], [0, 0, 1, 1], [], []>} : vector<16x32xf32>, vector<32x128xf32>, vector<16x128xf32> -> vector<16x128xf32>
    %31 = vector.extract_strided_slice %30 {offsets = [0, 0], sizes = [16, 64], strides = [1, 1]} : vector<16x128xf32> to vector<16x64xf32>
    %32 = vector.extract_strided_slice %30 {offsets = [0, 64], sizes = [16, 64], strides = [1, 1]} : vector<16x128xf32> to vector<16x64xf32>
    %c0_15 = arith.constant 0 : index
    %c0_16 = arith.constant 0 : index
    %33 = vector.load %arg9[%c0_15, %c0_16] : memref<8x64xf32, #tpu.memory_space<vmem>>, vector<8x64xf32>
    %34 = vector.extract_strided_slice %33 {offsets = [0, 0], sizes = [8, 16], strides = [1, 1]} : vector<8x64xf32> to vector<8x16xf32>
    %35 = vector.shape_cast %34 : vector<8x16xf32> to vector<1x8x16xf32>
    %36 = vector.extract_strided_slice %31 {offsets = [0, 0], sizes = [16, 16], strides = [1, 1]} : vector<16x64xf32> to vector<16x16xf32>
    %37 = vector.shape_cast %36 : vector<16x16xf32> to vector<1x16x16xf32>
    %38 = vector.extract_strided_slice %32 {offsets = [0, 0], sizes = [16, 16], strides = [1, 1]} : vector<16x64xf32> to vector<16x16xf32>
    %39 = vector.shape_cast %38 : vector<16x16xf32> to vector<1x16x16xf32>
    "tpu.trace_start"() <{level = 10 : i32, message = "bqd,bkd->bqk"}> : () -> ()
    %cst_17 = arith.constant dense<0.000000e+00> : vector<1x8x16xf32>
    %40 = tpu.matmul %35, %37, %cst_17 {dimension_numbers = #tpu.dot_dimension_numbers<[2], [2], [1], [1], [0, 0, 0, 1, 1, 1], [0], [0]>} : vector<1x8x16xf32>, vector<1x16x16xf32>, vector<1x8x16xf32> -> vector<1x8x16xf32>
    "tpu.trace_stop"() : () -> ()
    %c0_18 = arith.constant 0 : index
    %c0_19 = arith.constant 0 : index
    %c0_20 = arith.constant 0 : index
    %41 = vector.load %arg10[%c0_18, %c0_19, %c0_20] : memref<4x8x1xf32, #tpu.memory_space<vmem>>, vector<1x8x1xf32>
    %42 = vector.shape_cast %41 : vector<1x8x1xf32> to vector<8x1xf32>
    %43 = vector.shape_cast %42 : vector<8x1xf32> to vector<1x8x1xf32>
    %c0_21 = arith.constant 0 : index
    %c0_22 = arith.constant 0 : index
    %c0_23 = arith.constant 0 : index
    %44 = vector.load %arg11[%c0_21, %c0_22, %c0_23] : memref<4x8x1xf32, #tpu.memory_space<vmem>>, vector<1x8x1xf32>
    %45 = vector.shape_cast %44 : vector<1x8x1xf32> to vector<8x1xf32>
    %46 = vector.shape_cast %45 : vector<8x1xf32> to vector<1x8x1xf32>
    %c0_24 = arith.constant 0 : index
    %c0_25 = arith.constant 0 : index
    %c0_26 = arith.constant 0 : index
    %47 = vector.load %arg12[%c0_24, %c0_25, %c0_26] : memref<4x8x16xf32, #tpu.memory_space<vmem>>, vector<1x8x16xf32>
    %48 = vector.shape_cast %47 : vector<1x8x16xf32> to vector<8x16xf32>
    %49 = vector.shape_cast %48 : vector<8x16xf32> to vector<1x8x16xf32>
    %cst_27 = arith.constant dense<0xFF800000> : vector<1x8xf32>
    %50 = vector.multi_reduction <maximumf>, %40, %cst_27 [2] : vector<1x8x16xf32> to vector<1x8xf32>
    %51 = vector.shape_cast %50 : vector<1x8xf32> to vector<1x8x1xf32>
    %52 = arith.maximumf %43, %51 : vector<1x8x1xf32>
    %53 = arith.subf %43, %52 : vector<1x8x1xf32>
    %54 = math.exp %53 : vector<1x8x1xf32>
    %55 = vector.broadcast %52 : vector<1x8x1xf32> to vector<1x8x16xf32>
    %56 = arith.subf %40, %55 : vector<1x8x16xf32>
    %57 = math.exp %56 : vector<1x8x16xf32>
    %58 = arith.mulf %54, %46 : vector<1x8x1xf32>
    %cst_28 = arith.constant dense<0.000000e+00> : vector<1x8xf32>
    %59 = vector.multi_reduction <add>, %57, %cst_28 [2] : vector<1x8x16xf32> to vector<1x8xf32>
    %60 = vector.shape_cast %59 : vector<1x8xf32> to vector<1x8x1xf32>
    %61 = arith.addf %58, %60 : vector<1x8x1xf32>
    %62 = vector.broadcast %54 : vector<1x8x1xf32> to vector<1x8x16xf32>
    %63 = arith.mulf %62, %49 : vector<1x8x16xf32>
    "tpu.trace_start"() <{level = 10 : i32, message = "bqk,bkd->bqd"}> : () -> ()
    %cst_29 = arith.constant dense<0.000000e+00> : vector<1x8x16xf32>
    %64 = tpu.matmul %57, %39, %cst_29 {dimension_numbers = #tpu.dot_dimension_numbers<[2], [1], [1], [2], [0, 0, 0, 1, 1, 2], [0], [0]>} : vector<1x8x16xf32>, vector<1x16x16xf32>, vector<1x8x16xf32> -> vector<1x8x16xf32>
    "tpu.trace_stop"() : () -> ()
    %65 = arith.addf %63, %64 : vector<1x8x16xf32>
    %66 = vector.shape_cast %52 : vector<1x8x1xf32> to vector<8x1xf32>
    %c0_30 = arith.constant 0 : index
    %c0_31 = arith.constant 0 : index
    %c0_32 = arith.constant 0 : index
    %67 = vector.load %arg10[%c0_30, %c0_31, %c0_32] : memref<4x8x1xf32, #tpu.memory_space<vmem>>, vector<1x8x1xf32>
    %68 = vector.shape_cast %67 : vector<1x8x1xf32> to vector<8x1xf32>
    %69 = vector.shape_cast %66 : vector<8x1xf32> to vector<1x8x1xf32>
    tpu.vector_store %arg10[%c0_30, %c0_31, %c0_32], %69 {strides = array<i32>} : memref<4x8x1xf32, #tpu.memory_space<vmem>>, vector<1x8x1xf32>,
    %70 = vector.shape_cast %61 : vector<1x8x1xf32> to vector<8x1xf32>
    %c0_33 = arith.constant 0 : index
    %c0_34 = arith.constant 0 : index
    %c0_35 = arith.constant 0 : index
    %71 = vector.load %arg11[%c0_33, %c0_34, %c0_35] : memref<4x8x1xf32, #tpu.memory_space<vmem>>, vector<1x8x1xf32>
    %72 = vector.shape_cast %71 : vector<1x8x1xf32> to vector<8x1xf32>
    %73 = vector.shape_cast %70 : vector<8x1xf32> to vector<1x8x1xf32>
    tpu.vector_store %arg11[%c0_33, %c0_34, %c0_35], %73 {strides = array<i32>} : memref<4x8x1xf32, #tpu.memory_space<vmem>>, vector<1x8x1xf32>,
    %74 = vector.shape_cast %65 : vector<1x8x16xf32> to vector<8x16xf32>
    %c0_36 = arith.constant 0 : index
    %c0_37 = arith.constant 0 : index
    %c0_38 = arith.constant 0 : index
    %75 = vector.load %arg12[%c0_36, %c0_37, %c0_38] : memref<4x8x16xf32, #tpu.memory_space<vmem>>, vector<1x8x16xf32>
    %76 = vector.shape_cast %75 : vector<1x8x16xf32> to vector<8x16xf32>
    %77 = vector.shape_cast %74 : vector<8x16xf32> to vector<1x8x16xf32>
    tpu.vector_store %arg12[%c0_36, %c0_37, %c0_38], %77 {strides = array<i32>} : memref<4x8x16xf32, #tpu.memory_space<vmem>>, vector<1x8x16xf32>,
    %78 = vector.extract_strided_slice %33 {offsets = [0, 16], sizes = [8, 16], strides = [1, 1]} : vector<8x64xf32> to vector<8x16xf32>
    %79 = vector.shape_cast %78 : vector<8x16xf32> to vector<1x8x16xf32>
    %80 = vector.extract_strided_slice %31 {offsets = [0, 16], sizes = [16, 16], strides = [1, 1]} : vector<16x64xf32> to vector<16x16xf32>
    %81 = vector.shape_cast %80 : vector<16x16xf32> to vector<1x16x16xf32>
    %82 = vector.extract_strided_slice %32 {offsets = [0, 16], sizes = [16, 16], strides = [1, 1]} : vector<16x64xf32> to vector<16x16xf32>
    %83 = vector.shape_cast %82 : vector<16x16xf32> to vector<1x16x16xf32>
    "tpu.trace_start"() <{level = 10 : i32, message = "bqd,bkd->bqk"}> : () -> ()
    %cst_39 = arith.constant dense<0.000000e+00> : vector<1x8x16xf32>
    %84 = tpu.matmul %79, %81, %cst_39 {dimension_numbers = #tpu.dot_dimension_numbers<[2], [2], [1], [1], [0, 0, 0, 1, 1, 1], [0], [0]>} : vector<1x8x16xf32>, vector<1x16x16xf32>, vector<1x8x16xf32> -> vector<1x8x16xf32>
    "tpu.trace_stop"() : () -> ()
    %c1_40 = arith.constant 1 : index
    %c0_41 = arith.constant 0 : index
    %c0_42 = arith.constant 0 : index
    %85 = vector.load %arg10[%c1_40, %c0_41, %c0_42] : memref<4x8x1xf32, #tpu.memory_space<vmem>>, vector<1x8x1xf32>
    %86 = vector.shape_cast %85 : vector<1x8x1xf32> to vector<8x1xf32>
    %87 = vector.shape_cast %86 : vector<8x1xf32> to vector<1x8x1xf32>
    %c1_43 = arith.constant 1 : index
    %c0_44 = arith.constant 0 : index
    %c0_45 = arith.constant 0 : index
    %88 = vector.load %arg11[%c1_43, %c0_44, %c0_45] : memref<4x8x1xf32, #tpu.memory_space<vmem>>, vector<1x8x1xf32>
    %89 = vector.shape_cast %88 : vector<1x8x1xf32> to vector<8x1xf32>
    %90 = vector.shape_cast %89 : vector<8x1xf32> to vector<1x8x1xf32>
    %c1_46 = arith.constant 1 : index
    %c0_47 = arith.constant 0 : index
    %c0_48 = arith.constant 0 : index
    %91 = vector.load %arg12[%c1_46, %c0_47, %c0_48] : memref<4x8x16xf32, #tpu.memory_space<vmem>>, vector<1x8x16xf32>
    %92 = vector.shape_cast %91 : vector<1x8x16xf32> to vector<8x16xf32>
    %93 = vector.shape_cast %92 : vector<8x16xf32> to vector<1x8x16xf32>
    %cst_49 = arith.constant dense<0xFF800000> : vector<1x8xf32>
    %94 = vector.multi_reduction <maximumf>, %84, %cst_49 [2] : vector<1x8x16xf32> to vector<1x8xf32>
    %95 = vector.shape_cast %94 : vector<1x8xf32> to vector<1x8x1xf32>
    %96 = arith.maximumf %87, %95 : vector<1x8x1xf32>
    %97 = arith.subf %87, %96 : vector<1x8x1xf32>
    %98 = math.exp %97 : vector<1x8x1xf32>
    %99 = vector.broadcast %96 : vector<1x8x1xf32> to vector<1x8x16xf32>
    %100 = arith.subf %84, %99 : vector<1x8x16xf32>
    %101 = math.exp %100 : vector<1x8x16xf32>
    %102 = arith.mulf %98, %90 : vector<1x8x1xf32>
    %cst_50 = arith.constant dense<0.000000e+00> : vector<1x8xf32>
    %103 = vector.multi_reduction <add>, %101, %cst_50 [2] : vector<1x8x16xf32> to vector<1x8xf32>
    %104 = vector.shape_cast %103 : vector<1x8xf32> to vector<1x8x1xf32>
    %105 = arith.addf %102, %104 : vector<1x8x1xf32>
    %106 = vector.broadcast %98 : vector<1x8x1xf32> to vector<1x8x16xf32>
    %107 = arith.mulf %106, %93 : vector<1x8x16xf32>
    "tpu.trace_start"() <{level = 10 : i32, message = "bqk,bkd->bqd"}> : () -> ()
    %cst_51 = arith.constant dense<0.000000e+00> : vector<1x8x16xf32>
    %108 = tpu.matmul %101, %83, %cst_51 {dimension_numbers = #tpu.dot_dimension_numbers<[2], [1], [1], [2], [0, 0, 0, 1, 1, 2], [0], [0]>} : vector<1x8x16xf32>, vector<1x16x16xf32>, vector<1x8x16xf32> -> vector<1x8x16xf32>
    "tpu.trace_stop"() : () -> ()
    %109 = arith.addf %107, %108 : vector<1x8x16xf32>
    %110 = vector.shape_cast %96 : vector<1x8x1xf32> to vector<8x1xf32>
    %c1_52 = arith.constant 1 : index
    %c0_53 = arith.constant 0 : index
    %c0_54 = arith.constant 0 : index
    %111 = vector.load %arg10[%c1_52, %c0_53, %c0_54] : memref<4x8x1xf32, #tpu.memory_space<vmem>>, vector<1x8x1xf32>
    %112 = vector.shape_cast %111 : vector<1x8x1xf32> to vector<8x1xf32>
    %113 = vector.shape_cast %110 : vector<8x1xf32> to vector<1x8x1xf32>
    tpu.vector_store %arg10[%c1_52, %c0_53, %c0_54], %113 {strides = array<i32>} : memref<4x8x1xf32, #tpu.memory_space<vmem>>, vector<1x8x1xf32>,
    %114 = vector.shape_cast %105 : vector<1x8x1xf32> to vector<8x1xf32>
    %c1_55 = arith.constant 1 : index
    %c0_56 = arith.constant 0 : index
    %c0_57 = arith.constant 0 : index
    %115 = vector.load %arg11[%c1_55, %c0_56, %c0_57] : memref<4x8x1xf32, #tpu.memory_space<vmem>>, vector<1x8x1xf32>
    %116 = vector.shape_cast %115 : vector<1x8x1xf32> to vector<8x1xf32>
    %117 = vector.shape_cast %114 : vector<8x1xf32> to vector<1x8x1xf32>
    tpu.vector_store %arg11[%c1_55, %c0_56, %c0_57], %117 {strides = array<i32>} : memref<4x8x1xf32, #tpu.memory_space<vmem>>, vector<1x8x1xf32>,
    %118 = vector.shape_cast %109 : vector<1x8x16xf32> to vector<8x16xf32>
    %c1_58 = arith.constant 1 : index
    %c0_59 = arith.constant 0 : index
    %c0_60 = arith.constant 0 : index
    %119 = vector.load %arg12[%c1_58, %c0_59, %c0_60] : memref<4x8x16xf32, #tpu.memory_space<vmem>>, vector<1x8x16xf32>
    %120 = vector.shape_cast %119 : vector<1x8x16xf32> to vector<8x16xf32>
    %121 = vector.shape_cast %118 : vector<8x16xf32> to vector<1x8x16xf32>
    tpu.vector_store %arg12[%c1_58, %c0_59, %c0_60], %121 {strides = array<i32>} : memref<4x8x16xf32, #tpu.memory_space<vmem>>, vector<1x8x16xf32>,
    %122 = vector.extract_strided_slice %33 {offsets = [0, 32], sizes = [8, 16], strides = [1, 1]} : vector<8x64xf32> to vector<8x16xf32>
    %123 = vector.shape_cast %122 : vector<8x16xf32> to vector<1x8x16xf32>
    %124 = vector.extract_strided_slice %31 {offsets = [0, 32], sizes = [16, 16], strides = [1, 1]} : vector<16x64xf32> to vector<16x16xf32>
    %125 = vector.shape_cast %124 : vector<16x16xf32> to vector<1x16x16xf32>
    %126 = vector.extract_strided_slice %32 {offsets = [0, 32], sizes = [16, 16], strides = [1, 1]} : vector<16x64xf32> to vector<16x16xf32>
    %127 = vector.shape_cast %126 : vector<16x16xf32> to vector<1x16x16xf32>
    "tpu.trace_start"() <{level = 10 : i32, message = "bqd,bkd->bqk"}> : () -> ()
    %cst_61 = arith.constant dense<0.000000e+00> : vector<1x8x16xf32>
    %128 = tpu.matmul %123, %125, %cst_61 {dimension_numbers = #tpu.dot_dimension_numbers<[2], [2], [1], [1], [0, 0, 0, 1, 1, 1], [0], [0]>} : vector<1x8x16xf32>, vector<1x16x16xf32>, vector<1x8x16xf32> -> vector<1x8x16xf32>
    "tpu.trace_stop"() : () -> ()
    %c2_62 = arith.constant 2 : index
    %c0_63 = arith.constant 0 : index
    %c0_64 = arith.constant 0 : index
    %129 = vector.load %arg10[%c2_62, %c0_63, %c0_64] : memref<4x8x1xf32, #tpu.memory_space<vmem>>, vector<1x8x1xf32>
    %130 = vector.shape_cast %129 : vector<1x8x1xf32> to vector<8x1xf32>
    %131 = vector.shape_cast %130 : vector<8x1xf32> to vector<1x8x1xf32>
    %c2_65 = arith.constant 2 : index
    %c0_66 = arith.constant 0 : index
    %c0_67 = arith.constant 0 : index
    %132 = vector.load %arg11[%c2_65, %c0_66, %c0_67] : memref<4x8x1xf32, #tpu.memory_space<vmem>>, vector<1x8x1xf32>
    %133 = vector.shape_cast %132 : vector<1x8x1xf32> to vector<8x1xf32>
    %134 = vector.shape_cast %133 : vector<8x1xf32> to vector<1x8x1xf32>
    %c2_68 = arith.constant 2 : index
    %c0_69 = arith.constant 0 : index
    %c0_70 = arith.constant 0 : index
    %135 = vector.load %arg12[%c2_68, %c0_69, %c0_70] : memref<4x8x16xf32, #tpu.memory_space<vmem>>, vector<1x8x16xf32>
    %136 = vector.shape_cast %135 : vector<1x8x16xf32> to vector<8x16xf32>
    %137 = vector.shape_cast %136 : vector<8x16xf32> to vector<1x8x16xf32>
    %cst_71 = arith.constant dense<0xFF800000> : vector<1x8xf32>
    %138 = vector.multi_reduction <maximumf>, %128, %cst_71 [2] : vector<1x8x16xf32> to vector<1x8xf32>
    %139 = vector.shape_cast %138 : vector<1x8xf32> to vector<1x8x1xf32>
    %140 = arith.maximumf %131, %139 : vector<1x8x1xf32>
    %141 = arith.subf %131, %140 : vector<1x8x1xf32>
    %142 = math.exp %141 : vector<1x8x1xf32>
    %143 = vector.broadcast %140 : vector<1x8x1xf32> to vector<1x8x16xf32>
    %144 = arith.subf %128, %143 : vector<1x8x16xf32>
    %145 = math.exp %144 : vector<1x8x16xf32>
    %146 = arith.mulf %142, %134 : vector<1x8x1xf32>
    %cst_72 = arith.constant dense<0.000000e+00> : vector<1x8xf32>
    %147 = vector.multi_reduction <add>, %145, %cst_72 [2] : vector<1x8x16xf32> to vector<1x8xf32>
    %148 = vector.shape_cast %147 : vector<1x8xf32> to vector<1x8x1xf32>
    %149 = arith.addf %146, %148 : vector<1x8x1xf32>
    %150 = vector.broadcast %142 : vector<1x8x1xf32> to vector<1x8x16xf32>
    %151 = arith.mulf %150, %137 : vector<1x8x16xf32>
    "tpu.trace_start"() <{level = 10 : i32, message = "bqk,bkd->bqd"}> : () -> ()
    %cst_73 = arith.constant dense<0.000000e+00> : vector<1x8x16xf32>
    %152 = tpu.matmul %145, %127, %cst_73 {dimension_numbers = #tpu.dot_dimension_numbers<[2], [1], [1], [2], [0, 0, 0, 1, 1, 2], [0], [0]>} : vector<1x8x16xf32>, vector<1x16x16xf32>, vector<1x8x16xf32> -> vector<1x8x16xf32>
    "tpu.trace_stop"() : () -> ()
    %153 = arith.addf %151, %152 : vector<1x8x16xf32>
    %154 = vector.shape_cast %140 : vector<1x8x1xf32> to vector<8x1xf32>
    %c2_74 = arith.constant 2 : index
    %c0_75 = arith.constant 0 : index
    %c0_76 = arith.constant 0 : index
    %155 = vector.load %arg10[%c2_74, %c0_75, %c0_76] : memref<4x8x1xf32, #tpu.memory_space<vmem>>, vector<1x8x1xf32>
    %156 = vector.shape_cast %155 : vector<1x8x1xf32> to vector<8x1xf32>
    %157 = vector.shape_cast %154 : vector<8x1xf32> to vector<1x8x1xf32>
    tpu.vector_store %arg10[%c2_74, %c0_75, %c0_76], %157 {strides = array<i32>} : memref<4x8x1xf32, #tpu.memory_space<vmem>>, vector<1x8x1xf32>,
    %158 = vector.shape_cast %149 : vector<1x8x1xf32> to vector<8x1xf32>
    %c2_77 = arith.constant 2 : index
    %c0_78 = arith.constant 0 : index
    %c0_79 = arith.constant 0 : index
    %159 = vector.load %arg11[%c2_77, %c0_78, %c0_79] : memref<4x8x1xf32, #tpu.memory_space<vmem>>, vector<1x8x1xf32>
    %160 = vector.shape_cast %159 : vector<1x8x1xf32> to vector<8x1xf32>
    %161 = vector.shape_cast %158 : vector<8x1xf32> to vector<1x8x1xf32>
    tpu.vector_store %arg11[%c2_77, %c0_78, %c0_79], %161 {strides = array<i32>} : memref<4x8x1xf32, #tpu.memory_space<vmem>>, vector<1x8x1xf32>,
    %162 = vector.shape_cast %153 : vector<1x8x16xf32> to vector<8x16xf32>
    %c2_80 = arith.constant 2 : index
    %c0_81 = arith.constant 0 : index
    %c0_82 = arith.constant 0 : index
    %163 = vector.load %arg12[%c2_80, %c0_81, %c0_82] : memref<4x8x16xf32, #tpu.memory_space<vmem>>, vector<1x8x16xf32>
    %164 = vector.shape_cast %163 : vector<1x8x16xf32> to vector<8x16xf32>
    %165 = vector.shape_cast %162 : vector<8x16xf32> to vector<1x8x16xf32>
    tpu.vector_store %arg12[%c2_80, %c0_81, %c0_82], %165 {strides = array<i32>} : memref<4x8x16xf32, #tpu.memory_space<vmem>>, vector<1x8x16xf32>,
    %166 = vector.extract_strided_slice %33 {offsets = [0, 48], sizes = [8, 16], strides = [1, 1]} : vector<8x64xf32> to vector<8x16xf32>
    %167 = vector.shape_cast %166 : vector<8x16xf32> to vector<1x8x16xf32>
    %168 = vector.extract_strided_slice %31 {offsets = [0, 48], sizes = [16, 16], strides = [1, 1]} : vector<16x64xf32> to vector<16x16xf32>
    %169 = vector.shape_cast %168 : vector<16x16xf32> to vector<1x16x16xf32>
    %170 = vector.extract_strided_slice %32 {offsets = [0, 48], sizes = [16, 16], strides = [1, 1]} : vector<16x64xf32> to vector<16x16xf32>
    %171 = vector.shape_cast %170 : vector<16x16xf32> to vector<1x16x16xf32>
    "tpu.trace_start"() <{level = 10 : i32, message = "bqd,bkd->bqk"}> : () -> ()
    %cst_83 = arith.constant dense<0.000000e+00> : vector<1x8x16xf32>
    %172 = tpu.matmul %167, %169, %cst_83 {dimension_numbers = #tpu.dot_dimension_numbers<[2], [2], [1], [1], [0, 0, 0, 1, 1, 1], [0], [0]>} : vector<1x8x16xf32>, vector<1x16x16xf32>, vector<1x8x16xf32> -> vector<1x8x16xf32>
    "tpu.trace_stop"() : () -> ()
    %c3_84 = arith.constant 3 : index
    %c0_85 = arith.constant 0 : index
    %c0_86 = arith.constant 0 : index
    %173 = vector.load %arg10[%c3_84, %c0_85, %c0_86] : memref<4x8x1xf32, #tpu.memory_space<vmem>>, vector<1x8x1xf32>
    %174 = vector.shape_cast %173 : vector<1x8x1xf32> to vector<8x1xf32>
    %175 = vector.shape_cast %174 : vector<8x1xf32> to vector<1x8x1xf32>
    %c3_87 = arith.constant 3 : index
    %c0_88 = arith.constant 0 : index
    %c0_89 = arith.constant 0 : index
    %176 = vector.load %arg11[%c3_87, %c0_88, %c0_89] : memref<4x8x1xf32, #tpu.memory_space<vmem>>, vector<1x8x1xf32>
    %177 = vector.shape_cast %176 : vector<1x8x1xf32> to vector<8x1xf32>
    %178 = vector.shape_cast %177 : vector<8x1xf32> to vector<1x8x1xf32>
    %c3_90 = arith.constant 3 : index
    %c0_91 = arith.constant 0 : index
    %c0_92 = arith.constant 0 : index
    %179 = vector.load %arg12[%c3_90, %c0_91, %c0_92] : memref<4x8x16xf32, #tpu.memory_space<vmem>>, vector<1x8x16xf32>
    %180 = vector.shape_cast %179 : vector<1x8x16xf32> to vector<8x16xf32>
    %181 = vector.shape_cast %180 : vector<8x16xf32> to vector<1x8x16xf32>
    %cst_93 = arith.constant dense<0xFF800000> : vector<1x8xf32>
    %182 = vector.multi_reduction <maximumf>, %172, %cst_93 [2] : vector<1x8x16xf32> to vector<1x8xf32>
    %183 = vector.shape_cast %182 : vector<1x8xf32> to vector<1x8x1xf32>
    %184 = arith.maximumf %175, %183 : vector<1x8x1xf32>
    %185 = arith.subf %175, %184 : vector<1x8x1xf32>
    %186 = math.exp %185 : vector<1x8x1xf32>
    %187 = vector.broadcast %184 : vector<1x8x1xf32> to vector<1x8x16xf32>
    %188 = arith.subf %172, %187 : vector<1x8x16xf32>
    %189 = math.exp %188 : vector<1x8x16xf32>
    %190 = arith.mulf %186, %178 : vector<1x8x1xf32>
    %cst_94 = arith.constant dense<0.000000e+00> : vector<1x8xf32>
    %191 = vector.multi_reduction <add>, %189, %cst_94 [2] : vector<1x8x16xf32> to vector<1x8xf32>
    %192 = vector.shape_cast %191 : vector<1x8xf32> to vector<1x8x1xf32>
    %193 = arith.addf %190, %192 : vector<1x8x1xf32>
    %194 = vector.broadcast %186 : vector<1x8x1xf32> to vector<1x8x16xf32>
    %195 = arith.mulf %194, %181 : vector<1x8x16xf32>
    "tpu.trace_start"() <{level = 10 : i32, message = "bqk,bkd->bqd"}> : () -> ()
    %cst_95 = arith.constant dense<0.000000e+00> : vector<1x8x16xf32>
    %196 = tpu.matmul %189, %171, %cst_95 {dimension_numbers = #tpu.dot_dimension_numbers<[2], [1], [1], [2], [0, 0, 0, 1, 1, 2], [0], [0]>} : vector<1x8x16xf32>, vector<1x16x16xf32>, vector<1x8x16xf32> -> vector<1x8x16xf32>
    "tpu.trace_stop"() : () -> ()
    %197 = arith.addf %195, %196 : vector<1x8x16xf32>
    %198 = vector.shape_cast %184 : vector<1x8x1xf32> to vector<8x1xf32>
    %c3_96 = arith.constant 3 : index
    %c0_97 = arith.constant 0 : index
    %c0_98 = arith.constant 0 : index
    %199 = vector.load %arg10[%c3_96, %c0_97, %c0_98] : memref<4x8x1xf32, #tpu.memory_space<vmem>>, vector<1x8x1xf32>
    %200 = vector.shape_cast %199 : vector<1x8x1xf32> to vector<8x1xf32>
    %201 = vector.shape_cast %198 : vector<8x1xf32> to vector<1x8x1xf32>
    tpu.vector_store %arg10[%c3_96, %c0_97, %c0_98], %201 {strides = array<i32>} : memref<4x8x1xf32, #tpu.memory_space<vmem>>, vector<1x8x1xf32>,
    %202 = vector.shape_cast %193 : vector<1x8x1xf32> to vector<8x1xf32>
    %c3_99 = arith.constant 3 : index
    %c0_100 = arith.constant 0 : index
    %c0_101 = arith.constant 0 : index
    %203 = vector.load %arg11[%c3_99, %c0_100, %c0_101] : memref<4x8x1xf32, #tpu.memory_space<vmem>>, vector<1x8x1xf32>
    %204 = vector.shape_cast %203 : vector<1x8x1xf32> to vector<8x1xf32>
    %205 = vector.shape_cast %202 : vector<8x1xf32> to vector<1x8x1xf32>
    tpu.vector_store %arg11[%c3_99, %c0_100, %c0_101], %205 {strides = array<i32>} : memref<4x8x1xf32, #tpu.memory_space<vmem>>, vector<1x8x1xf32>,
    %206 = vector.shape_cast %197 : vector<1x8x16xf32> to vector<8x16xf32>
    %c3_102 = arith.constant 3 : index
    %c0_103 = arith.constant 0 : index
    %c0_104 = arith.constant 0 : index
    %207 = vector.load %arg12[%c3_102, %c0_103, %c0_104] : memref<4x8x16xf32, #tpu.memory_space<vmem>>, vector<1x8x16xf32>
    %208 = vector.shape_cast %207 : vector<1x8x16xf32> to vector<8x16xf32>
    %209 = vector.shape_cast %206 : vector<8x16xf32> to vector<1x8x16xf32>
    tpu.vector_store %arg12[%c3_102, %c0_103, %c0_104], %209 {strides = array<i32>} : memref<4x8x16xf32, #tpu.memory_space<vmem>>, vector<1x8x16xf32>,
    %c0_i32_105 = arith.constant 0 : i32
    %210 = arith.cmpi eq, %arg1, %c0_i32_105 : i32
    %211 = arith.extui %210 : i1 to i32
    %c0_i32_106 = arith.constant 0 : i32
    %212 = arith.cmpi ne, %211, %c0_i32_106 : i32
    scf.if %212 {
      %c0_107 = arith.constant 0 : index
      %c0_108 = arith.constant 0 : index
      %c0_109 = arith.constant 0 : index
      %213 = vector.load %arg11[%c0_107, %c0_108, %c0_109] : memref<4x8x1xf32, #tpu.memory_space<vmem>>, vector<1x8x1xf32>
      %214 = vector.shape_cast %213 : vector<1x8x1xf32> to vector<8x1xf32>
      %cst_110 = arith.constant 1.000000e+00 : f32
      %215 = vector.broadcast %cst_110 : f32 to vector<8x1xf32>
      %216 = arith.divf %215, %214 : vector<8x1xf32>
      %c0_111 = arith.constant 0 : index
      %c0_112 = arith.constant 0 : index
      %c0_113 = arith.constant 0 : index
      %217 = vector.load %arg12[%c0_111, %c0_112, %c0_113] : memref<4x8x16xf32, #tpu.memory_space<vmem>>, vector<1x8x16xf32>
      %218 = vector.shape_cast %217 : vector<1x8x16xf32> to vector<8x16xf32>
      %219 = vector.broadcast %216 : vector<8x1xf32> to vector<8x16xf32>
      %220 = arith.mulf %218, %219 : vector<8x16xf32>
      %c1_114 = arith.constant 1 : index
      %c0_115 = arith.constant 0 : index
      %c0_116 = arith.constant 0 : index
      %221 = vector.load %arg11[%c1_114, %c0_115, %c0_116] : memref<4x8x1xf32, #tpu.memory_space<vmem>>, vector<1x8x1xf32>
      %222 = vector.shape_cast %221 : vector<1x8x1xf32> to vector<8x1xf32>
      %cst_117 = arith.constant 1.000000e+00 : f32
      %223 = vector.broadcast %cst_117 : f32 to vector<8x1xf32>
      %224 = arith.divf %223, %222 : vector<8x1xf32>
      %c1_118 = arith.constant 1 : index
      %c0_119 = arith.constant 0 : index
      %c0_120 = arith.constant 0 : index
      %225 = vector.load %arg12[%c1_118, %c0_119, %c0_120] : memref<4x8x16xf32, #tpu.memory_space<vmem>>, vector<1x8x16xf32>
      %226 = vector.shape_cast %225 : vector<1x8x16xf32> to vector<8x16xf32>
      %227 = vector.broadcast %224 : vector<8x1xf32> to vector<8x16xf32>
      %228 = arith.mulf %226, %227 : vector<8x16xf32>
      %c2_121 = arith.constant 2 : index
      %c0_122 = arith.constant 0 : index
      %c0_123 = arith.constant 0 : index
      %229 = vector.load %arg11[%c2_121, %c0_122, %c0_123] : memref<4x8x1xf32, #tpu.memory_space<vmem>>, vector<1x8x1xf32>
      %230 = vector.shape_cast %229 : vector<1x8x1xf32> to vector<8x1xf32>
      %cst_124 = arith.constant 1.000000e+00 : f32
      %231 = vector.broadcast %cst_124 : f32 to vector<8x1xf32>
      %232 = arith.divf %231, %230 : vector<8x1xf32>
      %c2_125 = arith.constant 2 : index
      %c0_126 = arith.constant 0 : index
      %c0_127 = arith.constant 0 : index
      %233 = vector.load %arg12[%c2_125, %c0_126, %c0_127] : memref<4x8x16xf32, #tpu.memory_space<vmem>>, vector<1x8x16xf32>
      %234 = vector.shape_cast %233 : vector<1x8x16xf32> to vector<8x16xf32>
      %235 = vector.broadcast %232 : vector<8x1xf32> to vector<8x16xf32>
      %236 = arith.mulf %234, %235 : vector<8x16xf32>
      %c3_128 = arith.constant 3 : index
      %c0_129 = arith.constant 0 : index
      %c0_130 = arith.constant 0 : index
      %237 = vector.load %arg11[%c3_128, %c0_129, %c0_130] : memref<4x8x1xf32, #tpu.memory_space<vmem>>, vector<1x8x1xf32>
      %238 = vector.shape_cast %237 : vector<1x8x1xf32> to vector<8x1xf32>
      %cst_131 = arith.constant 1.000000e+00 : f32
      %239 = vector.broadcast %cst_131 : f32 to vector<8x1xf32>
      %240 = arith.divf %239, %238 : vector<8x1xf32>
      %c3_132 = arith.constant 3 : index
      %c0_133 = arith.constant 0 : index
      %c0_134 = arith.constant 0 : index
      %241 = vector.load %arg12[%c3_132, %c0_133, %c0_134] : memref<4x8x16xf32, #tpu.memory_space<vmem>>, vector<1x8x16xf32>
      %242 = vector.shape_cast %241 : vector<1x8x16xf32> to vector<8x16xf32>
      %243 = vector.broadcast %240 : vector<8x1xf32> to vector<8x16xf32>
      %244 = arith.mulf %242, %243 : vector<8x16xf32>
      %245 = tpu.concatenate %220, %228, %236, %244 in 1 : vector<8x16xf32>, vector<8x16xf32>, vector<8x16xf32>, vector<8x16xf32> -> vector<8x64xf32>
      %c0_135 = arith.constant 0 : index
      %c0_136 = arith.constant 0 : index
      %246 = vector.load %arg7[%c0_135, %c0_136] : memref<64x128xf32, #tpu.memory_space<vmem>>, vector<64x128xf32>
      %cst_137 = arith.constant dense<0.000000e+00> : vector<8x128xf32>
      %247 = tpu.matmul %245, %246, %cst_137 {dimension_numbers = #tpu.dot_dimension_numbers<[1], [0], [0], [1], [0, 0, 1, 1], [], []>} : vector<8x64xf32>, vector<64x128xf32>, vector<8x128xf32> -> vector<8x128xf32>
      %248 = vector.shape_cast %247 : vector<8x128xf32> to vector<1x8x128xf32>
      %c0_138 = arith.constant 0 : index
      %c0_139 = arith.constant 0 : index
      %c0_140 = arith.constant 0 : index
      %249 = vector.load %arg8[%c0_138, %c0_139, %c0_140] : memref<1x8x128xf32, #tpu.memory_space<vmem>>, vector<1x8x128xf32>
      tpu.vector_store %arg8[%c0_138, %c0_139, %c0_140], %248 {strides = array<i32>} : memref<1x8x128xf32, #tpu.memory_space<vmem>>, vector<1x8x128xf32>,
    } else {
    }
    return
  }
  func.func @transform_0(%arg0: i32, %arg1: i32) -> (i32, i32, i32) {
    %c0_i32 = arith.constant 0 : i32
    %c0_i32_0 = arith.constant 0 : i32
    return %arg0, %arg1, %c0_i32 : i32, i32, i32
  }
  func.func @transform_1(%arg0: i32, %arg1: i32) -> (i32, i32, i32) {
    %c0_i32 = arith.constant 0 : i32
    %c0_i32_0 = arith.constant 0 : i32
    %c0_i32_1 = arith.constant 0 : i32
    return %arg0, %c0_i32, %c0_i32_0 : i32, i32, i32
  }
  func.func @transform_2(%arg0: i32, %arg1: i32) -> (i32, i32) {
    %c0_i32 = arith.constant 0 : i32
    %c0_i32_0 = arith.constant 0 : i32
    %c0_i32_1 = arith.constant 0 : i32
    return %c0_i32, %c0_i32_0 : i32, i32
  }
  func.func @transform_3(%arg0: i32, %arg1: i32) -> (i32, i32) {
    %c0_i32 = arith.constant 0 : i32
    %c0_i32_0 = arith.constant 0 : i32
    %c0_i32_1 = arith.constant 0 : i32
    return %c0_i32, %c0_i32_0 : i32, i32
  }
  func.func @transform_4(%arg0: i32, %arg1: i32) -> (i32, i32) {
    %c0_i32 = arith.constant 0 : i32
    %c0_i32_0 = arith.constant 0 : i32
    %c0_i32_1 = arith.constant 0 : i32
    return %c0_i32, %c0_i32_0 : i32, i32
  }
  func.func @transform_5(%arg0: i32, %arg1: i32) -> (i32, i32) {
    %c0_i32 = arith.constant 0 : i32
    %c0_i32_0 = arith.constant 0 : i32
    %c0_i32_1 = arith.constant 0 : i32
    return %c0_i32, %c0_i32_0 : i32, i32
  }
  func.func @transform_6(%arg0: i32, %arg1: i32) -> (i32, i32, i32) {
    %c0_i32 = arith.constant 0 : i32
    %c0_i32_0 = arith.constant 0 : i32
    %c0_i32_1 = arith.constant 0 : i32
    return %arg0, %c0_i32, %c0_i32_0 : i32, i32, i32
  }
}

module attributes {stable_mosaic.version = 11 : i64} {
  func.func @_perceiver_attn_kernel(%arg0: i32, %arg1: i32, %arg2: memref<1x16x32xf32, #tpu.memory_space<vmem>>, %arg3: memref<1x8x32xf32, #tpu.memory_space<vmem>>, %arg4: memref<4x32xf32, #tpu.memory_space<vmem>>, %arg5: memref<32x192xf32, #tpu.memory_space<vmem>>, %arg6: memref<32x128xf32, #tpu.memory_space<vmem>>, %arg7: memref<64x128xf32, #tpu.memory_space<vmem>>, %arg8: memref<1x8x128xf32, #tpu.memory_space<vmem>>, %arg9: memref<8x64xf32, #tpu.memory_space<vmem>>, %arg10: memref<4x8x1xf32, #tpu.memory_space<vmem>>, %arg11: memref<4x8x1xf32, #tpu.memory_space<vmem>>, %arg12: memref<4x8x16xf32, #tpu.memory_space<vmem>>) attributes {dimension_semantics = [#tpu.dimension_semantics<parallel>, #tpu.dimension_semantics<arbitrary>], iteration_bounds = array<i64: 2, 1>, scalar_prefetch = 0 : i64, scratch_operands = 4 : i64, tpu.core_type = #tpu.core_type<tc>, window_params = [{transform_indices = @transform_0, window_bounds = array<i64: 1, 16, 32>}, {transform_indices = @transform_1, window_bounds = array<i64: 1, 8, 32>}, {pipeline_mode = #tpu.pipeline_mode<synchronous>, transform_indices = @transform_2, window_bounds = array<i64: 4, 32>}, {pipeline_mode = #tpu.pipeline_mode<synchronous>, transform_indices = @transform_3, window_bounds = array<i64: 32, 192>}, {pipeline_mode = #tpu.pipeline_mode<synchronous>, transform_indices = @transform_4, window_bounds = array<i64: 32, 128>}, {pipeline_mode = #tpu.pipeline_mode<synchronous>, transform_indices = @transform_5, window_bounds = array<i64: 64, 128>}, {transform_indices = @transform_6, window_bounds = array<i64: 1, 8, 128>}]} {
    %c0 = arith.constant 0 : index
    %c0_0 = arith.constant 0 : index
    %0 = vector.load %arg4[%c0, %c0_0] : memref<4x32xf32, #tpu.memory_space<vmem>>, vector<1x32xf32>
    %c1 = arith.constant 1 : index
    %c0_1 = arith.constant 0 : index
    %1 = vector.load %arg4[%c1, %c0_1] : memref<4x32xf32, #tpu.memory_space<vmem>>, vector<1x32xf32>
    %c2 = arith.constant 2 : index
    %c0_2 = arith.constant 0 : index
    %2 = vector.load %arg4[%c2, %c0_2] : memref<4x32xf32, #tpu.memory_space<vmem>>, vector<1x32xf32>
    %c3 = arith.constant 3 : index
    %c0_3 = arith.constant 0 : index
    %3 = vector.load %arg4[%c3, %c0_3] : memref<4x32xf32, #tpu.memory_space<vmem>>, vector<1x32xf32>
    %c0_i32 = arith.constant 0 : i32
    %4 = arith.cmpi eq, %arg1, %c0_i32 : i32
    %5 = arith.extui %4 : i1 to i32
    %c0_i32_4 = arith.constant 0 : i32
    %6 = arith.cmpi ne, %5, %c0_i32_4 : i32
    scf.if %6 {
      %c0_107 = arith.constant 0 : index
      %c0_108 = arith.constant 0 : index
      %c0_109 = arith.constant 0 : index
      %213 = vector.load %arg3[%c0_107, %c0_108, %c0_109] : memref<1x8x32xf32, #tpu.memory_space<vmem>>, vector<1x8x32xf32>
      %214 = vector.shape_cast %213 : vector<1x8x32xf32> to vector<8x32xf32>
      %cst_110 = arith.constant dense<0.000000e+00> : vector<8xf32>
      %215 = vector.multi_reduction <add>, %214, %cst_110 [1] : vector<8x32xf32> to vector<8xf32>
      %216 = vector.shape_cast %215 : vector<8xf32> to vector<8x1xf32>
      %cst_111 = arith.constant 3.200000e+01 : f32
      %217 = vector.broadcast %cst_111 : f32 to vector<8x1xf32>
      %218 = arith.divf %216, %217 : vector<8x1xf32>
      %219 = vector.broadcast %218 : vector<8x1xf32> to vector<8x32xf32>
      %220 = arith.subf %214, %219 : vector<8x32xf32>
      %221 = arith.mulf %220, %220 : vector<8x32xf32>
      %cst_112 = arith.constant dense<0.000000e+00> : vector<8xf32>
      %222 = vector.multi_reduction <add>, %221, %cst_112 [1] : vector<8x32xf32> to vector<8xf32>
      %223 = vector.shape_cast %222 : vector<8xf32> to vector<8x1xf32>
      %cst_113 = arith.constant 3.200000e+01 : f32
      %224 = vector.broadcast %cst_113 : f32 to vector<8x1xf32>
      %225 = arith.divf %223, %224 : vector<8x1xf32>
      %cst_114 = arith.constant 9.99999974E-6 : f32
      %226 = vector.broadcast %cst_114 : f32 to vector<8x1xf32>
      %227 = arith.addf %225, %226 : vector<8x1xf32>
      %228 = math.rsqrt %227 : vector<8x1xf32>
      %229 = vector.broadcast %228 : vector<8x1xf32> to vector<8x32xf32>
      %230 = arith.mulf %220, %229 : vector<8x32xf32>
      %231 = vector.broadcast %2 : vector<1x32xf32> to vector<8x32xf32>
      %232 = arith.mulf %230, %231 : vector<8x32xf32>
      %233 = vector.broadcast %3 : vector<1x32xf32> to vector<8x32xf32>
      %234 = arith.addf %232, %233 : vector<8x32xf32>
      %c0_115 = arith.constant 0 : index
      %c0_116 = arith.constant 0 : index
      %235 = vector.load %arg5[%c0_115, %c0_116] : memref<32x192xf32, #tpu.memory_space<vmem>>, vector<32x192xf32>
      %cst_117 = arith.constant dense<0.000000e+00> : vector<8x192xf32>
      %236 = tpu.matmul %234, %235, %cst_117 {dimension_numbers = #tpu.dot_dimension_numbers<[1], [0], [0], [1], [0, 0, 1, 1], [], []>} : vector<8x32xf32>, vector<32x192xf32>, vector<8x192xf32> -> vector<8x192xf32>
      %237 = vector.extract_strided_slice %236 {offsets = [0, 0], sizes = [8, 64], strides = [1, 1]} : vector<8x192xf32> to vector<8x64xf32>
      %238 = vector.extract_strided_slice %236 {offsets = [0, 64], sizes = [8, 64], strides = [1, 1]} : vector<8x192xf32> to vector<8x64xf32>
      %239 = vector.extract_strided_slice %236 {offsets = [0, 128], sizes = [8, 64], strides = [1, 1]} : vector<8x192xf32> to vector<8x64xf32>
      %c0_118 = arith.constant 0 : index
      %c0_119 = arith.constant 0 : index
      %240 = vector.load %arg9[%c0_118, %c0_119] : memref<8x64xf32, #tpu.memory_space<vmem>>, vector<8x64xf32>
      tpu.vector_store %arg9[%c0_118, %c0_119], %237 {strides = array<i32>} : memref<8x64xf32, #tpu.memory_space<vmem>>, vector<8x64xf32>,
      %241 = vector.extract_strided_slice %237 {offsets = [0, 0], sizes = [8, 16], strides = [1, 1]} : vector<8x64xf32> to vector<8x16xf32>
      %242 = vector.shape_cast %241 : vector<8x16xf32> to vector<1x8x16xf32>
      %243 = vector.extract_strided_slice %238 {offsets = [0, 0], sizes = [8, 16], strides = [1, 1]} : vector<8x64xf32> to vector<8x16xf32>
      %244 = vector.shape_cast %243 : vector<8x16xf32> to vector<1x8x16xf32>
      %245 = vector.extract_strided_slice %239 {offsets = [0, 0], sizes = [8, 16], strides = [1, 1]} : vector<8x64xf32> to vector<8x16xf32>
      %246 = vector.shape_cast %245 : vector<8x16xf32> to vector<1x8x16xf32>
      "tpu.trace_start"() <{level = 10 : i32, message = "bqd,bkd->bqk"}> : () -> ()
      %cst_120 = arith.constant dense<0.000000e+00> : vector<1x8x8xf32>
      %247 = tpu.matmul %242, %244, %cst_120 {dimension_numbers = #tpu.dot_dimension_numbers<[2], [2], [1], [1], [0, 0, 0, 1, 1, 1], [0], [0]>} : vector<1x8x16xf32>, vector<1x8x16xf32>, vector<1x8x8xf32> -> vector<1x8x8xf32>
      "tpu.trace_stop"() : () -> ()
      %cst_121 = arith.constant dense<0xFF800000> : vector<1x8xf32>
      %248 = vector.multi_reduction <maximumf>, %247, %cst_121 [2] : vector<1x8x8xf32> to vector<1x8xf32>
      %249 = vector.shape_cast %248 : vector<1x8xf32> to vector<1x8x1xf32>
      %250 = vector.broadcast %249 : vector<1x8x1xf32> to vector<1x8x8xf32>
      %251 = arith.subf %247, %250 : vector<1x8x8xf32>
      %252 = math.exp %251 : vector<1x8x8xf32>
      %cst_122 = arith.constant dense<0.000000e+00> : vector<1x8xf32>
      %253 = vector.multi_reduction <add>, %252, %cst_122 [2] : vector<1x8x8xf32> to vector<1x8xf32>
      %254 = vector.shape_cast %253 : vector<1x8xf32> to vector<1x8x1xf32>
      "tpu.trace_start"() <{level = 10 : i32, message = "bqk,bkd->bqd"}> : () -> ()
      %cst_123 = arith.constant dense<0.000000e+00> : vector<1x8x16xf32>
      %255 = tpu.matmul %252, %246, %cst_123 {dimension_numbers = #tpu.dot_dimension_numbers<[2], [1], [1], [2], [0, 0, 0, 1, 1, 2], [0], [0]>} : vector<1x8x8xf32>, vector<1x8x16xf32>, vector<1x8x16xf32> -> vector<1x8x16xf32>
      "tpu.trace_stop"() : () -> ()
      %256 = vector.shape_cast %249 : vector<1x8x1xf32> to vector<8x1xf32>
      %c0_124 = arith.constant 0 : index
      %c0_125 = arith.constant 0 : index
      %c0_126 = arith.constant 0 : index
      %257 = vector.load %arg10[%c0_124, %c0_125, %c0_126] : memref<4x8x1xf32, #tpu.memory_space<vmem>>, vector<1x8x1xf32>
      %258 = vector.shape_cast %257 : vector<1x8x1xf32> to vector<8x1xf32>
      %259 = vector.shape_cast %256 : vector<8x1xf32> to vector<1x8x1xf32>
      tpu.vector_store %arg10[%c0_124, %c0_125, %c0_126], %259 {strides = array<i32>} : memref<4x8x1xf32, #tpu.memory_space<vmem>>, vector<1x8x1xf32>,
      %260 = vector.shape_cast %254 : vector<1x8x1xf32> to vector<8x1xf32>
      %c0_127 = arith.constant 0 : index
      %c0_128 = arith.constant 0 : index
      %c0_129 = arith.constant 0 : index
      %261 = vector.load %arg11[%c0_127, %c0_128, %c0_129] : memref<4x8x1xf32, #tpu.memory_space<vmem>>, vector<1x8x1xf32>
      %262 = vector.shape_cast %261 : vector<1x8x1xf32> to vector<8x1xf32>
      %263 = vector.shape_cast %260 : vector<8x1xf32> to vector<1x8x1xf32>
      tpu.vector_store %arg11[%c0_127, %c0_128, %c0_129], %263 {strides = array<i32>} : memref<4x8x1xf32, #tpu.memory_space<vmem>>, vector<1x8x1xf32>,
      %264 = vector.shape_cast %255 : vector<1x8x16xf32> to vector<8x16xf32>
      %c0_130 = arith.constant 0 : index
      %c0_131 = arith.constant 0 : index
      %c0_132 = arith.constant 0 : index
      %265 = vector.load %arg12[%c0_130, %c0_131, %c0_132] : memref<4x8x16xf32, #tpu.memory_space<vmem>>, vector<1x8x16xf32>
      %266 = vector.shape_cast %265 : vector<1x8x16xf32> to vector<8x16xf32>
      %267 = vector.shape_cast %264 : vector<8x16xf32> to vector<1x8x16xf32>
      tpu.vector_store %arg12[%c0_130, %c0_131, %c0_132], %267 {strides = array<i32>} : memref<4x8x16xf32, #tpu.memory_space<vmem>>, vector<1x8x16xf32>,
      %268 = vector.extract_strided_slice %237 {offsets = [0, 16], sizes = [8, 16], strides = [1, 1]} : vector<8x64xf32> to vector<8x16xf32>
      %269 = vector.shape_cast %268 : vector<8x16xf32> to vector<1x8x16xf32>
      %270 = vector.extract_strided_slice %238 {offsets = [0, 16], sizes = [8, 16], strides = [1, 1]} : vector<8x64xf32> to vector<8x16xf32>
      %271 = vector.shape_cast %270 : vector<8x16xf32> to vector<1x8x16xf32>
      %272 = vector.extract_strided_slice %239 {offsets = [0, 16], sizes = [8, 16], strides = [1, 1]} : vector<8x64xf32> to vector<8x16xf32>
      %273 = vector.shape_cast %272 : vector<8x16xf32> to vector<1x8x16xf32>
      "tpu.trace_start"() <{level = 10 : i32, message = "bqd,bkd->bqk"}> : () -> ()
      %cst_133 = arith.constant dense<0.000000e+00> : vector<1x8x8xf32>
      %274 = tpu.matmul %269, %271, %cst_133 {dimension_numbers = #tpu.dot_dimension_numbers<[2], [2], [1], [1], [0, 0, 0, 1, 1, 1], [0], [0]>} : vector<1x8x16xf32>, vector<1x8x16xf32>, vector<1x8x8xf32> -> vector<1x8x8xf32>
      "tpu.trace_stop"() : () -> ()
      %cst_134 = arith.constant dense<0xFF800000> : vector<1x8xf32>
      %275 = vector.multi_reduction <maximumf>, %274, %cst_134 [2] : vector<1x8x8xf32> to vector<1x8xf32>
      %276 = vector.shape_cast %275 : vector<1x8xf32> to vector<1x8x1xf32>
      %277 = vector.broadcast %276 : vector<1x8x1xf32> to vector<1x8x8xf32>
      %278 = arith.subf %274, %277 : vector<1x8x8xf32>
      %279 = math.exp %278 : vector<1x8x8xf32>
      %cst_135 = arith.constant dense<0.000000e+00> : vector<1x8xf32>
      %280 = vector.multi_reduction <add>, %279, %cst_135 [2] : vector<1x8x8xf32> to vector<1x8xf32>
      %281 = vector.shape_cast %280 : vector<1x8xf32> to vector<1x8x1xf32>
      "tpu.trace_start"() <{level = 10 : i32, message = "bqk,bkd->bqd"}> : () -> ()
      %cst_136 = arith.constant dense<0.000000e+00> : vector<1x8x16xf32>
      %282 = tpu.matmul %279, %273, %cst_136 {dimension_numbers = #tpu.dot_dimension_numbers<[2], [1], [1], [2], [0, 0, 0, 1, 1, 2], [0], [0]>} : vector<1x8x8xf32>, vector<1x8x16xf32>, vector<1x8x16xf32> -> vector<1x8x16xf32>
      "tpu.trace_stop"() : () -> ()
      %283 = vector.shape_cast %276 : vector<1x8x1xf32> to vector<8x1xf32>
      %c1_137 = arith.constant 1 : index
      %c0_138 = arith.constant 0 : index
      %c0_139 = arith.constant 0 : index
      %284 = vector.load %arg10[%c1_137, %c0_138, %c0_139] : memref<4x8x1xf32, #tpu.memory_space<vmem>>, vector<1x8x1xf32>
      %285 = vector.shape_cast %284 : vector<1x8x1xf32> to vector<8x1xf32>
      %286 = vector.shape_cast %283 : vector<8x1xf32> to vector<1x8x1xf32>
      tpu.vector_store %arg10[%c1_137, %c0_138, %c0_139], %286 {strides = array<i32>} : memref<4x8x1xf32, #tpu.memory_space<vmem>>, vector<1x8x1xf32>,
      %287 = vector.shape_cast %281 : vector<1x8x1xf32> to vector<8x1xf32>
      %c1_140 = arith.constant 1 : index
      %c0_141 = arith.constant 0 : index
      %c0_142 = arith.constant 0 : index
      %288 = vector.load %arg11[%c1_140, %c0_141, %c0_142] : memref<4x8x1xf32, #tpu.memory_space<vmem>>, vector<1x8x1xf32>
      %289 = vector.shape_cast %288 : vector<1x8x1xf32> to vector<8x1xf32>
      %290 = vector.shape_cast %287 : vector<8x1xf32> to vector<1x8x1xf32>
      tpu.vector_store %arg11[%c1_140, %c0_141, %c0_142], %290 {strides = array<i32>} : memref<4x8x1xf32, #tpu.memory_space<vmem>>, vector<1x8x1xf32>,
      %291 = vector.shape_cast %282 : vector<1x8x16xf32> to vector<8x16xf32>
      %c1_143 = arith.constant 1 : index
      %c0_144 = arith.constant 0 : index
      %c0_145 = arith.constant 0 : index
      %292 = vector.load %arg12[%c1_143, %c0_144, %c0_145] : memref<4x8x16xf32, #tpu.memory_space<vmem>>, vector<1x8x16xf32>
      %293 = vector.shape_cast %292 : vector<1x8x16xf32> to vector<8x16xf32>
      %294 = vector.shape_cast %291 : vector<8x16xf32> to vector<1x8x16xf32>
      tpu.vector_store %arg12[%c1_143, %c0_144, %c0_145], %294 {strides = array<i32>} : memref<4x8x16xf32, #tpu.memory_space<vmem>>, vector<1x8x16xf32>,
      %295 = vector.extract_strided_slice %237 {offsets = [0, 32], sizes = [8, 16], strides = [1, 1]} : vector<8x64xf32> to vector<8x16xf32>
      %296 = vector.shape_cast %295 : vector<8x16xf32> to vector<1x8x16xf32>
      %297 = vector.extract_strided_slice %238 {offsets = [0, 32], sizes = [8, 16], strides = [1, 1]} : vector<8x64xf32> to vector<8x16xf32>
      %298 = vector.shape_cast %297 : vector<8x16xf32> to vector<1x8x16xf32>
      %299 = vector.extract_strided_slice %239 {offsets = [0, 32], sizes = [8, 16], strides = [1, 1]} : vector<8x64xf32> to vector<8x16xf32>
      %300 = vector.shape_cast %299 : vector<8x16xf32> to vector<1x8x16xf32>
      "tpu.trace_start"() <{level = 10 : i32, message = "bqd,bkd->bqk"}> : () -> ()
      %cst_146 = arith.constant dense<0.000000e+00> : vector<1x8x8xf32>
      %301 = tpu.matmul %296, %298, %cst_146 {dimension_numbers = #tpu.dot_dimension_numbers<[2], [2], [1], [1], [0, 0, 0, 1, 1, 1], [0], [0]>} : vector<1x8x16xf32>, vector<1x8x16xf32>, vector<1x8x8xf32> -> vector<1x8x8xf32>
      "tpu.trace_stop"() : () -> ()
      %cst_147 = arith.constant dense<0xFF800000> : vector<1x8xf32>
      %302 = vector.multi_reduction <maximumf>, %301, %cst_147 [2] : vector<1x8x8xf32> to vector<1x8xf32>
      %303 = vector.shape_cast %302 : vector<1x8xf32> to vector<1x8x1xf32>
      %304 = vector.broadcast %303 : vector<1x8x1xf32> to vector<1x8x8xf32>
      %305 = arith.subf %301, %304 : vector<1x8x8xf32>
      %306 = math.exp %305 : vector<1x8x8xf32>
      %cst_148 = arith.constant dense<0.000000e+00> : vector<1x8xf32>
      %307 = vector.multi_reduction <add>, %306, %cst_148 [2] : vector<1x8x8xf32> to vector<1x8xf32>
      %308 = vector.shape_cast %307 : vector<1x8xf32> to vector<1x8x1xf32>
      "tpu.trace_start"() <{level = 10 : i32, message = "bqk,bkd->bqd"}> : () -> ()
      %cst_149 = arith.constant dense<0.000000e+00> : vector<1x8x16xf32>
      %309 = tpu.matmul %306, %300, %cst_149 {dimension_numbers = #tpu.dot_dimension_numbers<[2], [1], [1], [2], [0, 0, 0, 1, 1, 2], [0], [0]>} : vector<1x8x8xf32>, vector<1x8x16xf32>, vector<1x8x16xf32> -> vector<1x8x16xf32>
      "tpu.trace_stop"() : () -> ()
      %310 = vector.shape_cast %303 : vector<1x8x1xf32> to vector<8x1xf32>
      %c2_150 = arith.constant 2 : index
      %c0_151 = arith.constant 0 : index
      %c0_152 = arith.constant 0 : index
      %311 = vector.load %arg10[%c2_150, %c0_151, %c0_152] : memref<4x8x1xf32, #tpu.memory_space<vmem>>, vector<1x8x1xf32>
      %312 = vector.shape_cast %311 : vector<1x8x1xf32> to vector<8x1xf32>
      %313 = vector.shape_cast %310 : vector<8x1xf32> to vector<1x8x1xf32>
      tpu.vector_store %arg10[%c2_150, %c0_151, %c0_152], %313 {strides = array<i32>} : memref<4x8x1xf32, #tpu.memory_space<vmem>>, vector<1x8x1xf32>,
      %314 = vector.shape_cast %308 : vector<1x8x1xf32> to vector<8x1xf32>
      %c2_153 = arith.constant 2 : index
      %c0_154 = arith.constant 0 : index
      %c0_155 = arith.constant 0 : index
      %315 = vector.load %arg11[%c2_153, %c0_154, %c0_155] : memref<4x8x1xf32, #tpu.memory_space<vmem>>, vector<1x8x1xf32>
      %316 = vector.shape_cast %315 : vector<1x8x1xf32> to vector<8x1xf32>
      %317 = vector.shape_cast %314 : vector<8x1xf32> to vector<1x8x1xf32>
      tpu.vector_store %arg11[%c2_153, %c0_154, %c0_155], %317 {strides = array<i32>} : memref<4x8x1xf32, #tpu.memory_space<vmem>>, vector<1x8x1xf32>,
      %318 = vector.shape_cast %309 : vector<1x8x16xf32> to vector<8x16xf32>
      %c2_156 = arith.constant 2 : index
      %c0_157 = arith.constant 0 : index
      %c0_158 = arith.constant 0 : index
      %319 = vector.load %arg12[%c2_156, %c0_157, %c0_158] : memref<4x8x16xf32, #tpu.memory_space<vmem>>, vector<1x8x16xf32>
      %320 = vector.shape_cast %319 : vector<1x8x16xf32> to vector<8x16xf32>
      %321 = vector.shape_cast %318 : vector<8x16xf32> to vector<1x8x16xf32>
      tpu.vector_store %arg12[%c2_156, %c0_157, %c0_158], %321 {strides = array<i32>} : memref<4x8x16xf32, #tpu.memory_space<vmem>>, vector<1x8x16xf32>,
      %322 = vector.extract_strided_slice %237 {offsets = [0, 48], sizes = [8, 16], strides = [1, 1]} : vector<8x64xf32> to vector<8x16xf32>
      %323 = vector.shape_cast %322 : vector<8x16xf32> to vector<1x8x16xf32>
      %324 = vector.extract_strided_slice %238 {offsets = [0, 48], sizes = [8, 16], strides = [1, 1]} : vector<8x64xf32> to vector<8x16xf32>
      %325 = vector.shape_cast %324 : vector<8x16xf32> to vector<1x8x16xf32>
      %326 = vector.extract_strided_slice %239 {offsets = [0, 48], sizes = [8, 16], strides = [1, 1]} : vector<8x64xf32> to vector<8x16xf32>
      %327 = vector.shape_cast %326 : vector<8x16xf32> to vector<1x8x16xf32>
      "tpu.trace_start"() <{level = 10 : i32, message = "bqd,bkd->bqk"}> : () -> ()
      %cst_159 = arith.constant dense<0.000000e+00> : vector<1x8x8xf32>
      %328 = tpu.matmul %323, %325, %cst_159 {dimension_numbers = #tpu.dot_dimension_numbers<[2], [2], [1], [1], [0, 0, 0, 1, 1, 1], [0], [0]>} : vector<1x8x16xf32>, vector<1x8x16xf32>, vector<1x8x8xf32> -> vector<1x8x8xf32>
      "tpu.trace_stop"() : () -> ()
      %cst_160 = arith.constant dense<0xFF800000> : vector<1x8xf32>
      %329 = vector.multi_reduction <maximumf>, %328, %cst_160 [2] : vector<1x8x8xf32> to vector<1x8xf32>
      %330 = vector.shape_cast %329 : vector<1x8xf32> to vector<1x8x1xf32>
      %331 = vector.broadcast %330 : vector<1x8x1xf32> to vector<1x8x8xf32>
      %332 = arith.subf %328, %331 : vector<1x8x8xf32>
      %333 = math.exp %332 : vector<1x8x8xf32>
      %cst_161 = arith.constant dense<0.000000e+00> : vector<1x8xf32>
      %334 = vector.multi_reduction <add>, %333, %cst_161 [2] : vector<1x8x8xf32> to vector<1x8xf32>
      %335 = vector.shape_cast %334 : vector<1x8xf32> to vector<1x8x1xf32>
      "tpu.trace_start"() <{level = 10 : i32, message = "bqk,bkd->bqd"}> : () -> ()
      %cst_162 = arith.constant dense<0.000000e+00> : vector<1x8x16xf32>
      %336 = tpu.matmul %333, %327, %cst_162 {dimension_numbers = #tpu.dot_dimension_numbers<[2], [1], [1], [2], [0, 0, 0, 1, 1, 2], [0], [0]>} : vector<1x8x8xf32>, vector<1x8x16xf32>, vector<1x8x16xf32> -> vector<1x8x16xf32>
      "tpu.trace_stop"() : () -> ()
      %337 = vector.shape_cast %330 : vector<1x8x1xf32> to vector<8x1xf32>
      %c3_163 = arith.constant 3 : index
      %c0_164 = arith.constant 0 : index
      %c0_165 = arith.constant 0 : index
      %338 = vector.load %arg10[%c3_163, %c0_164, %c0_165] : memref<4x8x1xf32, #tpu.memory_space<vmem>>, vector<1x8x1xf32>
      %339 = vector.shape_cast %338 : vector<1x8x1xf32> to vector<8x1xf32>
      %340 = vector.shape_cast %337 : vector<8x1xf32> to vector<1x8x1xf32>
      tpu.vector_store %arg10[%c3_163, %c0_164, %c0_165], %340 {strides = array<i32>} : memref<4x8x1xf32, #tpu.memory_space<vmem>>, vector<1x8x1xf32>,
      %341 = vector.shape_cast %335 : vector<1x8x1xf32> to vector<8x1xf32>
      %c3_166 = arith.constant 3 : index
      %c0_167 = arith.constant 0 : index
      %c0_168 = arith.constant 0 : index
      %342 = vector.load %arg11[%c3_166, %c0_167, %c0_168] : memref<4x8x1xf32, #tpu.memory_space<vmem>>, vector<1x8x1xf32>
      %343 = vector.shape_cast %342 : vector<1x8x1xf32> to vector<8x1xf32>
      %344 = vector.shape_cast %341 : vector<8x1xf32> to vector<1x8x1xf32>
      tpu.vector_store %arg11[%c3_166, %c0_167, %c0_168], %344 {strides = array<i32>} : memref<4x8x1xf32, #tpu.memory_space<vmem>>, vector<1x8x1xf32>,
      %345 = vector.shape_cast %336 : vector<1x8x16xf32> to vector<8x16xf32>
      %c3_169 = arith.constant 3 : index
      %c0_170 = arith.constant 0 : index
      %c0_171 = arith.constant 0 : index
      %346 = vector.load %arg12[%c3_169, %c0_170, %c0_171] : memref<4x8x16xf32, #tpu.memory_space<vmem>>, vector<1x8x16xf32>
      %347 = vector.shape_cast %346 : vector<1x8x16xf32> to vector<8x16xf32>
      %348 = vector.shape_cast %345 : vector<8x16xf32> to vector<1x8x16xf32>
      tpu.vector_store %arg12[%c3_169, %c0_170, %c0_171], %348 {strides = array<i32>} : memref<4x8x16xf32, #tpu.memory_space<vmem>>, vector<1x8x16xf32>,
    } else {
    }
    %c0_5 = arith.constant 0 : index
    %c0_6 = arith.constant 0 : index
    %c0_7 = arith.constant 0 : index
    %7 = vector.load %arg2[%c0_5, %c0_6, %c0_7] : memref<1x16x32xf32, #tpu.memory_space<vmem>>, vector<1x16x32xf32>
    %8 = vector.shape_cast %7 : vector<1x16x32xf32> to vector<16x32xf32>
    %cst = arith.constant dense<0.000000e+00> : vector<16xf32>
    %9 = vector.multi_reduction <add>, %8, %cst [1] : vector<16x32xf32> to vector<16xf32>
    %10 = vector.shape_cast %9 : vector<16xf32> to vector<16x1xf32>
    %cst_8 = arith.constant 3.200000e+01 : f32
    %11 = vector.broadcast %cst_8 : f32 to vector<16x1xf32>
    %12 = arith.divf %10, %11 : vector<16x1xf32>
    %13 = vector.broadcast %12 : vector<16x1xf32> to vector<16x32xf32>
    %14 = arith.subf %8, %13 : vector<16x32xf32>
    %15 = arith.mulf %14, %14 : vector<16x32xf32>
    %cst_9 = arith.constant dense<0.000000e+00> : vector<16xf32>
    %16 = vector.multi_reduction <add>, %15, %cst_9 [1] : vector<16x32xf32> to vector<16xf32>
    %17 = vector.shape_cast %16 : vector<16xf32> to vector<16x1xf32>
    %cst_10 = arith.constant 3.200000e+01 : f32
    %18 = vector.broadcast %cst_10 : f32 to vector<16x1xf32>
    %19 = arith.divf %17, %18 : vector<16x1xf32>
    %cst_11 = arith.constant 9.99999974E-6 : f32
    %20 = vector.broadcast %cst_11 : f32 to vector<16x1xf32>
    %21 = arith.addf %19, %20 : vector<16x1xf32>
    %22 = math.rsqrt %21 : vector<16x1xf32>
    %23 = vector.broadcast %22 : vector<16x1xf32> to vector<16x32xf32>
    %24 = arith.mulf %14, %23 : vector<16x32xf32>
    %25 = vector.broadcast %0 : vector<1x32xf32> to vector<16x32xf32>
    %26 = arith.mulf %24, %25 : vector<16x32xf32>
    %27 = vector.broadcast %1 : vector<1x32xf32> to vector<16x32xf32>
    %28 = arith.addf %26, %27 : vector<16x32xf32>
    %c0_12 = arith.constant 0 : index
    %c0_13 = arith.constant 0 : index
    %29 = vector.load %arg6[%c0_12, %c0_13] : memref<32x128xf32, #tpu.memory_space<vmem>>, vector<32x128xf32>
    %cst_14 = arith.constant dense<0.000000e+00> : vector<16x128xf32>
    %30 = tpu.matmul %28, %29, %cst_14 {dimension_numbers = #tpu.dot_dimension_numbers<[1], [0], [0], [1], [0, 0, 1, 1], [], []>} : vector<16x32xf32>, vector<32x128xf32>, vector<16x128xf32> -> vector<16x128xf32>
    %31 = vector.extract_strided_slice %30 {offsets = [0, 0], sizes = [16, 64], strides = [1, 1]} : vector<16x128xf32> to vector<16x64xf32>
    %32 = vector.extract_strided_slice %30 {offsets = [0, 64], sizes = [16, 64], strides = [1, 1]} : vector<16x128xf32> to vector<16x64xf32>
    %c0_15 = arith.constant 0 : index
    %c0_16 = arith.constant 0 : index
    %33 = vector.load %arg9[%c0_15, %c0_16] : memref<8x64xf32, #tpu.memory_space<vmem>>, vector<8x64xf32>
    %34 = vector.extract_strided_slice %33 {offsets = [0, 0], sizes = [8, 16], strides = [1, 1]} : vector<8x64xf32> to vector<8x16xf32>
    %35 = vector.shape_cast %34 : vector<8x16xf32> to vector<1x8x16xf32>
    %36 = vector.extract_strided_slice %31 {offsets = [0, 0], sizes = [16, 16], strides = [1, 1]} : vector<16x64xf32> to vector<16x16xf32>
    %37 = vector.shape_cast %36 : vector<16x16xf32> to vector<1x16x16xf32>
    %38 = vector.extract_strided_slice %32 {offsets = [0, 0], sizes = [16, 16], strides = [1, 1]} : vector<16x64xf32> to vector<16x16xf32>
    %39 = vector.shape_cast %38 : vector<16x16xf32> to vector<1x16x16xf32>
    "tpu.trace_start"() <{level = 10 : i32, message = "bqd,bkd->bqk"}> : () -> ()
    %cst_17 = arith.constant dense<0.000000e+00> : vector<1x8x16xf32>
    %40 = tpu.matmul %35, %37, %cst_17 {dimension_numbers = #tpu.dot_dimension_numbers<[2], [2], [1], [1], [0, 0, 0, 1, 1, 1], [0], [0]>} : vector<1x8x16xf32>, vector<1x16x16xf32>, vector<1x8x16xf32> -> vector<1x8x16xf32>
    "tpu.trace_stop"() : () -> ()
    %c0_18 = arith.constant 0 : index
    %c0_19 = arith.constant 0 : index
    %c0_20 = arith.constant 0 : index
    %41 = vector.load %arg10[%c0_18, %c0_19, %c0_20] : memref<4x8x1xf32, #tpu.memory_space<vmem>>, vector<1x8x1xf32>
    %42 = vector.shape_cast %41 : vector<1x8x1xf32> to vector<8x1xf32>
    %43 = vector.shape_cast %42 : vector<8x1xf32> to vector<1x8x1xf32>
    %c0_21 = arith.constant 0 : index
    %c0_22 = arith.constant 0 : index
    %c0_23 = arith.constant 0 : index
    %44 = vector.load %arg11[%c0_21, %c0_22, %c0_23] : memref<4x8x1xf32, #tpu.memory_space<vmem>>, vector<1x8x1xf32>
    %45 = vector.shape_cast %44 : vector<1x8x1xf32> to vector<8x1xf32>
    %46 = vector.shape_cast %45 : vector<8x1xf32> to vector<1x8x1xf32>
    %c0_24 = arith.constant 0 : index
    %c0_25 = arith.constant 0 : index
    %c0_26 = arith.constant 0 : index
    %47 = vector.load %arg12[%c0_24, %c0_25, %c0_26] : memref<4x8x16xf32, #tpu.memory_space<vmem>>, vector<1x8x16xf32>
    %48 = vector.shape_cast %47 : vector<1x8x16xf32> to vector<8x16xf32>
    %49 = vector.shape_cast %48 : vector<8x16xf32> to vector<1x8x16xf32>
    %cst_27 = arith.constant dense<0xFF800000> : vector<1x8xf32>
    %50 = vector.multi_reduction <maximumf>, %40, %cst_27 [2] : vector<1x8x16xf32> to vector<1x8xf32>
    %51 = vector.shape_cast %50 : vector<1x8xf32> to vector<1x8x1xf32>
    %52 = arith.maximumf %43, %51 : vector<1x8x1xf32>
    %53 = arith.subf %43, %52 : vector<1x8x1xf32>
    %54 = math.exp %53 : vector<1x8x1xf32>
    %55 = vector.broadcast %52 : vector<1x8x1xf32> to vector<1x8x16xf32>
    %56 = arith.subf %40, %55 : vector<1x8x16xf32>
    %57 = math.exp %56 : vector<1x8x16xf32>
    %58 = arith.mulf %54, %46 : vector<1x8x1xf32>
    %cst_28 = arith.constant dense<0.000000e+00> : vector<1x8xf32>
    %59 = vector.multi_reduction <add>, %57, %cst_28 [2] : vector<1x8x16xf32> to vector<1x8xf32>
    %60 = vector.shape_cast %59 : vector<1x8xf32> to vector<1x8x1xf32>
    %61 = arith.addf %58, %60 : vector<1x8x1xf32>
    %62 = vector.broadcast %54 : vector<1x8x1xf32> to vector<1x8x16xf32>
    %63 = arith.mulf %62, %49 : vector<1x8x16xf32>
    "tpu.trace_start"() <{level = 10 : i32, message = "bqk,bkd->bqd"}> : () -> ()
    %cst_29 = arith.constant dense<0.000000e+00> : vector<1x8x16xf32>
    %64 = tpu.matmul %57, %39, %cst_29 {dimension_numbers = #tpu.dot_dimension_numbers<[2], [1], [1], [2], [0, 0, 0, 1, 1, 2], [0], [0]>} : vector<1x8x16xf32>, vector<1x16x16xf32>, vector<1x8x16xf32> -> vector<1x8x16xf32>
    "tpu.trace_stop"() : () -> ()
    %65 = arith.addf %63, %64 : vector<1x8x16xf32>
    %66 = vector.shape_cast %52 : vector<1x8x1xf32> to vector<8x1xf32>
    %c0_30 = arith.constant 0 : index
    %c0_31 = arith.constant 0 : index
    %c0_32 = arith.constant 0 : index
    %67 = vector.load %arg10[%c0_30, %c0_31, %c0_32] : memref<4x8x1xf32, #tpu.memory_space<vmem>>, vector<1x8x1xf32>
    %68 = vector.shape_cast %67 : vector<1x8x1xf32> to vector<8x1xf32>
    %69 = vector.shape_cast %66 : vector<8x1xf32> to vector<1x8x1xf32>
    tpu.vector_store %arg10[%c0_30, %c0_31, %c0_32], %69 {strides = array<i32>} : memref<4x8x1xf32, #tpu.memory_space<vmem>>, vector<1x8x1xf32>,
    %70 = vector.shape_cast %61 : vector<1x8x1xf32> to vector<8x1xf32>
    %c0_33 = arith.constant 0 : index
    %c0_34 = arith.constant 0 : index
    %c0_35 = arith.constant 0 : index
    %71 = vector.load %arg11[%c0_33, %c0_34, %c0_35] : memref<4x8x1xf32, #tpu.memory_space<vmem>>, vector<1x8x1xf32>
    %72 = vector.shape_cast %71 : vector<1x8x1xf32> to vector<8x1xf32>
    %73 = vector.shape_cast %70 : vector<8x1xf32> to vector<1x8x1xf32>
    tpu.vector_store %arg11[%c0_33, %c0_34, %c0_35], %73 {strides = array<i32>} : memref<4x8x1xf32, #tpu.memory_space<vmem>>, vector<1x8x1xf32>,
    %74 = vector.shape_cast %65 : vector<1x8x16xf32> to vector<8x16xf32>
    %c0_36 = arith.constant 0 : index
    %c0_37 = arith.constant 0 : index
    %c0_38 = arith.constant 0 : index
    %75 = vector.load %arg12[%c0_36, %c0_37, %c0_38] : memref<4x8x16xf32, #tpu.memory_space<vmem>>, vector<1x8x16xf32>
    %76 = vector.shape_cast %75 : vector<1x8x16xf32> to vector<8x16xf32>
    %77 = vector.shape_cast %74 : vector<8x16xf32> to vector<1x8x16xf32>
    tpu.vector_store %arg12[%c0_36, %c0_37, %c0_38], %77 {strides = array<i32>} : memref<4x8x16xf32, #tpu.memory_space<vmem>>, vector<1x8x16xf32>,
    %78 = vector.extract_strided_slice %33 {offsets = [0, 16], sizes = [8, 16], strides = [1, 1]} : vector<8x64xf32> to vector<8x16xf32>
    %79 = vector.shape_cast %78 : vector<8x16xf32> to vector<1x8x16xf32>
    %80 = vector.extract_strided_slice %31 {offsets = [0, 16], sizes = [16, 16], strides = [1, 1]} : vector<16x64xf32> to vector<16x16xf32>
    %81 = vector.shape_cast %80 : vector<16x16xf32> to vector<1x16x16xf32>
    %82 = vector.extract_strided_slice %32 {offsets = [0, 16], sizes = [16, 16], strides = [1, 1]} : vector<16x64xf32> to vector<16x16xf32>
    %83 = vector.shape_cast %82 : vector<16x16xf32> to vector<1x16x16xf32>
    "tpu.trace_start"() <{level = 10 : i32, message = "bqd,bkd->bqk"}> : () -> ()
    %cst_39 = arith.constant dense<0.000000e+00> : vector<1x8x16xf32>
    %84 = tpu.matmul %79, %81, %cst_39 {dimension_numbers = #tpu.dot_dimension_numbers<[2], [2], [1], [1], [0, 0, 0, 1, 1, 1], [0], [0]>} : vector<1x8x16xf32>, vector<1x16x16xf32>, vector<1x8x16xf32> -> vector<1x8x16xf32>
    "tpu.trace_stop"() : () -> ()
    %c1_40 = arith.constant 1 : index
    %c0_41 = arith.constant 0 : index
    %c0_42 = arith.constant 0 : index
    %85 = vector.load %arg10[%c1_40, %c0_41, %c0_42] : memref<4x8x1xf32, #tpu.memory_space<vmem>>, vector<1x8x1xf32>
    %86 = vector.shape_cast %85 : vector<1x8x1xf32> to vector<8x1xf32>
    %87 = vector.shape_cast %86 : vector<8x1xf32> to vector<1x8x1xf32>
    %c1_43 = arith.constant 1 : index
    %c0_44 = arith.constant 0 : index
    %c0_45 = arith.constant 0 : index
    %88 = vector.load %arg11[%c1_43, %c0_44, %c0_45] : memref<4x8x1xf32, #tpu.memory_space<vmem>>, vector<1x8x1xf32>
    %89 = vector.shape_cast %88 : vector<1x8x1xf32> to vector<8x1xf32>
    %90 = vector.shape_cast %89 : vector<8x1xf32> to vector<1x8x1xf32>
    %c1_46 = arith.constant 1 : index
    %c0_47 = arith.constant 0 : index
    %c0_48 = arith.constant 0 : index
    %91 = vector.load %arg12[%c1_46, %c0_47, %c0_48] : memref<4x8x16xf32, #tpu.memory_space<vmem>>, vector<1x8x16xf32>
    %92 = vector.shape_cast %91 : vector<1x8x16xf32> to vector<8x16xf32>
    %93 = vector.shape_cast %92 : vector<8x16xf32> to vector<1x8x16xf32>
    %cst_49 = arith.constant dense<0xFF800000> : vector<1x8xf32>
    %94 = vector.multi_reduction <maximumf>, %84, %cst_49 [2] : vector<1x8x16xf32> to vector<1x8xf32>
    %95 = vector.shape_cast %94 : vector<1x8xf32> to vector<1x8x1xf32>
    %96 = arith.maximumf %87, %95 : vector<1x8x1xf32>
    %97 = arith.subf %87, %96 : vector<1x8x1xf32>
    %98 = math.exp %97 : vector<1x8x1xf32>
    %99 = vector.broadcast %96 : vector<1x8x1xf32> to vector<1x8x16xf32>
    %100 = arith.subf %84, %99 : vector<1x8x16xf32>
    %101 = math.exp %100 : vector<1x8x16xf32>
    %102 = arith.mulf %98, %90 : vector<1x8x1xf32>
    %cst_50 = arith.constant dense<0.000000e+00> : vector<1x8xf32>
    %103 = vector.multi_reduction <add>, %101, %cst_50 [2] : vector<1x8x16xf32> to vector<1x8xf32>
    %104 = vector.shape_cast %103 : vector<1x8xf32> to vector<1x8x1xf32>
    %105 = arith.addf %102, %104 : vector<1x8x1xf32>
    %106 = vector.broadcast %98 : vector<1x8x1xf32> to vector<1x8x16xf32>
    %107 = arith.mulf %106, %93 : vector<1x8x16xf32>
    "tpu.trace_start"() <{level = 10 : i32, message = "bqk,bkd->bqd"}> : () -> ()
    %cst_51 = arith.constant dense<0.000000e+00> : vector<1x8x16xf32>
    %108 = tpu.matmul %101, %83, %cst_51 {dimension_numbers = #tpu.dot_dimension_numbers<[2], [1], [1], [2], [0, 0, 0, 1, 1, 2], [0], [0]>} : vector<1x8x16xf32>, vector<1x16x16xf32>, vector<1x8x16xf32> -> vector<1x8x16xf32>
    "tpu.trace_stop"() : () -> ()
    %109 = arith.addf %107, %108 : vector<1x8x16xf32>
    %110 = vector.shape_cast %96 : vector<1x8x1xf32> to vector<8x1xf32>
    %c1_52 = arith.constant 1 : index
    %c0_53 = arith.constant 0 : index
    %c0_54 = arith.constant 0 : index
    %111 = vector.load %arg10[%c1_52, %c0_53, %c0_54] : memref<4x8x1xf32, #tpu.memory_space<vmem>>, vector<1x8x1xf32>
    %112 = vector.shape_cast %111 : vector<1x8x1xf32> to vector<8x1xf32>
    %113 = vector.shape_cast %110 : vector<8x1xf32> to vector<1x8x1xf32>
    tpu.vector_store %arg10[%c1_52, %c0_53, %c0_54], %113 {strides = array<i32>} : memref<4x8x1xf32, #tpu.memory_space<vmem>>, vector<1x8x1xf32>,
    %114 = vector.shape_cast %105 : vector<1x8x1xf32> to vector<8x1xf32>
    %c1_55 = arith.constant 1 : index
    %c0_56 = arith.constant 0 : index
    %c0_57 = arith.constant 0 : index
    %115 = vector.load %arg11[%c1_55, %c0_56, %c0_57] : memref<4x8x1xf32, #tpu.memory_space<vmem>>, vector<1x8x1xf32>
    %116 = vector.shape_cast %115 : vector<1x8x1xf32> to vector<8x1xf32>
    %117 = vector.shape_cast %114 : vector<8x1xf32> to vector<1x8x1xf32>
    tpu.vector_store %arg11[%c1_55, %c0_56, %c0_57], %117 {strides = array<i32>} : memref<4x8x1xf32, #tpu.memory_space<vmem>>, vector<1x8x1xf32>,
    %118 = vector.shape_cast %109 : vector<1x8x16xf32> to vector<8x16xf32>
    %c1_58 = arith.constant 1 : index
    %c0_59 = arith.constant 0 : index
    %c0_60 = arith.constant 0 : index
    %119 = vector.load %arg12[%c1_58, %c0_59, %c0_60] : memref<4x8x16xf32, #tpu.memory_space<vmem>>, vector<1x8x16xf32>
    %120 = vector.shape_cast %119 : vector<1x8x16xf32> to vector<8x16xf32>
    %121 = vector.shape_cast %118 : vector<8x16xf32> to vector<1x8x16xf32>
    tpu.vector_store %arg12[%c1_58, %c0_59, %c0_60], %121 {strides = array<i32>} : memref<4x8x16xf32, #tpu.memory_space<vmem>>, vector<1x8x16xf32>,
    %122 = vector.extract_strided_slice %33 {offsets = [0, 32], sizes = [8, 16], strides = [1, 1]} : vector<8x64xf32> to vector<8x16xf32>
    %123 = vector.shape_cast %122 : vector<8x16xf32> to vector<1x8x16xf32>
    %124 = vector.extract_strided_slice %31 {offsets = [0, 32], sizes = [16, 16], strides = [1, 1]} : vector<16x64xf32> to vector<16x16xf32>
    %125 = vector.shape_cast %124 : vector<16x16xf32> to vector<1x16x16xf32>
    %126 = vector.extract_strided_slice %32 {offsets = [0, 32], sizes = [16, 16], strides = [1, 1]} : vector<16x64xf32> to vector<16x16xf32>
    %127 = vector.shape_cast %126 : vector<16x16xf32> to vector<1x16x16xf32>
    "tpu.trace_start"() <{level = 10 : i32, message = "bqd,bkd->bqk"}> : () -> ()
    %cst_61 = arith.constant dense<0.000000e+00> : vector<1x8x16xf32>
    %128 = tpu.matmul %123, %125, %cst_61 {dimension_numbers = #tpu.dot_dimension_numbers<[2], [2], [1], [1], [0, 0, 0, 1, 1, 1], [0], [0]>} : vector<1x8x16xf32>, vector<1x16x16xf32>, vector<1x8x16xf32> -> vector<1x8x16xf32>
    "tpu.trace_stop"() : () -> ()
    %c2_62 = arith.constant 2 : index
    %c0_63 = arith.constant 0 : index
    %c0_64 = arith.constant 0 : index
    %129 = vector.load %arg10[%c2_62, %c0_63, %c0_64] : memref<4x8x1xf32, #tpu.memory_space<vmem>>, vector<1x8x1xf32>
    %130 = vector.shape_cast %129 : vector<1x8x1xf32> to vector<8x1xf32>
    %131 = vector.shape_cast %130 : vector<8x1xf32> to vector<1x8x1xf32>
    %c2_65 = arith.constant 2 : index
    %c0_66 = arith.constant 0 : index
    %c0_67 = arith.constant 0 : index
    %132 = vector.load %arg11[%c2_65, %c0_66, %c0_67] : memref<4x8x1xf32, #tpu.memory_space<vmem>>, vector<1x8x1xf32>
    %133 = vector.shape_cast %132 : vector<1x8x1xf32> to vector<8x1xf32>
    %134 = vector.shape_cast %133 : vector<8x1xf32> to vector<1x8x1xf32>
    %c2_68 = arith.constant 2 : index
    %c0_69 = arith.constant 0 : index
    %c0_70 = arith.constant 0 : index
    %135 = vector.load %arg12[%c2_68, %c0_69, %c0_70] : memref<4x8x16xf32, #tpu.memory_space<vmem>>, vector<1x8x16xf32>
    %136 = vector.shape_cast %135 : vector<1x8x16xf32> to vector<8x16xf32>
    %137 = vector.shape_cast %136 : vector<8x16xf32> to vector<1x8x16xf32>
    %cst_71 = arith.constant dense<0xFF800000> : vector<1x8xf32>
    %138 = vector.multi_reduction <maximumf>, %128, %cst_71 [2] : vector<1x8x16xf32> to vector<1x8xf32>
    %139 = vector.shape_cast %138 : vector<1x8xf32> to vector<1x8x1xf32>
    %140 = arith.maximumf %131, %139 : vector<1x8x1xf32>
    %141 = arith.subf %131, %140 : vector<1x8x1xf32>
    %142 = math.exp %141 : vector<1x8x1xf32>
    %143 = vector.broadcast %140 : vector<1x8x1xf32> to vector<1x8x16xf32>
    %144 = arith.subf %128, %143 : vector<1x8x16xf32>
    %145 = math.exp %144 : vector<1x8x16xf32>
    %146 = arith.mulf %142, %134 : vector<1x8x1xf32>
    %cst_72 = arith.constant dense<0.000000e+00> : vector<1x8xf32>
    %147 = vector.multi_reduction <add>, %145, %cst_72 [2] : vector<1x8x16xf32> to vector<1x8xf32>
    %148 = vector.shape_cast %147 : vector<1x8xf32> to vector<1x8x1xf32>
    %149 = arith.addf %146, %148 : vector<1x8x1xf32>
    %150 = vector.broadcast %142 : vector<1x8x1xf32> to vector<1x8x16xf32>
    %151 = arith.mulf %150, %137 : vector<1x8x16xf32>
    "tpu.trace_start"() <{level = 10 : i32, message = "bqk,bkd->bqd"}> : () -> ()
    %cst_73 = arith.constant dense<0.000000e+00> : vector<1x8x16xf32>
    %152 = tpu.matmul %145, %127, %cst_73 {dimension_numbers = #tpu.dot_dimension_numbers<[2], [1], [1], [2], [0, 0, 0, 1, 1, 2], [0], [0]>} : vector<1x8x16xf32>, vector<1x16x16xf32>, vector<1x8x16xf32> -> vector<1x8x16xf32>
    "tpu.trace_stop"() : () -> ()
    %153 = arith.addf %151, %152 : vector<1x8x16xf32>
    %154 = vector.shape_cast %140 : vector<1x8x1xf32> to vector<8x1xf32>
    %c2_74 = arith.constant 2 : index
    %c0_75 = arith.constant 0 : index
    %c0_76 = arith.constant 0 : index
    %155 = vector.load %arg10[%c2_74, %c0_75, %c0_76] : memref<4x8x1xf32, #tpu.memory_space<vmem>>, vector<1x8x1xf32>
    %156 = vector.shape_cast %155 : vector<1x8x1xf32> to vector<8x1xf32>
    %157 = vector.shape_cast %154 : vector<8x1xf32> to vector<1x8x1xf32>
    tpu.vector_store %arg10[%c2_74, %c0_75, %c0_76], %157 {strides = array<i32>} : memref<4x8x1xf32, #tpu.memory_space<vmem>>, vector<1x8x1xf32>,
    %158 = vector.shape_cast %149 : vector<1x8x1xf32> to vector<8x1xf32>
    %c2_77 = arith.constant 2 : index
    %c0_78 = arith.constant 0 : index
    %c0_79 = arith.constant 0 : index
    %159 = vector.load %arg11[%c2_77, %c0_78, %c0_79] : memref<4x8x1xf32, #tpu.memory_space<vmem>>, vector<1x8x1xf32>
    %160 = vector.shape_cast %159 : vector<1x8x1xf32> to vector<8x1xf32>
    %161 = vector.shape_cast %158 : vector<8x1xf32> to vector<1x8x1xf32>
    tpu.vector_store %arg11[%c2_77, %c0_78, %c0_79], %161 {strides = array<i32>} : memref<4x8x1xf32, #tpu.memory_space<vmem>>, vector<1x8x1xf32>,
    %162 = vector.shape_cast %153 : vector<1x8x16xf32> to vector<8x16xf32>
    %c2_80 = arith.constant 2 : index
    %c0_81 = arith.constant 0 : index
    %c0_82 = arith.constant 0 : index
    %163 = vector.load %arg12[%c2_80, %c0_81, %c0_82] : memref<4x8x16xf32, #tpu.memory_space<vmem>>, vector<1x8x16xf32>
    %164 = vector.shape_cast %163 : vector<1x8x16xf32> to vector<8x16xf32>
    %165 = vector.shape_cast %162 : vector<8x16xf32> to vector<1x8x16xf32>
    tpu.vector_store %arg12[%c2_80, %c0_81, %c0_82], %165 {strides = array<i32>} : memref<4x8x16xf32, #tpu.memory_space<vmem>>, vector<1x8x16xf32>,
    %166 = vector.extract_strided_slice %33 {offsets = [0, 48], sizes = [8, 16], strides = [1, 1]} : vector<8x64xf32> to vector<8x16xf32>
    %167 = vector.shape_cast %166 : vector<8x16xf32> to vector<1x8x16xf32>
    %168 = vector.extract_strided_slice %31 {offsets = [0, 48], sizes = [16, 16], strides = [1, 1]} : vector<16x64xf32> to vector<16x16xf32>
    %169 = vector.shape_cast %168 : vector<16x16xf32> to vector<1x16x16xf32>
    %170 = vector.extract_strided_slice %32 {offsets = [0, 48], sizes = [16, 16], strides = [1, 1]} : vector<16x64xf32> to vector<16x16xf32>
    %171 = vector.shape_cast %170 : vector<16x16xf32> to vector<1x16x16xf32>
    "tpu.trace_start"() <{level = 10 : i32, message = "bqd,bkd->bqk"}> : () -> ()
    %cst_83 = arith.constant dense<0.000000e+00> : vector<1x8x16xf32>
    %172 = tpu.matmul %167, %169, %cst_83 {dimension_numbers = #tpu.dot_dimension_numbers<[2], [2], [1], [1], [0, 0, 0, 1, 1, 1], [0], [0]>} : vector<1x8x16xf32>, vector<1x16x16xf32>, vector<1x8x16xf32> -> vector<1x8x16xf32>
    "tpu.trace_stop"() : () -> ()
    %c3_84 = arith.constant 3 : index
    %c0_85 = arith.constant 0 : index
    %c0_86 = arith.constant 0 : index
    %173 = vector.load %arg10[%c3_84, %c0_85, %c0_86] : memref<4x8x1xf32, #tpu.memory_space<vmem>>, vector<1x8x1xf32>
    %174 = vector.shape_cast %173 : vector<1x8x1xf32> to vector<8x1xf32>
    %175 = vector.shape_cast %174 : vector<8x1xf32> to vector<1x8x1xf32>
    %c3_87 = arith.constant 3 : index
    %c0_88 = arith.constant 0 : index
    %c0_89 = arith.constant 0 : index
    %176 = vector.load %arg11[%c3_87, %c0_88, %c0_89] : memref<4x8x1xf32, #tpu.memory_space<vmem>>, vector<1x8x1xf32>
    %177 = vector.shape_cast %176 : vector<1x8x1xf32> to vector<8x1xf32>
    %178 = vector.shape_cast %177 : vector<8x1xf32> to vector<1x8x1xf32>
    %c3_90 = arith.constant 3 : index
    %c0_91 = arith.constant 0 : index
    %c0_92 = arith.constant 0 : index
    %179 = vector.load %arg12[%c3_90, %c0_91, %c0_92] : memref<4x8x16xf32, #tpu.memory_space<vmem>>, vector<1x8x16xf32>
    %180 = vector.shape_cast %179 : vector<1x8x16xf32> to vector<8x16xf32>
    %181 = vector.shape_cast %180 : vector<8x16xf32> to vector<1x8x16xf32>
    %cst_93 = arith.constant dense<0xFF800000> : vector<1x8xf32>
    %182 = vector.multi_reduction <maximumf>, %172, %cst_93 [2] : vector<1x8x16xf32> to vector<1x8xf32>
    %183 = vector.shape_cast %182 : vector<1x8xf32> to vector<1x8x1xf32>
    %184 = arith.maximumf %175, %183 : vector<1x8x1xf32>
    %185 = arith.subf %175, %184 : vector<1x8x1xf32>
    %186 = math.exp %185 : vector<1x8x1xf32>
    %187 = vector.broadcast %184 : vector<1x8x1xf32> to vector<1x8x16xf32>
    %188 = arith.subf %172, %187 : vector<1x8x16xf32>
    %189 = math.exp %188 : vector<1x8x16xf32>
    %190 = arith.mulf %186, %178 : vector<1x8x1xf32>
    %cst_94 = arith.constant dense<0.000000e+00> : vector<1x8xf32>
    %191 = vector.multi_reduction <add>, %189, %cst_94 [2] : vector<1x8x16xf32> to vector<1x8xf32>
    %192 = vector.shape_cast %191 : vector<1x8xf32> to vector<1x8x1xf32>
    %193 = arith.addf %190, %192 : vector<1x8x1xf32>
    %194 = vector.broadcast %186 : vector<1x8x1xf32> to vector<1x8x16xf32>
    %195 = arith.mulf %194, %181 : vector<1x8x16xf32>
    "tpu.trace_start"() <{level = 10 : i32, message = "bqk,bkd->bqd"}> : () -> ()
    %cst_95 = arith.constant dense<0.000000e+00> : vector<1x8x16xf32>
    %196 = tpu.matmul %189, %171, %cst_95 {dimension_numbers = #tpu.dot_dimension_numbers<[2], [1], [1], [2], [0, 0, 0, 1, 1, 2], [0], [0]>} : vector<1x8x16xf32>, vector<1x16x16xf32>, vector<1x8x16xf32> -> vector<1x8x16xf32>
    "tpu.trace_stop"() : () -> ()
    %197 = arith.addf %195, %196 : vector<1x8x16xf32>
    %198 = vector.shape_cast %184 : vector<1x8x1xf32> to vector<8x1xf32>
    %c3_96 = arith.constant 3 : index
    %c0_97 = arith.constant 0 : index
    %c0_98 = arith.constant 0 : index
    %199 = vector.load %arg10[%c3_96, %c0_97, %c0_98] : memref<4x8x1xf32, #tpu.memory_space<vmem>>, vector<1x8x1xf32>
    %200 = vector.shape_cast %199 : vector<1x8x1xf32> to vector<8x1xf32>
    %201 = vector.shape_cast %198 : vector<8x1xf32> to vector<1x8x1xf32>
    tpu.vector_store %arg10[%c3_96, %c0_97, %c0_98], %201 {strides = array<i32>} : memref<4x8x1xf32, #tpu.memory_space<vmem>>, vector<1x8x1xf32>,
    %202 = vector.shape_cast %193 : vector<1x8x1xf32> to vector<8x1xf32>
    %c3_99 = arith.constant 3 : index
    %c0_100 = arith.constant 0 : index
    %c0_101 = arith.constant 0 : index
    %203 = vector.load %arg11[%c3_99, %c0_100, %c0_101] : memref<4x8x1xf32, #tpu.memory_space<vmem>>, vector<1x8x1xf32>
    %204 = vector.shape_cast %203 : vector<1x8x1xf32> to vector<8x1xf32>
    %205 = vector.shape_cast %202 : vector<8x1xf32> to vector<1x8x1xf32>
    tpu.vector_store %arg11[%c3_99, %c0_100, %c0_101], %205 {strides = array<i32>} : memref<4x8x1xf32, #tpu.memory_space<vmem>>, vector<1x8x1xf32>,
    %206 = vector.shape_cast %197 : vector<1x8x16xf32> to vector<8x16xf32>
    %c3_102 = arith.constant 3 : index
    %c0_103 = arith.constant 0 : index
    %c0_104 = arith.constant 0 : index
    %207 = vector.load %arg12[%c3_102, %c0_103, %c0_104] : memref<4x8x16xf32, #tpu.memory_space<vmem>>, vector<1x8x16xf32>
    %208 = vector.shape_cast %207 : vector<1x8x16xf32> to vector<8x16xf32>
    %209 = vector.shape_cast %206 : vector<8x16xf32> to vector<1x8x16xf32>
    tpu.vector_store %arg12[%c3_102, %c0_103, %c0_104], %209 {strides = array<i32>} : memref<4x8x16xf32, #tpu.memory_space<vmem>>, vector<1x8x16xf32>,
    %c0_i32_105 = arith.constant 0 : i32
    %210 = arith.cmpi eq, %arg1, %c0_i32_105 : i32
    %211 = arith.extui %210 : i1 to i32
    %c0_i32_106 = arith.constant 0 : i32
    %212 = arith.cmpi ne, %211, %c0_i32_106 : i32
    scf.if %212 {
      %c0_107 = arith.constant 0 : index
      %c0_108 = arith.constant 0 : index
      %c0_109 = arith.constant 0 : index
      %213 = vector.load %arg11[%c0_107, %c0_108, %c0_109] : memref<4x8x1xf32, #tpu.memory_space<vmem>>, vector<1x8x1xf32>
      %214 = vector.shape_cast %213 : vector<1x8x1xf32> to vector<8x1xf32>
      %cst_110 = arith.constant 1.000000e+00 : f32
      %215 = vector.broadcast %cst_110 : f32 to vector<8x1xf32>
      %216 = arith.divf %215, %214 : vector<8x1xf32>
      %c0_111 = arith.constant 0 : index
      %c0_112 = arith.constant 0 : index
      %c0_113 = arith.constant 0 : index
      %217 = vector.load %arg12[%c0_111, %c0_112, %c0_113] : memref<4x8x16xf32, #tpu.memory_space<vmem>>, vector<1x8x16xf32>
      %218 = vector.shape_cast %217 : vector<1x8x16xf32> to vector<8x16xf32>
      %219 = vector.broadcast %216 : vector<8x1xf32> to vector<8x16xf32>
      %220 = arith.mulf %218, %219 : vector<8x16xf32>
      %c1_114 = arith.constant 1 : index
      %c0_115 = arith.constant 0 : index
      %c0_116 = arith.constant 0 : index
      %221 = vector.load %arg11[%c1_114, %c0_115, %c0_116] : memref<4x8x1xf32, #tpu.memory_space<vmem>>, vector<1x8x1xf32>
      %222 = vector.shape_cast %221 : vector<1x8x1xf32> to vector<8x1xf32>
      %cst_117 = arith.constant 1.000000e+00 : f32
      %223 = vector.broadcast %cst_117 : f32 to vector<8x1xf32>
      %224 = arith.divf %223, %222 : vector<8x1xf32>
      %c1_118 = arith.constant 1 : index
      %c0_119 = arith.constant 0 : index
      %c0_120 = arith.constant 0 : index
      %225 = vector.load %arg12[%c1_118, %c0_119, %c0_120] : memref<4x8x16xf32, #tpu.memory_space<vmem>>, vector<1x8x16xf32>
      %226 = vector.shape_cast %225 : vector<1x8x16xf32> to vector<8x16xf32>
      %227 = vector.broadcast %224 : vector<8x1xf32> to vector<8x16xf32>
      %228 = arith.mulf %226, %227 : vector<8x16xf32>
      %c2_121 = arith.constant 2 : index
      %c0_122 = arith.constant 0 : index
      %c0_123 = arith.constant 0 : index
      %229 = vector.load %arg11[%c2_121, %c0_122, %c0_123] : memref<4x8x1xf32, #tpu.memory_space<vmem>>, vector<1x8x1xf32>
      %230 = vector.shape_cast %229 : vector<1x8x1xf32> to vector<8x1xf32>
      %cst_124 = arith.constant 1.000000e+00 : f32
      %231 = vector.broadcast %cst_124 : f32 to vector<8x1xf32>
      %232 = arith.divf %231, %230 : vector<8x1xf32>
      %c2_125 = arith.constant 2 : index
      %c0_126 = arith.constant 0 : index
      %c0_127 = arith.constant 0 : index
      %233 = vector.load %arg12[%c2_125, %c0_126, %c0_127] : memref<4x8x16xf32, #tpu.memory_space<vmem>>, vector<1x8x16xf32>
      %234 = vector.shape_cast %233 : vector<1x8x16xf32> to vector<8x16xf32>
      %235 = vector.broadcast %232 : vector<8x1xf32> to vector<8x16xf32>
      %236 = arith.mulf %234, %235 : vector<8x16xf32>
      %c3_128 = arith.constant 3 : index
      %c0_129 = arith.constant 0 : index
      %c0_130 = arith.constant 0 : index
      %237 = vector.load %arg11[%c3_128, %c0_129, %c0_130] : memref<4x8x1xf32, #tpu.memory_space<vmem>>, vector<1x8x1xf32>
      %238 = vector.shape_cast %237 : vector<1x8x1xf32> to vector<8x1xf32>
      %cst_131 = arith.constant 1.000000e+00 : f32
      %239 = vector.broadcast %cst_131 : f32 to vector<8x1xf32>
      %240 = arith.divf %239, %238 : vector<8x1xf32>
      %c3_132 = arith.constant 3 : index
      %c0_133 = arith.constant 0 : index
      %c0_134 = arith.constant 0 : index
      %241 = vector.load %arg12[%c3_132, %c0_133, %c0_134] : memref<4x8x16xf32, #tpu.memory_space<vmem>>, vector<1x8x16xf32>
      %242 = vector.shape_cast %241 : vector<1x8x16xf32> to vector<8x16xf32>
      %243 = vector.broadcast %240 : vector<8x1xf32> to vector<8x16xf32>
      %244 = arith.mulf %242, %243 : vector<8x16xf32>
      %245 = tpu.concatenate %220, %228, %236, %244 in 1 : vector<8x16xf32>, vector<8x16xf32>, vector<8x16xf32>, vector<8x16xf32> -> vector<8x64xf32>
      %c0_135 = arith.constant 0 : index
      %c0_136 = arith.constant 0 : index
      %246 = vector.load %arg7[%c0_135, %c0_136] : memref<64x128xf32, #tpu.memory_space<vmem>>, vector<64x128xf32>
      %cst_137 = arith.constant dense<0.000000e+00> : vector<8x128xf32>
      %247 = tpu.matmul %245, %246, %cst_137 {dimension_numbers = #tpu.dot_dimension_numbers<[1], [0], [0], [1], [0, 0, 1, 1], [], []>} : vector<8x64xf32>, vector<64x128xf32>, vector<8x128xf32> -> vector<8x128xf32>
      %248 = vector.shape_cast %247 : vector<8x128xf32> to vector<1x8x128xf32>
      %c0_138 = arith.constant 0 : index
      %c0_139 = arith.constant 0 : index
      %c0_140 = arith.constant 0 : index
      %249 = vector.load %arg8[%c0_138, %c0_139, %c0_140] : memref<1x8x128xf32, #tpu.memory_space<vmem>>, vector<1x8x128xf32>
      tpu.vector_store %arg8[%c0_138, %c0_139, %c0_140], %248 {strides = array<i32>} : memref<1x8x128xf32, #tpu.memory_space<vmem>>, vector<1x8x128xf32>,
    } else {
    }
    return
  }
  func.func @transform_0(%arg0: i32, %arg1: i32) -> (i32, i32, i32) {
    %c0_i32 = arith.constant 0 : i32
    %c0_i32_0 = arith.constant 0 : i32
    return %arg0, %arg1, %c0_i32 : i32, i32, i32
  }
  func.func @transform_1(%arg0: i32, %arg1: i32) -> (i32, i32, i32) {
    %c0_i32 = arith.constant 0 : i32
    %c0_i32_0 = arith.constant 0 : i32
    %c0_i32_1 = arith.constant 0 : i32
    return %arg0, %c0_i32, %c0_i32_0 : i32, i32, i32
  }
  func.func @transform_2(%arg0: i32, %arg1: i32) -> (i32, i32) {
    %c0_i32 = arith.constant 0 : i32
    %c0_i32_0 = arith.constant 0 : i32
    %c0_i32_1 = arith.constant 0 : i32
    return %c0_i32, %c0_i32_0 : i32, i32
  }
  func.func @transform_3(%arg0: i32, %arg1: i32) -> (i32, i32) {
    %c0_i32 = arith.constant 0 : i32
    %c0_i32_0 = arith.constant 0 : i32
    %c0_i32_1 = arith.constant 0 : i32
    return %c0_i32, %c0_i32_0 : i32, i32
  }
  func.func @transform_4(%arg0: i32, %arg1: i32) -> (i32, i32) {
    %c0_i32 = arith.constant 0 : i32
    %c0_i32_0 = arith.constant 0 : i32
    %c0_i32_1 = arith.constant 0 : i32
    return %c0_i32, %c0_i32_0 : i32, i32
  }
  func.func @transform_5(%arg0: i32, %arg1: i32) -> (i32, i32) {
    %c0_i32 = arith.constant 0 : i32
    %c0_i32_0 = arith.constant 0 : i32
    %c0_i32_1 = arith.constant 0 : i32
    return %c0_i32, %c0_i32_0 : i32, i32
  }
  func.func @transform_6(%arg0: i32, %arg1: i32) -> (i32, i32, i32) {
    %c0_i32 = arith.constant 0 : i32
    %c0_i32_0 = arith.constant 0 : i32
    %c0_i32_1 = arith.constant 0 : i32
    return %arg0, %c0_i32, %c0_i32_0 : i32, i32, i32
  }
}

</mosaic_0001>

<bundles_post_ra>
// kernel: tpu_custom_call.1
= control target key start
LH: loop header
LB: loop body
LE: loop exit
PB: predicated region body
PF: predicated region fallthrough
CT: control target
= control target key end

     0   :  { %s3738_s0 = inlined_call_operand.hbm [shape: f32[2,16,32], index: 0, kind: input, shape index: {}]   ;;  %s3739_s1 = inlined_call_operand.hbm [shape: f32[2,8,32], index: 1, kind: input, shape index: {}]   ;;  %s3740_s2 = inlined_call_operand.vmem [shape: f32[4,32], index: 2, kind: input, shape index: {}]   ;;  %s3741_s3 = inlined_call_operand.hbm [shape: f32[32,192], index: 3, kind: input, shape index: {}]   ;;  %s3742_s4 = inlined_call_operand.hbm [shape: f32[32,128], index: 4, kind: input, shape index: {}]   ;;  %s3743_s5 = inlined_call_operand.hbm [shape: f32[64,128], index: 5, kind: input, shape index: {}]   ;;  %s3744_s6 = inlined_call_operand.hbm [shape: f32[2,8,128], index: 6, kind: output, shape index: {}]  }
   0x1   :  { %3753 = sst [smem:[#allocation23_spill]] %s3738_s0 }
   0x2   :  { %3754 = sst [smem:[#allocation24_spill]] %s3741_s3 }
   0x3   :  { %3755 = sst [smem:[#allocation25_spill]] %s3742_s4 }
   0x4   :  { %3756 = sst [smem:[#allocation26_spill]] %s3743_s5 }
   0x5   :  { %11 = vsyncpa [#allocation7], 0 }
   0x6   :  { %13 = vsyncpa [#allocation7 + $0x1], 0 }
   0x7   :  { %14 = vsyncpa [#allocation10], 0 }
   0x8   :  { %16 = vsyncpa [#allocation10 + $0x1], 0 }
   0x9   :  { %17 = vsyncpa [#allocation13], 0 }
   0xa   :  { %18 = vsyncpa [#allocation8], 0 }
   0xb   :  { %20 = vsyncpa [#allocation8 + $0x1], 0  ;;  %s3139_s21 = smov 0   ;;  %s3141_s22 = smov 0  }
   0xc   :  { %s3143_s23 = smov 0   ;;  %s3145_s24 = smov 0  }
   0xd   :  { %s3147_s25 = smov 0   ;;  %s3149_s26 = smov 0  }
   0xe LB: > { %s3170_s27 = sadd.s32 4294967295, %s3081_s26   ;;  %s2359_s28 = sadd.s32 4294967294, %s3081_s26   ;;  %s3081_s26 = sphi %s3149_s26, %s26_s26   ;;  %s3077_s25 = sphi %s3147_s25, %s3792_s25   ;;  %s3073_s24 = sphi %s3145_s24, %s3791_s24   ;;  %s3069_s23 = sphi %s3143_s23, %s3790_s23   ;;  %s3065_s22 = sphi %s3141_s22, %s3789_s22   ;;  %s3061_s21 = sphi %s3139_s21, %s3788_s21  }
   0xf   : > { %p60_p0 = scmp.ne.s32.totalorder %s3065_s22, %s3061_s21  ;;  %p3745_p1 = scmp.eq.s32.totalorder %s3170_s27, 0 }
  0x10   : > { %p200_p3 = scmp.eq.s32.totalorder %s2359_s28, 1  ;;  %p2360_p5 = scmp.ge.s32.totalorder %s3081_s26, 1 }
  0x11   : > { %p3179_p4 = por %p3745_p1, %p60_p0  ;;  %p207_p7 = scmp.lt.s32.totalorder %s3081_s26, 3 }
  0x12   : > { %p3184_p6 = por %p200_p3, %p60_p0  ;;  %s3083_s8 = smov [#allocation11]  }
  0x13   : > { %s3757_s29 = scalar_select %p3179_p4, 1, 0 }
  0x14   : > { %s3758_s30 = scalar_select %p3184_p6, 1, 0 }
  0x15   : > { %p3189_p8 = pnand %p2360_p5, %p207_p7  ;;  %s222_s9 = sshll.u32 %s3083_s8, 4  ;;  %s3193_s9 = int_to_ptr.vmem [resolvable:$true] %s222_s9 }
  0x16   : > { %3759 = sst [smem:[#allocation21_spill]] %s3758_s30  ;;  %s3084_s11 = smov [#allocation12]  }
  0x17   : > { %s3760_s7 = scalar_select %p3189_p8, 1, 0 }
  0x18   : > { %p2673_p9 = pneg %p3189_p8  ;;  %s235_s12 = sshll.u32 %s3084_s11, 4  ;;  %s3204_s12 = int_to_ptr.vmem [resolvable:$true] %s235_s12 }
  0x19   : > { %s3762_s3 = sld [smem:[#allocation24_spill]] }
  0x1a   : > { %p3200_p11 = pnand %p2673_p9, %p3745_p1 }
  0x1c   : > { %p3214_p13 = pneg %p3200_p11 }
  0x1f   : > { %s2843_s15 = scalar_lea.hbm %s3762_s3, 1024 }
  0x20   : > { %p2844_p12 = scmp.ne.s32.totalorder %s3762_s3, %s2843_s15  ;;  %p2850_p5 = scmp.lt.u32.totalorder %s2843_s15, %s3762_s3 }
  0x22   : > { %p2846_p0 = pnand %p3214_p13, %p2844_p12 }
  0x24   : > { %p2847_p3 = pneg %p2846_p0 }
  0x26   : > { %p2852_p7 = pnand %p2850_p5, %p2847_p3 }
  0x28   : > { %2855 = shalt.err (!%p2852_p7)
}
  0x29   : > { %s2856_s28 = scalar_lea.vmem %s3193_s9, 1024  ;;  %p2864_p2 = scmp.lt.s32.totalorder %s3193_s9, %s3193_s9 }
  0x2a   : > { %p2857_p9 = scmp.ne.s32.totalorder %s3193_s9, %s2856_s28  ;;  %p2865_p6 = scmp.lt.s32.totalorder %s2856_s28, %s2856_s28 }
  0x2c   : > { %p2859_p10 = pnand %p2857_p9, %p3214_p13  ;;  %p2866_p12 = por %p2865_p6, %p2864_p2 }
  0x2e   : > { %p2860_p1 = pneg %p2859_p10 }
  0x30   : > { %p2867_p0 = pnand %p2866_p12, %p2860_p1 }
  0x32   : > { %2870 = shalt.err (!%p2867_p0)
}
  0x33   : > { %s3085_s8 = smov 256   ;;  %s3086_s11 = smov 16  }
  0x34   : > { %2676 = dma.hbm_to_vmem [thread:$0]  (!%p3200_p11), %s3762_s3, 1024, %s3193_s9, [#allocation10], %s3085_s8, %s3085_s8, %s3086_s11  }
  0x35   : > { %s3764_s4 = sld [smem:[#allocation25_spill]] }
  0x3b   : > { %s2871_s17 = scalar_lea.hbm %s3764_s4, 512 }
  0x3c   : > { %p2872_p2 = scmp.ne.s32.totalorder %s3764_s4, %s2871_s17  ;;  %p2878_p10 = scmp.lt.u32.totalorder %s2871_s17, %s3764_s4 }
  0x3e   : > { %p2874_p1 = pnand %p2872_p2, %p3214_p13 }
  0x40   : > { %p2875_p6 = pneg %p2874_p1 }
  0x42   : > { %p2880_p3 = pnand %p2878_p10, %p2875_p6 }
  0x44   : > { %2883 = shalt.err (!%p2880_p3)
}
  0x45   : > { %s2884_s9 = scalar_lea.vmem %s3204_s12, 512  ;;  %p2892_p12 = scmp.lt.s32.totalorder %s3204_s12, %s3204_s12 }
  0x46   : > { %p2885_p5 = scmp.ne.s32.totalorder %s3204_s12, %s2884_s9  ;;  %p2893_p0 = scmp.lt.s32.totalorder %s2884_s9, %s2884_s9 }
  0x48   : > { %p2887_p7 = pnand %p2885_p5, %p3214_p13  ;;  %p2894_p2 = por %p2893_p0, %p2892_p12 }
  0x4a   : > { %p2888_p9 = pneg %p2887_p7 }
  0x4c   : > { %p2895_p1 = pnand %p2894_p2, %p2888_p9 }
  0x4e   : > { %2898 = shalt.err (!%p2895_p1)
}
  0x4f   : > { %s3749_s8 = smov 128   ;;  %s3750_s30 = smov 8  }
  0x50   : > { %2679 = dma.hbm_to_vmem [thread:$0]  (!%p3200_p11), %s3764_s4, 512, %s3204_s12, [#allocation13], %s3749_s8, %s3749_s8, %s3750_s30  }
  0x51   : > { %s3089_s14 = smov [#allocation14]   ;;  %s3765_s5 = sld [smem:[#allocation26_spill]] }
  0x52   : > { %s248_s15 = sshll.u32 %s3089_s14, 4  ;;  %s249_s15 = int_to_ptr.vmem [resolvable:$true] %s248_s15 }
  0x57   : > { %s2899_s19 = scalar_lea.hbm %s3765_s5, 1024 }
  0x58   : > { %p2900_p6 = scmp.ne.s32.totalorder %s3765_s5, %s2899_s19  ;;  %p2906_p5 = scmp.lt.u32.totalorder %s2899_s19, %s3765_s5 }
  0x5a   : > { %p2902_p10 = pnand %p2900_p6, %p3214_p13 }
  0x5c   : > { %p2903_p3 = pneg %p2902_p10 }
  0x5e   : > { %p2908_p7 = pnand %p2906_p5, %p2903_p3 }
  0x60   : > { %2911 = shalt.err (!%p2908_p7)
}
  0x61   : > { %s2912_s12 = scalar_lea.vmem %s249_s15, 1024  ;;  %p2920_p2 = scmp.lt.s32.totalorder %s249_s15, %s249_s15 }
  0x62   : > { %p2913_p9 = scmp.ne.s32.totalorder %s249_s15, %s2912_s12  ;;  %p2921_p1 = scmp.lt.s32.totalorder %s2912_s12, %s2912_s12 }
  0x64   : > { %p2915_p12 = pnand %p2913_p9, %p3214_p13  ;;  %p2922_p4 = por %p2921_p1, %p2920_p2 }
  0x66   : > { %p2916_p0 = pneg %p2915_p12 }
  0x68   : > { %p2923_p8 = pnand %p2922_p4, %p2916_p0 }
  0x6a   : > { %2926 = shalt.err (!%p2923_p8)
}
  0x6b   : > { %2682 = dma.hbm_to_vmem [thread:$0]  (!%p3200_p11), %s3765_s5, 1024, %s249_s15, [#allocation13], %s3749_s8, %s3749_s8, %s3750_s30  }
  0x6c   : > { %s38_s18 = sadd.s32 1, %s3077_s25  ;;  %s47_s10 = sadd.s32 1, %s3069_s23 }
  0x6d   : > { %p40_p4 = scmp.ge.s32.totalorder %s38_s18, 2  ;;  %p54_p8 = scmp.ne.s32.totalorder %s3069_s23, %s3065_s22 }
  0x6e   : > { %p55_p13 = scmp.eq.s32.totalorder %s3081_s26, 0  ;;  %p3768_p10 = scmp.eq.s32.totalorder %s3170_s27, 1 }
  0x6f   : > { %s3794_s18 = smov (%p40_p4, %s38_s18), 0  ;;  %p2697_p11 = scmp.lt.s32.totalorder %s3081_s26, 2 }
  0x70   : > { %3766 = sst [smem:[#allocation22_spill]] %s3794_s18  ;;  %p3289_p6 = por %p55_p13, %p54_p8 }
  0x71   : > { %p3295_p3 = por %p3768_p10, %p54_p8  ;;  %s42_s15 = ssub.s32 %s3077_s25, %s3794_s18 }
  0x72   : > { %p45_p5 = scmp.eq.s32.totalorder %s42_s15, 0  ;;  %s3303_s16 = sand.u32 1, %s3069_s23  }
  0x73   : > { %s3769_s14 = scalar_select %p3295_p3, 1, 0 }
  0x74   : > { %s2365_s17 = sshll.u32 %s3303_s16, 4  ;;  %s2417_s20 = sshll.u32 %s3077_s25, 8 }
  0x75   : > { %s3307_s19 = scalar_select %p45_p5, %s3069_s23, %s47_s10  }
  0x76   : > { %s3770_s0 = sld [smem:[#allocation23_spill]]  ;;  %s266_s3 = scalar_lea.vmem [#allocation6], %s2365_s17 }
  0x77   : > { %s275_s11 = sshll.u32 %s266_s3, 4  ;;  %p3319_p7 = pnand %p2697_p11, %p3289_p6  ;;  %s3315_s11 = int_to_ptr.vmem [resolvable:$true] %s275_s11 }
  0x78   : > { %s2368_s8 = sshll.u32 %s3303_s16, 3  ;;  %s263_s28 = scalar_lea.sflag [#allocation7], %s3303_s16 }
  0x79   : > { %p2929_p12 = pneg %p3319_p7 }
  0x7c   : > { %s3313_s12 = scalar_lea.hbm %s3770_s0, %s2417_s20  ;;  %s2932_s13 = scalar_lea.hbm %s3770_s0, 512 }
  0x7d   : > { %s2927_s20 = scalar_lea.hbm %s3313_s12, 256  ;;  %p2933_p1 = scmp.lt.u32.totalorder %s3313_s12, %s3770_s0 }
  0x7e   : > { %p2928_p9 = scmp.ne.s32.totalorder %s3313_s12, %s2927_s20  ;;  %p2934_p4 = scmp.lt.u32.totalorder %s2932_s13, %s2927_s20 }
  0x7f   : > { %p2936_p13 = scmp.lt.u32.totalorder %s2927_s20, %s3313_s12 }
  0x80   : > { %p2930_p0 = pnand %p2929_p12, %p2928_p9  ;;  %p2935_p8 = por %p2934_p4, %p2933_p1 }
  0x82   : > { %p2931_p2 = pneg %p2930_p0  ;;  %p2937_p6 = por %p2936_p13, %p2935_p8 }
  0x84   : > { %p2938_p10 = pnand %p2937_p6, %p2931_p2 }
  0x86   : > { %2941 = shalt.err (!%p2938_p10)
}
  0x87   : > { %s2942_s10 = scalar_lea.vmem %s3315_s11, 256  ;;  %s3090_s17 = smov [#allocation6]  }
  0x88   : > { %p2943_p11 = scmp.ne.s32.totalorder %s3315_s11, %s2942_s10  ;;  %s2947_s9 = sshll.u32 %s3090_s17, 4  ;;  %s2948_s9 = int_to_ptr.vmem [resolvable:$false] %s2947_s9 }
  0x89   : > { %s2949_s30 = scalar_lea.vmem %s2948_s9, 512  ;;  %p2950_p0 = scmp.lt.s32.totalorder %s3315_s11, %s2948_s9 }
  0x8a   : > { %p2945_p5 = pnand %p2943_p11, %p2929_p12  ;;  %p2951_p1 = scmp.lt.s32.totalorder %s2949_s30, %s2942_s10 }
  0x8c   : > { %p2946_p9 = pneg %p2945_p5  ;;  %p2952_p4 = por %p2951_p1, %p2950_p0 }
  0x8e   : > { %p2953_p8 = pnand %p2952_p4, %p2946_p9 }
  0x90   : > { %2956 = shalt.err (!%p2953_p8)
}
  0x91   : > { %s3772_s20 = smov 8   ;;  %s3773_s13 = smov 128  }
  0x92   : > { %2686 = dma.hbm_to_vmem [thread:$0]  (!%p3319_p7), %s3313_s12, 256, %s3315_s11, %s263_s28, %s3773_s13, %s3773_s13, %s3772_s20  }
  0x93   : > { %s2369_s3 = sshll.u32 %s3077_s25, 7  ;;  %s289_s30 = scalar_lea.vmem [#allocation9], %s2368_s8 }
  0x94   : > { %s3360_s9 = scalar_lea.hbm %s3739_s1, %s2369_s3  ;;  %s296_s0 = sshll.u32 %s289_s30, 4  ;;  %s297_s0 = int_to_ptr.vmem [resolvable:$true] %s296_s0 }
  0x95   : > { %s3774_s4 = sand.u32 1, %s3081_s26   ;;  %s2957_s18 = scalar_lea.hbm %s3360_s9, 128 }
  0x96   : > { %s286_s5 = scalar_lea.sflag [#allocation10], %s3774_s4  ;;  %p2958_p2 = scmp.ne.s32.totalorder %s3360_s9, %s2957_s18 }
  0x97   : > { %s2962_s28 = scalar_lea.hbm %s3739_s1, 256  ;;  %p2963_p10 = scmp.lt.u32.totalorder %s3360_s9, %s3739_s1 }
  0x98   : > { %p2960_p13 = pnand %p2958_p2, %p2929_p12  ;;  %p2964_p11 = scmp.lt.u32.totalorder %s2962_s28, %s2957_s18 }
  0x99   : > { %p2966_p9 = scmp.lt.u32.totalorder %s2957_s18, %s3360_s9 }
  0x9a   : > { %p2961_p6 = pneg %p2960_p13  ;;  %p2965_p5 = por %p2964_p11, %p2963_p10 }
  0x9c   : > { %p2967_p0 = por %p2966_p9, %p2965_p5 }
  0x9e   : > { %p2968_p1 = pnand %p2967_p0, %p2961_p6 }
  0xa0   : > { %2971 = shalt.err (!%p2968_p1)
}
  0xa1   : > { %s2972_s4 = scalar_lea.vmem %s297_s0, 128  ;;  %s3091_s8 = smov [#allocation9]  }
  0xa2   : > { %p2973_p4 = scmp.ne.s32.totalorder %s297_s0, %s2972_s4  ;;  %s2977_s13 = sshll.u32 %s3091_s8, 4  ;;  %s2978_s13 = int_to_ptr.vmem [resolvable:$false] %s2977_s13 }
  0xa3   : > { %s2979_s3 = scalar_lea.vmem %s2978_s13, 256  ;;  %p2980_p13 = scmp.lt.s32.totalorder %s297_s0, %s2978_s13 }
  0xa4   : > { %p2975_p8 = pnand %p2973_p4, %p2929_p12  ;;  %p2981_p3 = scmp.lt.s32.totalorder %s2979_s3, %s2972_s4 }
  0xa6   : > { %p2976_p2 = pneg %p2975_p8  ;;  %p2982_p10 = por %p2981_p3, %p2980_p13 }
  0xa8   : > { %p2983_p11 = pnand %p2982_p10, %p2976_p2 }
  0xaa   : > { %2986 = shalt.err (!%p2983_p11)
}
  0xab   : > { %2689 = dma.hbm_to_vmem [thread:$0]  (!%p3319_p7), %s3360_s9, 128, %s297_s0, %s286_s5  }
  0xac   : > { %p3775_p6 = scmp.ne.s32.totalorder %s3760_s7, 0 }
  0xad   : > { %s3388_s18 = sand.u32 (!%p3775_p6), 1, %s3065_s22   ;;  %p3776_p3 = scmp.ne.s32.totalorder (!%p3775_p6), %s3757_s29, 0 }
  0xae   : > { %305 = sbr.rel (%p3775_p6) target bundleno = 3428 (0xd64), region = 44  ;;  %s2371_s17 = sshll.u32 (!%p3775_p6), %s3388_s18, 4 }
  0xaf   : > { %s308_s10 = scalar_lea.sflag (!%p3775_p6), [#allocation7], %s3388_s18  ;;  %s3392_s30 = scalar_lea.vmem (!%p3775_p6), [#allocation6], %s2371_s17 }
  0xb5   : > { %3040 = dma.done.wait (%p3776_p3), %s308_s10, 256  }
  0xb6   : > { %3042 = vsyncadd (%p3776_p3), %s308_s10, 4294967040  ;;  %s316_s0 = sand.u32 1, %s3170_s27   ;;  %s2372_s5 = sshll.u32 %s3388_s18, 3 }
  0xb7   : > { %s317_s7 = scalar_lea.sflag [#allocation10], %s316_s0  ;;  %s320_s15 = scalar_lea.vmem [#allocation9], %s2372_s5 }
  0xb8   : > { %3044 = dma.done.wait (%p3776_p3), %s317_s7, 128  }
  0xb9   : > { %3046 = vsyncadd (%p3776_p3), %s317_s7, 4294967168  ;;  %p3777_p7 = scmp.eq.s32.totalorder %s3170_s27, 0 }
  0xbb   : > { %3048 = dma.done.wait (%p3777_p7), [#allocation10], 1024   ;;  %p3778_p12 = pmov %p3777_p7 }
  0xbc   : > { %p3779_p5 = pmov %p3777_p7 }
  0xbd   : > { %3050 = vsyncadd (%p3778_p12), [#allocation10], 4294966272 }
  0xbe   : > { %3052 = dma.done.wait (%p3779_p5), [#allocation13], 1536   ;;  %p3780_p9 = pmov %p3779_p5 }
  0xbf   : > { %vm376_vm0 = vcmask 261120   ;;  %v375_v0 = vld [vmem:[%s320_s15] sm:$0xff]  ;;  %v402_v7 = vld [vmem:[#allocation11 + $0x8] sm:$0xff]  ;;  %v401_v9 = vld [vmem:[#allocation11] sm:$0xff]  ;;  %v3092_v14 = vmov 0.0   ;;  %vm3093_vm1 = vmmov 0  }
  0xc0   : > { %3054 = vsyncadd (%p3780_p9), [#allocation13], 4294965760  ;;  %v377_v1 = vsel %vm376_vm0, %v375_v0, 0.0  ;;  %v404_v8 = vld [vmem:[#allocation11 + $0x18] sm:$0xff]  ;;  %v403_v11 = vld [vmem:[#allocation11 + $0x10] sm:$0xff]  ;;  %476 = vmatprep.mubr.f32.mxu1 %v3092_v14  ;;  %2483 = vmatprep.subr.mxu0 %v3092_v14  ;;  %vm483_vm2 = vcmask 523264  }
  0xc1   : > { %378 = vadd.xlane.f32.xlu0 %v377_v1  ;;  %v2599_v10 = vpack.c.bf16 %v404_v8, %v402_v7  ;;  %v406_v12 = vld [vmem:[#allocation11 + $0x28] sm:$0xff]  ;;  %v408_v13 = vld [vmem:[#allocation11 + $0x38] sm:$0xff]  ;;  %v2601_v15 = vpack.c.bf16 %v403_v11, %v401_v9  ;;  %v405_v17 = vld [vmem:[#allocation11 + $0x20] sm:$0xff]  ;;  %2485 = vmatprep.mubr.msk.f32.mxu0 %vm3093_vm1, %v3092_v14  ;;  %s3094_s11 = smov 48   ;;  %s3095_s28 = smov 64   ;;  %vm488_vm3 = vcmask 130048  }
  0xc2   : > { %v2603_v16 = vpack.c.bf16 %v408_v13, %v406_v12  ;;  %v407_v18 = vld [vmem:[#allocation11 + $0x30] sm:$0xff]  ;;  %v1159_v21 = vld [vmem:[%s3392_s30 + $0x8] sm:$0xff]  ;;  %s3096_s16 = smov 112   ;;  %s3097_s20 = smov 96   ;;  %v1200_v48 = vld [vmem:[#allocation12] sm:$0xff]  ;;  %vm563_vm4 = vcmask 64512  }
  0xc3   : > { %2600 = vmatprep.subr.bf16.mxu1 %v2599_v10  ;;  %v2605_v19 = vpack.c.bf16 %v407_v18, %v405_v17  ;;  %v1158_v20 = vld [vmem:[%s3392_s30] sm:$0xff]  ;;  %v1164_v23 = vsel %vm376_vm0, %v1159_v21, 0.0  ;;  %v2377_v28 = vld [vmem:[%s3740_s2 + $0x2] ss:$0 sm:$0xff]  ;;  %v2378_v30 = vld [vmem:[%s3740_s2 + $0x3] ss:$0 sm:$0xff] }
  0xc4   : > { %2602 = vmatpush1.bf16.msra.mxu1 %v2601_v15  ;;  %v1161_v22 = vsel %vm376_vm0, %v1158_v20, 0.0  ;;  %s3098_s4 = smov 32   ;;  %s3099_s8 = smov 80   ;;  %v1201_v49 = vld [vmem:[#allocation12 + $0x8] sm:$0xff]  ;;  %v1202_v53 = vld [vmem:[#allocation12 + $0x10] sm:$0xff]  ;;  %v1203_v54 = vld [vmem:[#allocation12 + $0x18] sm:$0xff] }
  0xc5   : > { %2604 = vmatprep.subr.bf16.mxu1 %v2603_v16  ;;  %1162 = vadd.xlane.f32.xlu1 %v1161_v22  ;;  %s3100_s13 = smov 16   ;;  %v2607_v52 = vpack.c.bf16 %v1201_v49, %v1200_v48  ;;  %v2611_v56 = vpack.c.bf16 %v1203_v54, %v1202_v53  ;;  %vm646_vm5 = vcmask 7168   ;;  %vm3525_vm6 = vmpackc.low %vm488_vm3, %vm488_vm3  ;;  %vm2127_vm7 = vcmask 392192   ;;  %s365_s0 = scalar_lea.vmem [#allocation15], %s2372_s5 }
  0xc6   : > { %s2226_s7 = sshll.u32 %s365_s0, 4  ;;  %s2414_s15 = sshll.u32 %s3073_s24, 7  ;;  %s3686_s7 = int_to_ptr.vmem [resolvable:$true] %s2226_s7 }
  0xc7   : > { %s3691_s9 = scalar_lea.hbm %s3744_s6, %s2414_s15  ;;  %s2213_s12 = scalar_lea.sflag [#allocation8], %s3388_s18 }
  0xc8   : > { %2606 = vmatpush1.bf16.msra.mxu1 %v2605_v19  ;;  %p3783_p1 = scmp.ne.s32.totalorder %s3769_s14, 0  ;;  %s3103_s24 = smov [#allocation15]  }
  0xc9   : > { %2473 = vmatprep.subr.mxu1 %v3092_v14  ;;  %1165 = vadd.xlane.f32.xlu1 %v1164_v23  ;;  %v3101_v23 = vmov 0.0|0.0   ;;  %s2991_s5 = sshll.u32 %s3103_s24, 4  ;;  %s2992_s5 = int_to_ptr.vmem [resolvable:$false] %s2991_s5 }
  0xca   : > { %p2994_p2 = scmp.lt.s32.totalorder %s3686_s7, %s2992_s5 }
 0x14e   : > { %v379_v2 = vpop.xlane.xlu0 %378 }
 0x14f   : > { %v381_v3 = vmul.f32 0.03125, %v379_v2  ;;  %v2392_v2 = vld [vmem:[%s3740_s2] ss:$0 sm:$0xff] }
 0x151   : > { %v382_v4 = vsub.f32 %v375_v0, %v381_v3 }
 0x152   : > { %v1163_v35 = vpop.xlane.xlu1 %1162 }
 0x153   : > { %v383_v5 = vmul.f32 %v382_v4, %v382_v4  ;;  %v1168_v40 = vmul.f32 0.03125, %v1163_v35 }
 0x155   : > { %v384_v6 = vsel %vm376_vm0, %v383_v5, 0.0  ;;  %v1170_v42 = vsub.f32 %v1158_v20, %v1168_v40 }
 0x156   : > { %385 = vadd.xlane.f32.xlu0 %v384_v6  ;;  %v1166_v36 = vpop.xlane.xlu1 %1165  ;;  %v2393_v6 = vld [vmem:[%s3740_s2 + $0x1] ss:$0 sm:$0xff] }
 0x157   : > { %v1169_v37 = vmul.f32 0.03125, %v1166_v36  ;;  %v1172_v43 = vmul.f32 %v1170_v42, %v1170_v42 }
 0x159   : > { %v1171_v38 = vsub.f32 %v1159_v21, %v1169_v37  ;;  %v1174_v44 = vsel %vm376_vm0, %v1172_v43, 0.0 }
 0x15b   : > { %v1173_v39 = vmul.f32 %v1171_v38, %v1171_v38 }
 0x15d   : > { %v1177_v41 = vsel %vm376_vm0, %v1173_v39, 0.0 }
 0x1e3   : > { %v386_v24 = vpop.xlane.xlu0 %385 }
 0x1e4   : > { %v387_v25 = vmul.f32 0.03125, %v386_v24 }
 0x1e6   : > { %v388_v26 = vadd.f32 1e-05, %v387_v25 }
 0x1e8   : > { %2805 = vrsqrt.f32 %v388_v26 }
 0x1f2   : > { %v2806_v27 = vpop.eup %2805 }
 0x1f3   : > { %v390_v29 = vmul.f32 %v2806_v27, %v382_v4 }
 0x1f5   : > { %v395_v31 = vmul.f32 %v2377_v28, %v390_v29 }
 0x1f7   : > { %v400_v32 = vadd.f32 %v2378_v30, %v395_v31 }
 0x1f9   : > { %2379 = vmatmul.mubr.msk.f32.vlgmr.msra.gmra.mrb[0].mxu1 %vm376_vm0, %v400_v32 }
 0x1fa   : > { %2475 = vmatprep.mubr.msk.f32.mxu1 %vm3093_vm1, %v3092_v14 }
 0x2cc   : > { %v478_v33 = vpop.f32.mrb[0].mxu1 }
 0x2cd   : > { %484 = vst.msk [vmem:[#allocation2] sm:$0xff] %vm483_vm2, %v478_v33  ;;  %652 = vrot.lane.b32.xlu1 %v478_v33, %s3094_s11  ;;  %486 = vrot.lane.b32.xlu0 %v478_v33, %s3095_s28  ;;  %v3437_v34 = vpop.f32.mrb[1].mxu1 }
 0x2d1   : > { %650 = vrot.lane.b32.xlu1 %v478_v33, %s3096_s16  ;;  %820 = vrot.lane.b32.xlu0 %v478_v33, %s3097_s20 }
 0x2d4   : > { %v3490_v28 = vld [vmem:[#allocation2] sm:$0xff] }
 0x2d5   : > { %822 = vrot.lane.b32.xlu1 %v478_v33, %s3098_s4  ;;  %989 = vrot.lane.b32.xlu0 %v478_v33, %s3099_s8 }
 0x2d9   : > { %991 = vrot.lane.b32.xlu1 %v478_v33, %s3100_s13 }
 0x2f4   : > { %1178 = vadd.xlane.f32.xlu0 %v1177_v41 }
 0x2fd   : > { %1175 = vadd.xlane.f32.xlu1 %v1174_v44 }
 0x30e   : > { %738 = vrot.lane.b32.xlu1 %v3437_v34, %s3096_s16 }
 0x33f   : > { %v653_v45 = vpop.permute.xlu1 %652  ;;  %v487_v46 = vpop.permute.xlu0 %486 }
 0x340   : > { %2474 = vmatpush3.xpose.msk.msra.mxu1 %vm488_vm3, %v487_v46  ;;  %2484 = vmatpush3.xpose.msk.msra.mxu0 %vm488_vm3, %v653_v45 }
 0x341   : > { %2478 = vmatprep.subr.mxu1 %v3092_v14  ;;  %2493 = vmatprep.subr.mxu0 %v3092_v14 }
 0x343   : > { %v651_v47 = vpop.permute.xlu1 %650  ;;  %2476 = vmatmul.mubr.msk.f32.vlgmr.msra.gmra.mrb[2].mxu1 %vm488_vm3, %v478_v33  ;;  %v821_v51 = vpop.permute.xlu0 %820 }
 0x344   : > { %2479 = vmatpush3.msra.mxu1 %v3437_v34  ;;  %2486 = vmatmul.mubr.msk.f32.vlgmr.msra.gmra.mrb[0].mxu0 %vm488_vm3, %v651_v47 }
 0x345   : > { %2495 = vmatprep.mubr.msk.f32.mxu0 %vm3093_vm1, %v3092_v14  ;;  %2480 = vmatprep.mubr.msk.f32.mxu1 %vm3093_vm1, %v3092_v14 }
 0x346   : > { %2488 = vmatprep.subr.mxu1 %v3092_v14 }
 0x347   : > { %v823_v50 = vpop.permute.xlu1 %822  ;;  %v990_v57 = vpop.permute.xlu0 %989 }
 0x348   : > { %2494 = vmatpush3.xpose.msk.msra.mxu0 %vm488_vm3, %v823_v50 }
 0x349   : > { %2503 = vmatprep.subr.mxu0 %v3092_v14 }
 0x34b   : > { %v992_v55 = vpop.permute.xlu1 %991  ;;  %2496 = vmatmul.mubr.msk.f32.vlgmr.msra.gmra.mrb[2].mxu0 %vm488_vm3, %v821_v51 }
 0x34c   : > { %2504 = vmatpush3.xpose.msk.msra.mxu0 %vm488_vm3, %v992_v55  ;;  %2505 = vmatprep.mubr.msk.f32.mxu0 %vm3093_vm1, %v3092_v14 }
 0x34d   : > { %2608 = vmatprep.subr.bf16.mxu0 %v2607_v52 }
 0x34f   : > { %2506 = vmatmul.mubr.msk.f32.vlgmr.msra.gmra.mrb[4].mxu0 %vm488_vm3, %v990_v57 }
 0x350   : > { %2610 = vmatpush3.bf16.msra.mxu0 %v2607_v52 }
 0x351   : > { %2612 = vmatprep.subr.bf16.mxu0 %v2611_v56 }
 0x354   : > { %2614 = vmatpush3.bf16.msra.mxu0 %v2611_v56 }
 0x355   : > { %2619 = vmatprep.subr.bf16.mxu0 %v3101_v23 }
 0x381   : > { %v1179_v58 = vpop.xlane.xlu0 %1178 }
 0x382   : > { %v1181_v59 = vmul.f32 0.03125, %v1179_v58 }
 0x384   : > { %v1183_v60 = vadd.f32 1e-05, %v1181_v59 }
 0x386   : > { %2807 = vrsqrt.f32 %v1183_v60 }
 0x38a   : > { %v1176_v61 = vpop.xlane.xlu1 %1175 }
 0x38b   : > { %v1180_v62 = vmul.f32 0.03125, %v1176_v61 }
 0x38d   : > { %v1182_v63 = vadd.f32 1e-05, %v1180_v62 }
 0x38e   : > { %v739_v32 = vpop.permute.xlu1 %738 }
 0x38f   : > { %2809 = vrsqrt.f32 %v1182_v63 }
 0x390   : > { %v2808_v0 = vpop.eup %2807 }
 0x391   : > { %v1187_v1 = vmul.f32 %v2808_v0, %v1171_v38 }
 0x393   : > { %v1193_v5 = vmul.f32 %v2392_v2, %v1187_v1  ;;  %v3102_v1 = vmov 0  }
 0x394   : > { %2773 = vset.pattern.permute.xlu0 %v3102_v1  ;;  %2774 = vset.pattern.permute.xlu1 %v3102_v1 }
 0x395   : > { %v1199_v9 = vadd.f32 %v2393_v6, %v1193_v5 }
 0x399   : > { %v2810_v3 = vpop.eup %2809 }
 0x39a   : > { %v1186_v4 = vmul.f32 %v2810_v3, %v1170_v42 }
 0x39c   : > { %v1192_v7 = vmul.f32 %v2392_v2, %v1186_v4 }
 0x39e   : > { %v1198_v8 = vadd.f32 %v2393_v6, %v1192_v7 }
 0x3a0   : > { %2521 = vmatprep.mubr.msk.f32.mxu0 %vm376_vm0, %v1198_v8 }
 0x3a1   : > { %2522 = vmatmul.mubr.msk.f32.vlgmr.msra.gmra.mrb[6].mxu0 %vm376_vm0, %v1199_v9 }
 0x3a2   : > { %2535 = vmatprep.mubr.msk.f32.mxu0 %vm3093_vm1, %v3092_v14 }
 0x416   : > { %v559_v10 = vpop.f32.mrb[2].mxu1 }
 0x417   : > { %v2477_v11 = vpop.f32.mrb[3].mxu1  ;;  %v724_v12 = vpop.f32.mrb[0].mxu0  ;;  %v564_v13 = vsel %vm563_vm4, %v559_v10, -inf }
 0x418   : > { %v2487_v15 = vpop.f32.mrb[1].mxu0  ;;  %565 = vmax.xlane.f32.xlu0 %v564_v13  ;;  %v728_v16 = vsel %vm563_vm4, %v724_v12, -inf }
 0x41c   : > { %729 = vmax.xlane.f32.xlu0 %v728_v16 }
 0x41e   : > { %v894_v17 = vpop.f32.mrb[2].mxu0 }
 0x41f   : > { %v2497_v18 = vpop.f32.mrb[3].mxu0  ;;  %v898_v19 = vsel %vm563_vm4, %v894_v17, -inf }
 0x420   : > { %899 = vmax.xlane.f32.xlu1 %v898_v19 }
 0x422   : > { %v1063_v20 = vpop.f32.mrb[4].mxu0 }
 0x423   : > { %v2507_v21 = vpop.f32.mrb[5].mxu0  ;;  %v1067_v22 = vsel %vm563_vm4, %v1063_v20, -inf }
 0x424   : > { %1068 = vmax.xlane.f32.xlu0 %v1067_v22 }
 0x431   : > { %1076 = vrot.lane.b32.xlu1 %v3437_v34, %s3099_s8 }
 0x43a   : > { %907 = vrot.lane.b32.xlu0 %v3437_v34, %s3097_s20 }
 0x474   : > { %v2523_v24 = vpop.f32.mrb[6].mxu0 }
 0x475   : > { %v1276_v25 = vpop.f32.mrb[7].mxu0 }
 0x476   : > { %v3486_v26 = vpack.i.bf16 %v2523_v24, %v1276_v25  ;;  %v2616_v27 = vpack.c.bf16 %v2523_v24, %v1276_v25 }
 0x478   : > { %2769 = vrot.lane.b32.xlu1 %v3486_v26, %s3096_s16 }
 0x47c   : > { %1479 = vrot.lane.b32.xlu1 %v3490_v28, %s3096_s16 }
 0x4a5   : > { %v566_v29 = vpop.xlane.xlu0 %565 }
 0x4a6   : > { %v567_v30 = vsub.f32 %v559_v10, %v566_v29  ;;  %647 = vst.msk [vmem:[#allocation3] sm:$0xff] %vm646_vm5, %v566_v29 }
 0x4a8   : > { %v568_v31 = vmul.f32 1.442695, %v567_v30 }
 0x4a9   : > { %v730_v33 = vpop.xlane.xlu0 %729 }
 0x4aa   : > { %2811 = vpow2.f32 %v568_v31  ;;  %v731_v34 = vsub.f32 %v724_v12, %v730_v33  ;;  %815 = vst.msk [vmem:[#allocation3 + $0x8] sm:$0xff] %vm646_vm5, %v730_v33 }
 0x4ac   : > { %v732_v35 = vmul.f32 1.442695, %v731_v34 }
 0x4ad   : > { %v900_v36 = vpop.xlane.xlu1 %899  ;;  %v3550_v5 = vld [vmem:[#allocation3] sm:$0xff] }
 0x4ae   : > { %2813 = vpow2.f32 %v732_v35  ;;  %v901_v37 = vsub.f32 %v894_v17, %v900_v36  ;;  %984 = vst.msk [vmem:[#allocation3 + $0x10] sm:$0xff] %vm646_vm5, %v900_v36 }
 0x4b0   : > { %v902_v38 = vmul.f32 1.442695, %v901_v37 }
 0x4b1   : > { %v1069_v39 = vpop.xlane.xlu0 %1068  ;;  %v1077_v46 = vpop.permute.xlu1 %1076  ;;  %v3560_v9 = vld [vmem:[#allocation3 + $0x8] sm:$0xff] }
 0x4b2   : > { %2815 = vpow2.f32 %v902_v38  ;;  %v1070_v40 = vsub.f32 %v1063_v20, %v1069_v39  ;;  %1153 = vst.msk [vmem:[#allocation3 + $0x18] sm:$0xff] %vm646_vm5, %v1069_v39 }
 0x4b4   : > { %v3498_v41 = vpop.eup %2811  ;;  %v1071_v42 = vmul.f32 1.442695, %v1070_v40 }
 0x4b5   : > { %2481 = vmatmul.mubr.msk.f32.vlgmr.msra.gmra.mrb[4].mxu1 %vm563_vm4, %v3498_v41  ;;  %v908_v44 = vpop.permute.xlu0 %907  ;;  %v570_v48 = vsel %vm563_vm4, %v3498_v41, 0.0 }
 0x4b6   : > { %2817 = vpow2.f32 %v1071_v42  ;;  %2489 = vmatpush3.msra.mxu1 %v739_v32  ;;  %2490 = vmatprep.mubr.msk.f32.mxu1 %vm3093_vm1, %v3092_v14 }
 0x4b7   : > { %2498 = vmatprep.subr.mxu1 %v3092_v14 }
 0x4b8   : > { %v3505_v43 = vpop.eup %2813 }
 0x4b9   : > { %2491 = vmatmul.mubr.msk.f32.vlgmr.msra.gmra.mrb[6].mxu1 %vm563_vm4, %v3505_v43  ;;  %v734_v41 = vsel %vm563_vm4, %v3505_v43, 0.0 }
 0x4ba   : > { %2499 = vmatpush3.msra.mxu1 %v908_v44  ;;  %2500 = vmatprep.mubr.msk.f32.mxu1 %vm3093_vm1, %v3092_v14 }
 0x4bb   : > { %2508 = vmatprep.subr.mxu1 %v3092_v14 }
 0x4bc   : > { %v3512_v45 = vpop.eup %2815 }
 0x4bd   : > { %2501 = vmatmul.mubr.msk.f32.vlgmr.msra.gmra.mrb[8].mxu1 %vm563_vm4, %v3512_v45 }
 0x4be   : > { %2509 = vmatpush3.msra.mxu1 %v1077_v46  ;;  %2510 = vmatprep.mubr.msk.f32.mxu1 %vm3093_vm1, %v3092_v14 }
 0x4bf   : > { %2615 = vmatprep.subr.bf16.mxu1 %v3101_v23 }
 0x4c0   : > { %v3519_v47 = vpop.eup %2817 }
 0x4c1   : > { %2511 = vmatmul.mubr.msk.f32.vlgmr.msra.gmra.mrb[10].mxu1 %vm563_vm4, %v3519_v47 }
 0x4c2   : > { %2528 = vmatprep.mubr.msk.f32.mxu1 %vm3093_vm1, %v3092_v14 }
 0x4c5   : > { %2618 = vmatpush3.bf16.xpose.msk.msra.mxu1 %vm3525_vm6, %v2616_v27 }
 0x4c6   : > { %2622 = vmatprep.subr.bf16.mxu1 %v3101_v23 }
 0x4cc   : > { %2529 = vmatmul.mubr.msk.f32.vlgmr.msra.gmra.mrb[12].mxu1 %vm488_vm3, %v3490_v28 }
 0x4cd   : > { %2542 = vmatprep.mubr.msk.f32.mxu1 %vm3093_vm1, %v3092_v14 }
 0x4ea   : > { %v2770_v49 = vpop.permute.xlu1 %2769 }
 0x4eb   : > { %v2772_v50 = vunpack.i.h.bf16 %v2770_v49  ;;  %v2771_v51 = vunpack.i.l.bf16 %v2770_v49 }
 0x4ed   : > { %v2623_v52 = vpack.c.bf16 %v2772_v50, %v2771_v51  ;;  %v3603_v50 = vld [vmem:[#allocation3 + $0x10] sm:$0xff] }
 0x4ee   : > { %v1480_v53 = vpop.permute.xlu1 %1479 }
 0x4ef   : > { %2625 = vmatpush3.bf16.xpose.msk.msra.mxu1 %vm3525_vm6, %v2623_v52 }
 0x4f0   : > { %2633 = vmatprep.subr.bf16.mxu1 %v3101_v23 }
 0x4f6   : > { %2543 = vmatmul.mubr.msk.f32.vlgmr.msra.gmra.mrb[14].mxu1 %vm488_vm3, %v1480_v53 }
 0x4f7   : > { %2563 = vmatprep.mubr.msk.f32.mxu1 %vm3093_vm1, %v3092_v14 }
 0x588   : > { %v642_v54 = vpop.f32.mrb[4].mxu1 }
 0x589   : > { %649 = vst.msk [vmem:[#allocation5] sm:$0xff] %vm488_vm3, %v642_v54  ;;  %v2482_v55 = vpop.f32.mrb[5].mxu1 }
 0x58c   : > { %v810_v56 = vpop.f32.mrb[6].mxu1 }
 0x58d   : > { %819 = vst.msk [vmem:[#allocation5 + $0x8] sm:$0xff] %vm488_vm3, %v810_v56  ;;  %v2492_v57 = vpop.f32.mrb[7].mxu1 }
 0x590   : > { %v979_v58 = vpop.f32.mrb[8].mxu1 }
 0x591   : > { %988 = vst.msk [vmem:[#allocation5 + $0x10] sm:$0xff] %vm488_vm3, %v979_v58  ;;  %v2502_v59 = vpop.f32.mrb[9].mxu1 }
 0x594   : > { %v1148_v60 = vpop.f32.mrb[10].mxu1 }
 0x595   : > { %1157 = vst.msk [vmem:[#allocation5 + $0x18] sm:$0xff] %vm488_vm3, %v1148_v60  ;;  %v2512_v61 = vpop.f32.mrb[11].mxu1 }
 0x59f   : > { %v1362_v62 = vpop.f32.mrb[12].mxu1 }
 0x5a0   : > { %v2530_v63 = vpop.f32.mrb[13].mxu1  ;;  %v1369_v0 = vsel %vm488_vm3, %v1362_v62, -inf }
 0x5a1   : > { %1370 = vmax.xlane.f32.xlu0 %v1369_v0 }
 0x5c9   : > { %v1557_v2 = vpop.f32.mrb[14].mxu1 }
 0x5ca   : > { %v2544_v3 = vpop.f32.mrb[15].mxu1  ;;  %v1567_v4 = vsel %vm488_vm3, %v1557_v2, -inf }
 0x5cb   : > { %1568 = vmax.xlane.f32.xlu1 %v1567_v4 }
 0x62e   : > { %v1371_v6 = vpop.xlane.xlu0 %1370 }
 0x62f   : > { %v3553_v7 = vmax.f32 %v3550_v5, %v1371_v6 }
 0x631   : > { %v1373_v8 = vsub.f32 %v3550_v5, %v3553_v7  ;;  %1476 = vst.msk [vmem:[#allocation3] sm:$0xff] %vm646_vm5, %v3553_v7  ;;  %1378 = vperm.xlu0 %2773, %v3553_v7   ;;  %v1763_v5 = vld [vmem:[#allocation5 + $0x10] sm:$0xff] }
 0x658   : > { %v1569_v10 = vpop.xlane.xlu1 %1568 }
 0x659   : > { %v3563_v11 = vmax.f32 %v3560_v9, %v1569_v10 }
 0x65b   : > { %v1571_v12 = vsub.f32 %v3560_v9, %v3563_v11  ;;  %1673 = vst.msk [vmem:[#allocation3 + $0x8] sm:$0xff] %vm646_vm5, %v3563_v11  ;;  %1576 = vperm.xlu1 %2774, %v3563_v11   ;;  %v1073_v9 = vsel %vm563_vm4, %v3519_v47, 0.0 }
 0x65f   : > { %2776 = vrot.lane.b32.xlu1 %v3486_v26, %s3095_s28  ;;  %s2993_s28 = scalar_lea.vmem %s2992_s5, 256 }
 0x663   : > { %2781 = vrot.lane.b32.xlu1 %v3486_v26, %s3094_s11 }
 0x667   : > { %2786 = vrot.lane.b32.xlu1 %v3486_v26, %s3097_s20 }
 0x66b   : > { %1676 = vrot.lane.b32.xlu1 %v3490_v28, %s3097_s20 }
 0x6b0   : > { %v1379_v13 = vpop.permute.xlu0 %1378 }
 0x6b1   : > { %v1381_v15 = vsub.f32 %v1362_v62, %v1379_v13  ;;  %v904_v13 = vsel %vm563_vm4, %v3512_v45, 0.0 }
 0x6b3   : > { %v1382_v16 = vmul.f32 1.442695, %v1381_v15  ;;  %v1572_v15 = vmul.f32 1.442695, %v1571_v12 }
 0x6b5   : > { %2819 = vpow2.f32 %v1382_v16 }
 0x6bf   : > { %v3579_v30 = vpop.eup %2819 }
 0x6da   : > { %v1577_v17 = vpop.permute.xlu1 %1576 }
 0x6db   : > { %v1579_v18 = vsub.f32 %v1557_v2, %v1577_v17  ;;  %v1956_v17 = vld [vmem:[#allocation3 + $0x18] sm:$0xff] }
 0x6dd   : > { %v1580_v19 = vmul.f32 1.442695, %v1579_v18 }
 0x6de   : > { %v2777_v20 = vpop.permute.xlu1 %2776 }
 0x6df   : > { %2821 = vpow2.f32 %v1580_v19  ;;  %v2779_v21 = vunpack.i.h.bf16 %v2777_v20  ;;  %v2778_v22 = vunpack.i.l.bf16 %v2777_v20 }
 0x6e1   : > { %v2620_v24 = vpack.c.bf16 %v2779_v21, %v2778_v22 }
 0x6e2   : > { %v2782_v25 = vpop.permute.xlu1 %2781 }
 0x6e3   : > { %v2784_v27 = vunpack.i.h.bf16 %v2782_v25  ;;  %v2783_v29 = vunpack.i.l.bf16 %v2782_v25  ;;  %2621 = vmatpush3.bf16.msra.mxu0 %v2620_v24 }
 0x6e4   : > { %2626 = vmatprep.subr.bf16.mxu0 %v3101_v23 }
 0x6e5   : > { %v2627_v31 = vpack.c.bf16 %v2784_v27, %v2783_v29  ;;  %v1566_v27 = vld [vmem:[#allocation5 + $0x8] sm:$0xff] }
 0x6e6   : > { %2536 = vmatmul.mubr.msk.f32.vlgmr.msra.gmra.mrb[8].mxu0 %vm488_vm3, %v3579_v30  ;;  %v2787_v32 = vpop.permute.xlu1 %2786 }
 0x6e7   : > { %2628 = vmatpush3.bf16.msra.mxu0 %v2627_v31  ;;  %2549 = vmatprep.mubr.msk.f32.mxu0 %vm3093_vm1, %v3092_v14  ;;  %v2789_v34 = vunpack.i.h.bf16 %v2787_v32  ;;  %v2788_v35 = vunpack.i.l.bf16 %v2787_v32 }
 0x6e8   : > { %2629 = vmatprep.subr.bf16.mxu0 %v3101_v23 }
 0x6e9   : > { %v3586_v33 = vpop.eup %2821  ;;  %v2630_v36 = vpack.c.bf16 %v2789_v34, %v2788_v35 }
 0x6ea   : > { %2550 = vmatmul.mubr.msk.f32.vlgmr.msra.gmra.mrb[10].mxu0 %vm488_vm3, %v3586_v33  ;;  %v1677_v37 = vpop.permute.xlu1 %1676  ;;  %v1583_v11 = vsel %vm488_vm3, %v3586_v33, 0.0 }
 0x6eb   : > { %2556 = vmatprep.mubr.msk.f32.mxu0 %vm3093_vm1, %v3092_v14 }
 0x6f0   : > { %2632 = vmatpush3.bf16.xpose.msk.msra.mxu0 %vm3525_vm6, %v2630_v36  ;;  %v1385_v36 = vsel %vm488_vm3, %v3579_v30, 0.0 }
 0x6f1   : > { %2640 = vmatprep.subr.bf16.mxu0 %v3101_v23 }
 0x6f7   : > { %2557 = vmatmul.mubr.msk.f32.vlgmr.msra.gmra.mrb[12].mxu0 %vm488_vm3, %v1677_v37 }
 0x6f8   : > { %2577 = vmatprep.mubr.msk.f32.mxu0 %vm3093_vm1, %v3092_v14 }
 0x7b9   : > { %v3598_v38 = vpop.f32.mrb[8].mxu0 }
 0x7ba   : > { %v2537_v39 = vpop.f32.mrb[9].mxu0 }
 0x7bd   : > { %v3600_v40 = vpop.f32.mrb[10].mxu0 }
 0x7be   : > { %v2551_v42 = vpop.f32.mrb[11].mxu0 }
 0x7ca   : > { %v1754_v44 = vpop.f32.mrb[12].mxu0 }
 0x7cb   : > { %v2558_v46 = vpop.f32.mrb[13].mxu0  ;;  %v1764_v49 = vsel %vm488_vm3, %v1754_v44, -inf }
 0x7cc   : > { %1765 = vmax.xlane.f32.xlu1 %v1764_v49 }
 0x859   : > { %v1766_v51 = vpop.xlane.xlu1 %1765 }
 0x85a   : > { %v3606_v52 = vmax.f32 %v3603_v50, %v1766_v51 }
 0x85c   : > { %v1768_v53 = vsub.f32 %v3603_v50, %v3606_v52  ;;  %1870 = vst.msk [vmem:[#allocation3 + $0x10] sm:$0xff] %vm646_vm5, %v3606_v52  ;;  %1773 = vperm.xlu0 %2773, %v3606_v52  }
 0x85e   : > { %v1769_v37 = vmul.f32 1.442695, %v1768_v53 }
 0x860   : > { %2791 = vrot.lane.b32.xlu0 %v3486_v26, %s3098_s4 }
 0x864   : > { %2796 = vrot.lane.b32.xlu0 %v3486_v26, %s3099_s8 }
 0x868   : > { %1873 = vrot.lane.b32.xlu0 %v3490_v28, %s3099_s8 }
 0x8db   : > { %v1774_v54 = vpop.permute.xlu0 %1773 }
 0x8dc   : > { %v1776_v55 = vsub.f32 %v1754_v44, %v1774_v54 }
 0x8de   : > { %v1777_v56 = vmul.f32 1.442695, %v1776_v55 }
 0x8df   : > { %v2792_v57 = vpop.permute.xlu0 %2791 }
 0x8e0   : > { %2823 = vpow2.f32 %v1777_v56  ;;  %v2794_v58 = vunpack.i.h.bf16 %v2792_v57  ;;  %v2793_v59 = vunpack.i.l.bf16 %v2792_v57  ;;  %v1374_v57 = vmul.f32 1.442695, %v1373_v8 }
 0x8e1   : > { %2825 = vpow2.f32 %v1572_v15 }
 0x8e2   : > { %v2634_v60 = vpack.c.bf16 %v2794_v58, %v2793_v59 }
 0x8e3   : > { %v2797_v61 = vpop.permute.xlu0 %2796 }
 0x8e4   : > { %2635 = vmatpush3.bf16.msra.mxu1 %v2634_v60  ;;  %v2799_v62 = vunpack.i.h.bf16 %v2797_v61  ;;  %v2798_v63 = vunpack.i.l.bf16 %v2797_v61 }
 0x8e5   : > { %2636 = vmatprep.subr.bf16.mxu1 %v3101_v23 }
 0x8e6   : > { %v2637_v1 = vpack.c.bf16 %v2799_v62, %v2798_v63 }
 0x8e7   : > { %v1874_v28 = vpop.permute.xlu0 %1873 }
 0x8ea   : > { %v2824_v0 = vpop.eup %2823 }
 0x8eb   : > { %2564 = vmatmul.mubr.msk.f32.vlgmr.msra.gmra.mrb[16].mxu1 %vm488_vm3, %v2824_v0  ;;  %v2826_v16 = vpop.eup %2825  ;;  %v1780_v12 = vsel %vm488_vm3, %v2824_v0, 0.0 }
 0x8ec   : > { %2570 = vmatprep.mubr.msk.f32.mxu1 %vm3093_vm1, %v3092_v14 }
 0x8ed   : > { %2639 = vmatpush3.bf16.xpose.msk.msra.mxu1 %vm3525_vm6, %v2637_v1 }
 0x8f4   : > { %2571 = vmatmul.mubr.msk.f32.vlgmr.msra.gmra.mrb[18].mxu1 %vm488_vm3, %v1874_v28 }
 0x9be   : > { %v3626_v2 = vpop.f32.mrb[16].mxu1 }
 0x9bf   : > { %v2565_v3 = vpop.f32.mrb[17].mxu1 }
 0x9c7   : > { %v1951_v4 = vpop.f32.mrb[18].mxu1 }
 0x9c8   : > { %v2572_v6 = vpop.f32.mrb[19].mxu1  ;;  %v1961_v10 = vsel %vm488_vm3, %v1951_v4, -inf }
 0x9c9   : > { %1962 = vmax.xlane.f32.xlu0 %v1961_v10 }
 0x9df   : > { %2801 = vrot.lane.b32.xlu0 %v3486_v26, %s3100_s13 }
 0x9fe   : > { %905 = vadd.xlane.f32.xlu0 %v904_v13 }
 0xa02   : > { %571 = vadd.xlane.f32.xlu0 %v570_v48 }
 0xa18   : > { %1589 = vperm.xlu0 %2773, %v2826_v16  }
 0xa56   : > { %v1963_v18 = vpop.xlane.xlu0 %1962 }
 0xa57   : > { %v1964_v19 = vmax.f32 %v1956_v17, %v1963_v18  ;;  %v2131_v18 = vld [vmem:[#allocation14 + $0x10] sm:$0xff] }
 0xa59   : > { %v1965_v20 = vsub.f32 %v1956_v17, %v1964_v19  ;;  %2067 = vst.msk [vmem:[#allocation3 + $0x18] sm:$0xff] %vm646_vm5, %v1964_v19  ;;  %1970 = vperm.xlu1 %2774, %v1964_v19   ;;  %v2130_v17 = vld [vmem:[#allocation14 + $0x8] sm:$0xff] }
 0xa5a   : > { %v2802_v26 = vpop.permute.xlu0 %2801 }
 0xa5b   : > { %v2804_v45 = vunpack.i.h.bf16 %v2802_v26  ;;  %v2803_v21 = vunpack.i.l.bf16 %v2802_v26  ;;  %v1966_v39 = vmul.f32 1.442695, %v1965_v20  ;;  %v2132_v20 = vld [vmem:[#allocation14 + $0x18] sm:$0xff] }
 0xa5c   : > { %v2647_v26 = vpack.c.bf16 %v2132_v20, %v2131_v18 }
 0xa5d   : > { %v2641_v22 = vpack.c.bf16 %v2804_v45, %v2803_v21  ;;  %v2133_v45 = vld [vmem:[#allocation14 + $0x20] sm:$0xff] }
 0xa5f   : > { %2642 = vmatpush3.bf16.msra.mxu0 %v2641_v22 }
 0xa60   : > { %2643 = vmatprep.subr.bf16.mxu0 %v3101_v23 }
 0xa7d   : > { %735 = vadd.xlane.f32.xlu1 %v734_v41 }
 0xa81   : > { %1074 = vadd.xlane.f32.xlu1 %v1073_v9 }
 0xa85   : > { %1584 = vadd.xlane.f32.xlu1 %v1583_v11  ;;  %v2135_v11 = vld [vmem:[#allocation14 + $0x30] sm:$0xff] }
 0xa89   : > { %1781 = vadd.xlane.f32.xlu1 %v1780_v12  ;;  %v2136_v12 = vld [vmem:[#allocation14 + $0x38] sm:$0xff] }
 0xa8b   : > { %v906_v24 = vpop.xlane.xlu0 %905 }
 0xa8c   : > { %986 = vst.msk [vmem:[#allocation4 + $0x10] sm:$0xff] %vm646_vm5, %v906_v24 }
 0xa8f   : > { %v572_v25 = vpop.xlane.xlu0 %571 }
 0xa90   : > { %648 = vst.msk [vmem:[#allocation4] sm:$0xff] %vm646_vm5, %v572_v25 }
 0xa93   : > { %v1761_v49 = vld [vmem:[#allocation4 + $0x10] sm:$0xff] }
 0xa97   : > { %v1590_v43 = vpop.permute.xlu0 %1589  ;;  %v1367_v0 = vld [vmem:[#allocation4] sm:$0xff] }
 0xa98   : > { %v1592_v29 = vmul.f32 %v1590_v43, %v1566_v27 }
 0xa9a   : > { %v1672_v31 = vadd.f32 %v3600_v40, %v1592_v29  ;;  %v2653_v29 = vpack.c.bf16 %v2136_v12, %v2135_v11 }
 0xa9c   : > { %1675 = vst.msk [vmem:[#allocation5 + $0x8] sm:$0xff] %vm488_vm3, %v1672_v31  ;;  %v1368_v31 = vld [vmem:[#allocation5] sm:$0xff] }
 0xaa3   : > { %v2086_v41 = vld [vmem:[#allocation5 + $0x8] sm:$0xff] }
 0xad8   : > { %v1971_v47 = vpop.permute.xlu1 %1970 }
 0xad9   : > { %v1973_v32 = vsub.f32 %v1951_v4, %v1971_v47 }
 0xadb   : > { %v1974_v33 = vmul.f32 1.442695, %v1973_v32 }
 0xadd   : > { %2827 = vpow2.f32 %v1974_v33 }
 0xade   : > { %2829 = vpow2.f32 %v1769_v37 }
 0xadf   : > { %2831 = vpow2.f32 %v1966_v39 }
 0xae7   : > { %v2828_v34 = vpop.eup %2827 }
 0xae8   : > { %2578 = vmatmul.mubr.msk.f32.vlgmr.msra.gmra.mrb[14].mxu0 %vm488_vm3, %v2828_v34  ;;  %v1977_v35 = vsel %vm488_vm3, %v2828_v34, 0.0  ;;  %v2830_v40 = vpop.eup %2829  ;;  %v1960_v34 = vld [vmem:[#allocation5 + $0x18] sm:$0xff] }
 0xae9   : > { %1978 = vadd.xlane.f32.xlu1 %v1977_v35  ;;  %2596 = vmatprep.mubr.msk.f32.mxu0 %vm3093_vm1, %v3092_v14  ;;  %v2832_v42 = vpop.eup %2831  ;;  %v1779_v50 = vmul.f32 %v2830_v40, %v1761_v49 }
 0xaed   : > { %1386 = vadd.xlane.f32.xlu1 %v1385_v36 }
 0xafe   : > { %1786 = vperm.xlu1 %2774, %v2830_v40  }
 0xb02   : > { %1983 = vperm.xlu1 %2774, %v2832_v42  }
 0xb0a   : > { %v736_v44 = vpop.xlane.xlu1 %735 }
 0xb0b   : > { %817 = vst.msk [vmem:[#allocation4 + $0x8] sm:$0xff] %vm646_vm5, %v736_v44 }
 0xb0e   : > { %v1075_v46 = vpop.xlane.xlu1 %1074 }
 0xb0f   : > { %1155 = vst.msk [vmem:[#allocation4 + $0x18] sm:$0xff] %vm646_vm5, %v1075_v46 }
 0xb12   : > { %v1564_v14 = vld [vmem:[#allocation4 + $0x8] sm:$0xff]  ;;  %v1585_v30 = vpop.xlane.xlu1 %1584 }
 0xb13   : > { %v1582_v51 = vmul.f32 %v2826_v16, %v1564_v14  ;;  %v2129_v16 = vld [vmem:[#allocation14] sm:$0xff] }
 0xb14   : > { %v2644_v19 = vpack.c.bf16 %v2130_v17, %v2129_v16 }
 0xb15   : > { %v1586_v54 = vadd.f32 %v1585_v30, %v1582_v51 }
 0xb16   : > { %v1782_v52 = vpop.xlane.xlu1 %1781  ;;  %v1958_v61 = vld [vmem:[#allocation4 + $0x18] sm:$0xff]  ;;  %2645 = vmatpush3.bf16.msra.mxu0 %v2644_v19 }
 0xb17   : > { %1674 = vst.msk [vmem:[#allocation4 + $0x8] sm:$0xff] %vm646_vm5, %v1586_v54  ;;  %v1783_v53 = vadd.f32 %v1782_v52, %v1779_v50  ;;  %v1976_v62 = vmul.f32 %v2832_v42, %v1958_v61  ;;  %2646 = vmatprep.subr.bf16.mxu0 %v3101_v23 }
 0xb19   : > { %1871 = vst.msk [vmem:[#allocation4 + $0x10] sm:$0xff] %vm646_vm5, %v1783_v53 }
 0xb1a   : > { %2648 = vmatpush3.bf16.msra.mxu0 %v2647_v26 }
 0xb1b   : > { %2649 = vmatprep.subr.bf16.mxu0 %v3101_v23 }
 0xb1e   : > { %v2083_v55 = vld [vmem:[#allocation4 + $0x8] sm:$0xff] }
 0xb1f   : > { %2833 = vrcp.f32 %v2083_v55 }
 0xb20   : > { %v2093_v56 = vld [vmem:[#allocation4 + $0x10] sm:$0xff] }
 0xb21   : > { %2835 = vrcp.f32 %v2093_v56 }
 0xb22   : > { %2837 = vpow2.f32 %v1374_v57 }
 0xb29   : > { %v2834_v58 = vpop.eup %2833 }
 0xb2a   : > { %2089 = vperm.xlu0 %2773, %v2834_v58  }
 0xb2b   : > { %v2836_v59 = vpop.eup %2835 }
 0xb2c   : > { %2099 = vperm.xlu1 %2774, %v2836_v59   ;;  %v2838_v60 = vpop.eup %2837 }
 0xb2d   : > { %v1384_v28 = vmul.f32 %v2838_v60, %v1367_v0 }
 0xb30   : > { %1391 = vperm.xlu1 %2774, %v2838_v60  }
 0xb76   : > { %v1979_v63 = vpop.xlane.xlu1 %1978 }
 0xb77   : > { %v1980_v1 = vadd.f32 %v1979_v63, %v1976_v62 }
 0xb79   : > { %2068 = vst.msk [vmem:[#allocation4 + $0x18] sm:$0xff] %vm646_vm5, %v1980_v1 }
 0xb7a   : > { %v1387_v3 = vpop.xlane.xlu1 %1386 }
 0xb7b   : > { %v1388_v4 = vadd.f32 %v1387_v3, %v1384_v28 }
 0xb7d   : > { %1477 = vst.msk [vmem:[#allocation4] sm:$0xff] %vm646_vm5, %v1388_v4 }
 0xb7e   : > { %v1787_v7 = vpop.permute.xlu1 %1786 }
 0xb7f   : > { %v1789_v8 = vmul.f32 %v1787_v7, %v1763_v5 }
 0xb80   : > { %v2103_v6 = vld [vmem:[#allocation4 + $0x18] sm:$0xff] }
 0xb81   : > { %v1869_v10 = vadd.f32 %v3626_v2, %v1789_v8  ;;  %2839 = vrcp.f32 %v2103_v6  ;;  %v2134_v2 = vld [vmem:[#allocation14 + $0x28] sm:$0xff] }
 0xb82   : > { %v1984_v21 = vpop.permute.xlu1 %1983  ;;  %v2650_v22 = vpack.c.bf16 %v2134_v2, %v2133_v45 }
 0xb83   : > { %1872 = vst.msk [vmem:[#allocation5 + $0x10] sm:$0xff] %vm488_vm3, %v1869_v10  ;;  %v1986_v35 = vmul.f32 %v1984_v21, %v1960_v34 }
 0xb84   : > { %v2073_v13 = vld [vmem:[#allocation4] sm:$0xff]  ;;  %2651 = vmatpush3.bf16.msra.mxu0 %v2650_v22 }
 0xb85   : > { %2841 = vrcp.f32 %v2073_v13  ;;  %2652 = vmatprep.subr.bf16.mxu0 %v3101_v23 }
 0xb88   : > { %2654 = vmatpush3.bf16.msra.mxu0 %v2653_v29 }
 0xb8a   : > { %v2096_v25 = vld [vmem:[#allocation5 + $0x10] sm:$0xff] }
 0xb8b   : > { %v2840_v48 = vpop.eup %2839 }
 0xb8c   : > { %2109 = vperm.xlu0 %2773, %v2840_v48  }
 0xb8f   : > { %v2842_v15 = vpop.eup %2841 }
 0xb90   : > { %2079 = vperm.xlu0 %2773, %v2842_v15  }
 0xba9   : > { %v2090_v9 = vpop.permute.xlu0 %2089 }
 0xbaa   : > { %v2092_v24 = vmul.f32 %v2090_v9, %v2086_v41 }
 0xbab   : > { %v2100_v27 = vpop.permute.xlu1 %2099 }
 0xbac   : > { %v2102_v43 = vmul.f32 %v2100_v27, %v2096_v25  ;;  %2114 = vrot.lane.b32.xlu1 %v2092_v24, %s3100_s13 }
 0xbae   : > { %2118 = vrot.lane.b32.xlu0 %v2102_v43, %s3098_s4 }
 0xbaf   : > { %v1392_v47 = vpop.permute.xlu1 %1391 }
 0xbb0   : > { %v1394_v32 = vmul.f32 %v1392_v47, %v1368_v31 }
 0xbb2   : > { %v1474_v33 = vadd.f32 %v3598_v38, %v1394_v32 }
 0xbb4   : > { %1478 = vst.msk [vmem:[#allocation5] sm:$0xff] %vm488_vm3, %v1474_v33 }
 0xbbb   : > { %v2062_v36 = vpop.f32.mrb[14].mxu0  ;;  %v2076_v46 = vld [vmem:[#allocation5] sm:$0xff] }
 0xbbc   : > { %v2066_v37 = vadd.f32 %v2062_v36, %v1986_v35  ;;  %v2579_v39 = vpop.f32.mrb[15].mxu0 }
 0xbbe   : > { %2069 = vst.msk [vmem:[#allocation5 + $0x18] sm:$0xff] %vm488_vm3, %v2066_v37 }
 0xbc5   : > { %v2106_v23 = vld [vmem:[#allocation5 + $0x18] sm:$0xff] }
 0xc0b   : > { %v2110_v40 = vpop.permute.xlu0 %2109 }
 0xc0c   : > { %v2112_v42 = vmul.f32 %v2110_v40, %v2106_v23 }
 0xc0e   : > { %2122 = vrot.lane.b32.xlu1 %v2112_v42, %s3094_s11  ;;  %s2987_s11 = scalar_lea.vmem %s3686_s7, 128 }
 0xc0f   : > { %v2080_v44 = vpop.permute.xlu0 %2079  ;;  %p2988_p0 = scmp.ne.s32.totalorder %s3686_s7, %s2987_s11  ;;  %p2995_p13 = scmp.lt.s32.totalorder %s2993_s28, %s2987_s11 }
 0xc10   : > { %v2082_v38 = vmul.f32 %v2080_v44, %v2076_v46 }
 0xc11   : > { %p2989_p4 = pnand %p2988_p0, %p3783_p1  ;;  %p2996_p10 = por %p2995_p13, %p2994_p2 }
 0xc13   : > { %p2990_p8 = pneg %p2989_p4 }
 0xc15   : > { %p2997_p11 = pnand %p2996_p10, %p2990_p8 }
 0xc1e   : > { %v2115_v14 = vpop.permute.xlu1 %2114 }
 0xc1f   : > { %v2125_v30 = vsel %vm488_vm3, %v2082_v38, %v2115_v14 }
 0xc20   : > { %v2119_v49 = vpop.permute.xlu0 %2118 }
 0xc21   : > { %v2126_v51 = vsel %vm376_vm0, %v2125_v30, %v2119_v49 }
 0xc80   : > { %v2123_v54 = vpop.permute.xlu1 %2122 }
 0xc81   : > { %v2128_v50 = vsel %vm2127_vm7, %v2126_v51, %v2123_v54 }
 0xc82   : > { %2597 = vmatmul.mubr.msk.f32.vlgmr.msra.gmra.mrb[16].mxu0 %vm483_vm2, %v2128_v50 }
 0xd55   : > { %v2207_v52 = vpop.f32.mrb[16].mxu0 }
 0xd56   : > { %2211 = vst [vmem:[%s365_s0] sm:$0xff] %v2207_v52  ;;  %v2598_v53 = vpop.f32.mrb[17].mxu0 }
 0xd57   : > { %3000 = shalt.err (!%p2997_p11)
}
 0xd58   : > { %s3001_s18 = scalar_lea.hbm %s3691_s9, 128  ;;  %s3005_s4 = scalar_lea.hbm %s3744_s6, 256 }
 0xd59   : > { %p3002_p6 = scmp.ne.s32.totalorder %s3691_s9, %s3001_s18  ;;  %p3006_p12 = scmp.lt.u32.totalorder %s3691_s9, %s3744_s6 }
 0xd5a   : > { %p3007_p5 = scmp.lt.u32.totalorder %s3005_s4, %s3001_s18  ;;  %p3009_p0 = scmp.lt.u32.totalorder %s3001_s18, %s3691_s9 }
 0xd5b   : > { %p3003_p3 = pnand %p3002_p6, %p3783_p1 }
 0xd5c   : > { %p3008_p9 = por %p3007_p5, %p3006_p12 }
 0xd5d   : > { %p3004_p7 = pneg %p3003_p3 }
 0xd5e   : > { %p3010_p4 = por %p3009_p0, %p3008_p9 }
 0xd60   : > { %p3011_p8 = pnand %p3010_p4, %p3004_p7 }
 0xd62   : > { %3014 = shalt.err (!%p3011_p8)
}
 0xd63   : > { %2671 = dma.vmem_to_hbm [thread:$0]  (%p3783_p1), %s3686_s7, 128, %s3691_s9, %s2213_s12  }
 0xd64 PF: > { %s3784_s3 = sld [smem:[#allocation21_spill]]  ;;  %s2238_s17 = sand.u32 1, %s3061_s21  }
 0xd65   : > { %p3786_p13 = scmp.ge.s32.totalorder %s3081_s26, 2  ;;  %s2239_s10 = scalar_lea.sflag [#allocation8], %s2238_s17 }
 0xd6a   : > { %p3785_p2 = scmp.ne.s32.totalorder %s3784_s3, 0 }
 0xd6c   : > { %p2691_p10 = pnand %p3786_p13, %p3785_p2 }
 0xd6e   : > { %3056 = dma.done.wait (!%p2691_p10), %s2239_s10, 128  }
 0xd6f   : > { %3058 = vsyncadd (!%p2691_p10), %s2239_s10, 4294967168  ;;  %s26_s26 = sadd.s32 1, %s3081_s26   ;;  %s3787_s14 = sld [smem:[#allocation22_spill]] }
 0xd70   : > { %p23_p11 = scmp.ge.s32.totalorder %s26_s26, 4   ;;  %s3788_s21 = smov %s3065_s22 }
 0xd71   : > { %s3789_s22 = smov %s3069_s23  ;;  %s3790_s23 = smov %s3307_s19 }
 0xd72   : > { %s3791_s24 = smov %s3077_s25  ;;  %25 = sbr.rel (!%p23_p11) target bundleno = 14 (0xe), region = 140 }
 0xd75   : > { %s3792_s25 = smov %s3787_s14 }
 0xd79   :  { %2244 = vsyncpa [#allocation7], 1 }
 0xd7a   :  { %2246 = vsyncpa [#allocation7 + $0x1], 1 }
 0xd7b   :  { %2247 = vsyncpa [#allocation10], 1 }
 0xd7c   :  { %2249 = vsyncpa [#allocation10 + $0x1], 1 }
 0xd7d   :  { %2250 = vsyncpa [#allocation13], 1 }
 0xd7e   :  { %2251 = vsyncpa [#allocation8], 1 }
 0xd7f   :  { %2253 = vsyncpa [#allocation8 + $0x1], 1 }

// kernel: tpu_custom_call.1
= control target key start
LH: loop header
LB: loop body
LE: loop exit
PB: predicated region body
PF: predicated region fallthrough
CT: control target
= control target key end

     0   :  { %s3738_s0 = inlined_call_operand.hbm [shape: f32[2,16,32], index: 0, kind: input, shape index: {}]   ;;  %s3739_s1 = inlined_call_operand.hbm [shape: f32[2,8,32], index: 1, kind: input, shape index: {}]   ;;  %s3740_s2 = inlined_call_operand.vmem [shape: f32[4,32], index: 2, kind: input, shape index: {}]   ;;  %s3741_s3 = inlined_call_operand.hbm [shape: f32[32,192], index: 3, kind: input, shape index: {}]   ;;  %s3742_s4 = inlined_call_operand.hbm [shape: f32[32,128], index: 4, kind: input, shape index: {}]   ;;  %s3743_s5 = inlined_call_operand.hbm [shape: f32[64,128], index: 5, kind: input, shape index: {}]   ;;  %s3744_s6 = inlined_call_operand.hbm [shape: f32[2,8,128], index: 6, kind: output, shape index: {}]  }
   0x1   :  { %3753 = sst [smem:[#allocation23_spill]] %s3738_s0 }
   0x2   :  { %3754 = sst [smem:[#allocation24_spill]] %s3741_s3 }
   0x3   :  { %3755 = sst [smem:[#allocation25_spill]] %s3742_s4 }
   0x4   :  { %3756 = sst [smem:[#allocation26_spill]] %s3743_s5 }
   0x5   :  { %11 = vsyncpa [#allocation7], 0 }
   0x6   :  { %13 = vsyncpa [#allocation7 + $0x1], 0 }
   0x7   :  { %14 = vsyncpa [#allocation10], 0 }
   0x8   :  { %16 = vsyncpa [#allocation10 + $0x1], 0 }
   0x9   :  { %17 = vsyncpa [#allocation13], 0 }
   0xa   :  { %18 = vsyncpa [#allocation8], 0 }
   0xb   :  { %20 = vsyncpa [#allocation8 + $0x1], 0  ;;  %s3139_s21 = smov 0   ;;  %s3141_s22 = smov 0  }
   0xc   :  { %s3143_s23 = smov 0   ;;  %s3145_s24 = smov 0  }
   0xd   :  { %s3147_s25 = smov 0   ;;  %s3149_s26 = smov 0  }
   0xe LB: > { %s3170_s27 = sadd.s32 4294967295, %s3081_s26   ;;  %s2359_s28 = sadd.s32 4294967294, %s3081_s26   ;;  %s3081_s26 = sphi %s3149_s26, %s26_s26   ;;  %s3077_s25 = sphi %s3147_s25, %s3792_s25   ;;  %s3073_s24 = sphi %s3145_s24, %s3791_s24   ;;  %s3069_s23 = sphi %s3143_s23, %s3790_s23   ;;  %s3065_s22 = sphi %s3141_s22, %s3789_s22   ;;  %s3061_s21 = sphi %s3139_s21, %s3788_s21  }
   0xf   : > { %p60_p0 = scmp.ne.s32.totalorder %s3065_s22, %s3061_s21  ;;  %p3745_p1 = scmp.eq.s32.totalorder %s3170_s27, 0 }
  0x10   : > { %p200_p3 = scmp.eq.s32.totalorder %s2359_s28, 1  ;;  %p2360_p5 = scmp.ge.s32.totalorder %s3081_s26, 1 }
  0x11   : > { %p3179_p4 = por %p3745_p1, %p60_p0  ;;  %p207_p7 = scmp.lt.s32.totalorder %s3081_s26, 3 }
  0x12   : > { %p3184_p6 = por %p200_p3, %p60_p0  ;;  %s3083_s8 = smov [#allocation11]  }
  0x13   : > { %s3757_s29 = scalar_select %p3179_p4, 1, 0 }
  0x14   : > { %s3758_s30 = scalar_select %p3184_p6, 1, 0 }
  0x15   : > { %p3189_p8 = pnand %p2360_p5, %p207_p7  ;;  %s222_s9 = sshll.u32 %s3083_s8, 4  ;;  %s3193_s9 = int_to_ptr.vmem [resolvable:$true] %s222_s9 }
  0x16   : > { %3759 = sst [smem:[#allocation21_spill]] %s3758_s30  ;;  %s3084_s11 = smov [#allocation12]  }
  0x17   : > { %s3760_s7 = scalar_select %p3189_p8, 1, 0 }
  0x18   : > { %p2673_p9 = pneg %p3189_p8  ;;  %s235_s12 = sshll.u32 %s3084_s11, 4  ;;  %s3204_s12 = int_to_ptr.vmem [resolvable:$true] %s235_s12 }
  0x19   : > { %s3762_s3 = sld [smem:[#allocation24_spill]] }
  0x1a   : > { %p3200_p11 = pnand %p2673_p9, %p3745_p1 }
  0x1c   : > { %p3214_p13 = pneg %p3200_p11 }
  0x1f   : > { %s2843_s15 = scalar_lea.hbm %s3762_s3, 1024 }
  0x20   : > { %p2844_p12 = scmp.ne.s32.totalorder %s3762_s3, %s2843_s15  ;;  %p2850_p5 = scmp.lt.u32.totalorder %s2843_s15, %s3762_s3 }
  0x22   : > { %p2846_p0 = pnand %p3214_p13, %p2844_p12 }
  0x24   : > { %p2847_p3 = pneg %p2846_p0 }
  0x26   : > { %p2852_p7 = pnand %p2850_p5, %p2847_p3 }
  0x28   : > { %2855 = shalt.err (!%p2852_p7)
}
  0x29   : > { %s2856_s28 = scalar_lea.vmem %s3193_s9, 1024  ;;  %p2864_p2 = scmp.lt.s32.totalorder %s3193_s9, %s3193_s9 }
  0x2a   : > { %p2857_p9 = scmp.ne.s32.totalorder %s3193_s9, %s2856_s28  ;;  %p2865_p6 = scmp.lt.s32.totalorder %s2856_s28, %s2856_s28 }
  0x2c   : > { %p2859_p10 = pnand %p2857_p9, %p3214_p13  ;;  %p2866_p12 = por %p2865_p6, %p2864_p2 }
  0x2e   : > { %p2860_p1 = pneg %p2859_p10 }
  0x30   : > { %p2867_p0 = pnand %p2866_p12, %p2860_p1 }
  0x32   : > { %2870 = shalt.err (!%p2867_p0)
}
  0x33   : > { %s3085_s8 = smov 256   ;;  %s3086_s11 = smov 16  }
  0x34   : > { %2676 = dma.hbm_to_vmem [thread:$0]  (!%p3200_p11), %s3762_s3, 1024, %s3193_s9, [#allocation10], %s3085_s8, %s3085_s8, %s3086_s11  }
  0x35   : > { %s3764_s4 = sld [smem:[#allocation25_spill]] }
  0x3b   : > { %s2871_s17 = scalar_lea.hbm %s3764_s4, 512 }
  0x3c   : > { %p2872_p2 = scmp.ne.s32.totalorder %s3764_s4, %s2871_s17  ;;  %p2878_p10 = scmp.lt.u32.totalorder %s2871_s17, %s3764_s4 }
  0x3e   : > { %p2874_p1 = pnand %p2872_p2, %p3214_p13 }
  0x40   : > { %p2875_p6 = pneg %p2874_p1 }
  0x42   : > { %p2880_p3 = pnand %p2878_p10, %p2875_p6 }
  0x44   : > { %2883 = shalt.err (!%p2880_p3)
}
  0x45   : > { %s2884_s9 = scalar_lea.vmem %s3204_s12, 512  ;;  %p2892_p12 = scmp.lt.s32.totalorder %s3204_s12, %s3204_s12 }
  0x46   : > { %p2885_p5 = scmp.ne.s32.totalorder %s3204_s12, %s2884_s9  ;;  %p2893_p0 = scmp.lt.s32.totalorder %s2884_s9, %s2884_s9 }
  0x48   : > { %p2887_p7 = pnand %p2885_p5, %p3214_p13  ;;  %p2894_p2 = por %p2893_p0, %p2892_p12 }
  0x4a   : > { %p2888_p9 = pneg %p2887_p7 }
  0x4c   : > { %p2895_p1 = pnand %p2894_p2, %p2888_p9 }
  0x4e   : > { %2898 = shalt.err (!%p2895_p1)
}
  0x4f   : > { %s3749_s8 = smov 128   ;;  %s3750_s30 = smov 8  }
  0x50   : > { %2679 = dma.hbm_to_vmem [thread:$0]  (!%p3200_p11), %s3764_s4, 512, %s3204_s12, [#allocation13], %s3749_s8, %s3749_s8, %s3750_s30  }
  0x51   : > { %s3089_s14 = smov [#allocation14]   ;;  %s3765_s5 = sld [smem:[#allocation26_spill]] }
  0x52   : > { %s248_s15 = sshll.u32 %s3089_s14, 4  ;;  %s249_s15 = int_to_ptr.vmem [resolvable:$true] %s248_s15 }
  0x57   : > { %s2899_s19 = scalar_lea.hbm %s3765_s5, 1024 }
  0x58   : > { %p2900_p6 = scmp.ne.s32.totalorder %s3765_s5, %s2899_s19  ;;  %p2906_p5 = scmp.lt.u32.totalorder %s2899_s19, %s3765_s5 }
  0x5a   : > { %p2902_p10 = pnand %p2900_p6, %p3214_p13 }
  0x5c   : > { %p2903_p3 = pneg %p2902_p10 }
  0x5e   : > { %p2908_p7 = pnand %p2906_p5, %p2903_p3 }
  0x60   : > { %2911 = shalt.err (!%p2908_p7)
}
  0x61   : > { %s2912_s12 = scalar_lea.vmem %s249_s15, 1024  ;;  %p2920_p2 = scmp.lt.s32.totalorder %s249_s15, %s249_s15 }
  0x62   : > { %p2913_p9 = scmp.ne.s32.totalorder %s249_s15, %s2912_s12  ;;  %p2921_p1 = scmp.lt.s32.totalorder %s2912_s12, %s2912_s12 }
  0x64   : > { %p2915_p12 = pnand %p2913_p9, %p3214_p13  ;;  %p2922_p4 = por %p2921_p1, %p2920_p2 }
  0x66   : > { %p2916_p0 = pneg %p2915_p12 }
  0x68   : > { %p2923_p8 = pnand %p2922_p4, %p2916_p0 }
  0x6a   : > { %2926 = shalt.err (!%p2923_p8)
}
  0x6b   : > { %2682 = dma.hbm_to_vmem [thread:$0]  (!%p3200_p11), %s3765_s5, 1024, %s249_s15, [#allocation13], %s3749_s8, %s3749_s8, %s3750_s30  }
  0x6c   : > { %s38_s18 = sadd.s32 1, %s3077_s25  ;;  %s47_s10 = sadd.s32 1, %s3069_s23 }
  0x6d   : > { %p40_p4 = scmp.ge.s32.totalorder %s38_s18, 2  ;;  %p54_p8 = scmp.ne.s32.totalorder %s3069_s23, %s3065_s22 }
  0x6e   : > { %p55_p13 = scmp.eq.s32.totalorder %s3081_s26, 0  ;;  %p3768_p10 = scmp.eq.s32.totalorder %s3170_s27, 1 }
  0x6f   : > { %s3794_s18 = smov (%p40_p4, %s38_s18), 0  ;;  %p2697_p11 = scmp.lt.s32.totalorder %s3081_s26, 2 }
  0x70   : > { %3766 = sst [smem:[#allocation22_spill]] %s3794_s18  ;;  %p3289_p6 = por %p55_p13, %p54_p8 }
  0x71   : > { %p3295_p3 = por %p3768_p10, %p54_p8  ;;  %s42_s15 = ssub.s32 %s3077_s25, %s3794_s18 }
  0x72   : > { %p45_p5 = scmp.eq.s32.totalorder %s42_s15, 0  ;;  %s3303_s16 = sand.u32 1, %s3069_s23  }
  0x73   : > { %s3769_s14 = scalar_select %p3295_p3, 1, 0 }
  0x74   : > { %s2365_s17 = sshll.u32 %s3303_s16, 4  ;;  %s2417_s20 = sshll.u32 %s3077_s25, 8 }
  0x75   : > { %s3307_s19 = scalar_select %p45_p5, %s3069_s23, %s47_s10  }
  0x76   : > { %s3770_s0 = sld [smem:[#allocation23_spill]]  ;;  %s266_s3 = scalar_lea.vmem [#allocation6], %s2365_s17 }
  0x77   : > { %s275_s11 = sshll.u32 %s266_s3, 4  ;;  %p3319_p7 = pnand %p2697_p11, %p3289_p6  ;;  %s3315_s11 = int_to_ptr.vmem [resolvable:$true] %s275_s11 }
  0x78   : > { %s2368_s8 = sshll.u32 %s3303_s16, 3  ;;  %s263_s28 = scalar_lea.sflag [#allocation7], %s3303_s16 }
  0x79   : > { %p2929_p12 = pneg %p3319_p7 }
  0x7c   : > { %s3313_s12 = scalar_lea.hbm %s3770_s0, %s2417_s20  ;;  %s2932_s13 = scalar_lea.hbm %s3770_s0, 512 }
  0x7d   : > { %s2927_s20 = scalar_lea.hbm %s3313_s12, 256  ;;  %p2933_p1 = scmp.lt.u32.totalorder %s3313_s12, %s3770_s0 }
  0x7e   : > { %p2928_p9 = scmp.ne.s32.totalorder %s3313_s12, %s2927_s20  ;;  %p2934_p4 = scmp.lt.u32.totalorder %s2932_s13, %s2927_s20 }
  0x7f   : > { %p2936_p13 = scmp.lt.u32.totalorder %s2927_s20, %s3313_s12 }
  0x80   : > { %p2930_p0 = pnand %p2929_p12, %p2928_p9  ;;  %p2935_p8 = por %p2934_p4, %p2933_p1 }
  0x82   : > { %p2931_p2 = pneg %p2930_p0  ;;  %p2937_p6 = por %p2936_p13, %p2935_p8 }
  0x84   : > { %p2938_p10 = pnand %p2937_p6, %p2931_p2 }
  0x86   : > { %2941 = shalt.err (!%p2938_p10)
}
  0x87   : > { %s2942_s10 = scalar_lea.vmem %s3315_s11, 256  ;;  %s3090_s17 = smov [#allocation6]  }
  0x88   : > { %p2943_p11 = scmp.ne.s32.totalorder %s3315_s11, %s2942_s10  ;;  %s2947_s9 = sshll.u32 %s3090_s17, 4  ;;  %s2948_s9 = int_to_ptr.vmem [resolvable:$false] %s2947_s9 }
  0x89   : > { %s2949_s30 = scalar_lea.vmem %s2948_s9, 512  ;;  %p2950_p0 = scmp.lt.s32.totalorder %s3315_s11, %s2948_s9 }
  0x8a   : > { %p2945_p5 = pnand %p2943_p11, %p2929_p12  ;;  %p2951_p1 = scmp.lt.s32.totalorder %s2949_s30, %s2942_s10 }
  0x8c   : > { %p2946_p9 = pneg %p2945_p5  ;;  %p2952_p4 = por %p2951_p1, %p2950_p0 }
  0x8e   : > { %p2953_p8 = pnand %p2952_p4, %p2946_p9 }
  0x90   : > { %2956 = shalt.err (!%p2953_p8)
}
  0x91   : > { %s3772_s20 = smov 8   ;;  %s3773_s13 = smov 128  }
  0x92   : > { %2686 = dma.hbm_to_vmem [thread:$0]  (!%p3319_p7), %s3313_s12, 256, %s3315_s11, %s263_s28, %s3773_s13, %s3773_s13, %s3772_s20  }
  0x93   : > { %s2369_s3 = sshll.u32 %s3077_s25, 7  ;;  %s289_s30 = scalar_lea.vmem [#allocation9], %s2368_s8 }
  0x94   : > { %s3360_s9 = scalar_lea.hbm %s3739_s1, %s2369_s3  ;;  %s296_s0 = sshll.u32 %s289_s30, 4  ;;  %s297_s0 = int_to_ptr.vmem [resolvable:$true] %s296_s0 }
  0x95   : > { %s3774_s4 = sand.u32 1, %s3081_s26   ;;  %s2957_s18 = scalar_lea.hbm %s3360_s9, 128 }
  0x96   : > { %s286_s5 = scalar_lea.sflag [#allocation10], %s3774_s4  ;;  %p2958_p2 = scmp.ne.s32.totalorder %s3360_s9, %s2957_s18 }
  0x97   : > { %s2962_s28 = scalar_lea.hbm %s3739_s1, 256  ;;  %p2963_p10 = scmp.lt.u32.totalorder %s3360_s9, %s3739_s1 }
  0x98   : > { %p2960_p13 = pnand %p2958_p2, %p2929_p12  ;;  %p2964_p11 = scmp.lt.u32.totalorder %s2962_s28, %s2957_s18 }
  0x99   : > { %p2966_p9 = scmp.lt.u32.totalorder %s2957_s18, %s3360_s9 }
  0x9a   : > { %p2961_p6 = pneg %p2960_p13  ;;  %p2965_p5 = por %p2964_p11, %p2963_p10 }
  0x9c   : > { %p2967_p0 = por %p2966_p9, %p2965_p5 }
  0x9e   : > { %p2968_p1 = pnand %p2967_p0, %p2961_p6 }
  0xa0   : > { %2971 = shalt.err (!%p2968_p1)
}
  0xa1   : > { %s2972_s4 = scalar_lea.vmem %s297_s0, 128  ;;  %s3091_s8 = smov [#allocation9]  }
  0xa2   : > { %p2973_p4 = scmp.ne.s32.totalorder %s297_s0, %s2972_s4  ;;  %s2977_s13 = sshll.u32 %s3091_s8, 4  ;;  %s2978_s13 = int_to_ptr.vmem [resolvable:$false] %s2977_s13 }
  0xa3   : > { %s2979_s3 = scalar_lea.vmem %s2978_s13, 256  ;;  %p2980_p13 = scmp.lt.s32.totalorder %s297_s0, %s2978_s13 }
  0xa4   : > { %p2975_p8 = pnand %p2973_p4, %p2929_p12  ;;  %p2981_p3 = scmp.lt.s32.totalorder %s2979_s3, %s2972_s4 }
  0xa6   : > { %p2976_p2 = pneg %p2975_p8  ;;  %p2982_p10 = por %p2981_p3, %p2980_p13 }
  0xa8   : > { %p2983_p11 = pnand %p2982_p10, %p2976_p2 }
  0xaa   : > { %2986 = shalt.err (!%p2983_p11)
}
  0xab   : > { %2689 = dma.hbm_to_vmem [thread:$0]  (!%p3319_p7), %s3360_s9, 128, %s297_s0, %s286_s5  }
  0xac   : > { %p3775_p6 = scmp.ne.s32.totalorder %s3760_s7, 0 }
  0xad   : > { %s3388_s18 = sand.u32 (!%p3775_p6), 1, %s3065_s22   ;;  %p3776_p3 = scmp.ne.s32.totalorder (!%p3775_p6), %s3757_s29, 0 }
  0xae   : > { %305 = sbr.rel (%p3775_p6) target bundleno = 3428 (0xd64), region = 44  ;;  %s2371_s17 = sshll.u32 (!%p3775_p6), %s3388_s18, 4 }
  0xaf   : > { %s308_s10 = scalar_lea.sflag (!%p3775_p6), [#allocation7], %s3388_s18  ;;  %s3392_s30 = scalar_lea.vmem (!%p3775_p6), [#allocation6], %s2371_s17 }
  0xb5   : > { %3040 = dma.done.wait (%p3776_p3), %s308_s10, 256  }
  0xb6   : > { %3042 = vsyncadd (%p3776_p3), %s308_s10, 4294967040  ;;  %s316_s0 = sand.u32 1, %s3170_s27   ;;  %s2372_s5 = sshll.u32 %s3388_s18, 3 }
  0xb7   : > { %s317_s7 = scalar_lea.sflag [#allocation10], %s316_s0  ;;  %s320_s15 = scalar_lea.vmem [#allocation9], %s2372_s5 }
  0xb8   : > { %3044 = dma.done.wait (%p3776_p3), %s317_s7, 128  }
  0xb9   : > { %3046 = vsyncadd (%p3776_p3), %s317_s7, 4294967168  ;;  %p3777_p7 = scmp.eq.s32.totalorder %s3170_s27, 0 }
  0xbb   : > { %3048 = dma.done.wait (%p3777_p7), [#allocation10], 1024   ;;  %p3778_p12 = pmov %p3777_p7 }
  0xbc   : > { %p3779_p5 = pmov %p3777_p7 }
  0xbd   : > { %3050 = vsyncadd (%p3778_p12), [#allocation10], 4294966272 }
  0xbe   : > { %3052 = dma.done.wait (%p3779_p5), [#allocation13], 1536   ;;  %p3780_p9 = pmov %p3779_p5 }
  0xbf   : > { %vm376_vm0 = vcmask 261120   ;;  %v375_v0 = vld [vmem:[%s320_s15] sm:$0xff]  ;;  %v402_v7 = vld [vmem:[#allocation11 + $0x8] sm:$0xff]  ;;  %v401_v9 = vld [vmem:[#allocation11] sm:$0xff]  ;;  %v3092_v14 = vmov 0.0   ;;  %vm3093_vm1 = vmmov 0  }
  0xc0   : > { %3054 = vsyncadd (%p3780_p9), [#allocation13], 4294965760  ;;  %v377_v1 = vsel %vm376_vm0, %v375_v0, 0.0  ;;  %v404_v8 = vld [vmem:[#allocation11 + $0x18] sm:$0xff]  ;;  %v403_v11 = vld [vmem:[#allocation11 + $0x10] sm:$0xff]  ;;  %476 = vmatprep.mubr.f32.mxu1 %v3092_v14  ;;  %2483 = vmatprep.subr.mxu0 %v3092_v14  ;;  %vm483_vm2 = vcmask 523264  }
  0xc1   : > { %378 = vadd.xlane.f32.xlu0 %v377_v1  ;;  %v2599_v10 = vpack.c.bf16 %v404_v8, %v402_v7  ;;  %v406_v12 = vld [vmem:[#allocation11 + $0x28] sm:$0xff]  ;;  %v408_v13 = vld [vmem:[#allocation11 + $0x38] sm:$0xff]  ;;  %v2601_v15 = vpack.c.bf16 %v403_v11, %v401_v9  ;;  %v405_v17 = vld [vmem:[#allocation11 + $0x20] sm:$0xff]  ;;  %2485 = vmatprep.mubr.msk.f32.mxu0 %vm3093_vm1, %v3092_v14  ;;  %s3094_s11 = smov 48   ;;  %s3095_s28 = smov 64   ;;  %vm488_vm3 = vcmask 130048  }
  0xc2   : > { %v2603_v16 = vpack.c.bf16 %v408_v13, %v406_v12  ;;  %v407_v18 = vld [vmem:[#allocation11 + $0x30] sm:$0xff]  ;;  %v1159_v21 = vld [vmem:[%s3392_s30 + $0x8] sm:$0xff]  ;;  %s3096_s16 = smov 112   ;;  %s3097_s20 = smov 96   ;;  %v1200_v48 = vld [vmem:[#allocation12] sm:$0xff]  ;;  %vm563_vm4 = vcmask 64512  }
  0xc3   : > { %2600 = vmatprep.subr.bf16.mxu1 %v2599_v10  ;;  %v2605_v19 = vpack.c.bf16 %v407_v18, %v405_v17  ;;  %v1158_v20 = vld [vmem:[%s3392_s30] sm:$0xff]  ;;  %v1164_v23 = vsel %vm376_vm0, %v1159_v21, 0.0  ;;  %v2377_v28 = vld [vmem:[%s3740_s2 + $0x2] ss:$0 sm:$0xff]  ;;  %v2378_v30 = vld [vmem:[%s3740_s2 + $0x3] ss:$0 sm:$0xff] }
  0xc4   : > { %2602 = vmatpush1.bf16.msra.mxu1 %v2601_v15  ;;  %v1161_v22 = vsel %vm376_vm0, %v1158_v20, 0.0  ;;  %s3098_s4 = smov 32   ;;  %s3099_s8 = smov 80   ;;  %v1201_v49 = vld [vmem:[#allocation12 + $0x8] sm:$0xff]  ;;  %v1202_v53 = vld [vmem:[#allocation12 + $0x10] sm:$0xff]  ;;  %v1203_v54 = vld [vmem:[#allocation12 + $0x18] sm:$0xff] }
  0xc5   : > { %2604 = vmatprep.subr.bf16.mxu1 %v2603_v16  ;;  %1162 = vadd.xlane.f32.xlu1 %v1161_v22  ;;  %s3100_s13 = smov 16   ;;  %v2607_v52 = vpack.c.bf16 %v1201_v49, %v1200_v48  ;;  %v2611_v56 = vpack.c.bf16 %v1203_v54, %v1202_v53  ;;  %vm646_vm5 = vcmask 7168   ;;  %vm3525_vm6 = vmpackc.low %vm488_vm3, %vm488_vm3  ;;  %vm2127_vm7 = vcmask 392192   ;;  %s365_s0 = scalar_lea.vmem [#allocation15], %s2372_s5 }
  0xc6   : > { %s2226_s7 = sshll.u32 %s365_s0, 4  ;;  %s2414_s15 = sshll.u32 %s3073_s24, 7  ;;  %s3686_s7 = int_to_ptr.vmem [resolvable:$true] %s2226_s7 }
  0xc7   : > { %s3691_s9 = scalar_lea.hbm %s3744_s6, %s2414_s15  ;;  %s2213_s12 = scalar_lea.sflag [#allocation8], %s3388_s18 }
  0xc8   : > { %2606 = vmatpush1.bf16.msra.mxu1 %v2605_v19  ;;  %p3783_p1 = scmp.ne.s32.totalorder %s3769_s14, 0  ;;  %s3103_s24 = smov [#allocation15]  }
  0xc9   : > { %2473 = vmatprep.subr.mxu1 %v3092_v14  ;;  %1165 = vadd.xlane.f32.xlu1 %v1164_v23  ;;  %v3101_v23 = vmov 0.0|0.0   ;;  %s2991_s5 = sshll.u32 %s3103_s24, 4  ;;  %s2992_s5 = int_to_ptr.vmem [resolvable:$false] %s2991_s5 }
  0xca   : > { %p2994_p2 = scmp.lt.s32.totalorder %s3686_s7, %s2992_s5 }
 0x14e   : > { %v379_v2 = vpop.xlane.xlu0 %378 }
 0x14f   : > { %v381_v3 = vmul.f32 0.03125, %v379_v2  ;;  %v2392_v2 = vld [vmem:[%s3740_s2] ss:$0 sm:$0xff] }
 0x151   : > { %v382_v4 = vsub.f32 %v375_v0, %v381_v3 }
 0x152   : > { %v1163_v35 = vpop.xlane.xlu1 %1162 }
 0x153   : > { %v383_v5 = vmul.f32 %v382_v4, %v382_v4  ;;  %v1168_v40 = vmul.f32 0.03125, %v1163_v35 }
 0x155   : > { %v384_v6 = vsel %vm376_vm0, %v383_v5, 0.0  ;;  %v1170_v42 = vsub.f32 %v1158_v20, %v1168_v40 }
 0x156   : > { %385 = vadd.xlane.f32.xlu0 %v384_v6  ;;  %v1166_v36 = vpop.xlane.xlu1 %1165  ;;  %v2393_v6 = vld [vmem:[%s3740_s2 + $0x1] ss:$0 sm:$0xff] }
 0x157   : > { %v1169_v37 = vmul.f32 0.03125, %v1166_v36  ;;  %v1172_v43 = vmul.f32 %v1170_v42, %v1170_v42 }
 0x159   : > { %v1171_v38 = vsub.f32 %v1159_v21, %v1169_v37  ;;  %v1174_v44 = vsel %vm376_vm0, %v1172_v43, 0.0 }
 0x15b   : > { %v1173_v39 = vmul.f32 %v1171_v38, %v1171_v38 }
 0x15d   : > { %v1177_v41 = vsel %vm376_vm0, %v1173_v39, 0.0 }
 0x1e3   : > { %v386_v24 = vpop.xlane.xlu0 %385 }
 0x1e4   : > { %v387_v25 = vmul.f32 0.03125, %v386_v24 }
 0x1e6   : > { %v388_v26 = vadd.f32 1e-05, %v387_v25 }
 0x1e8   : > { %2805 = vrsqrt.f32 %v388_v26 }
 0x1f2   : > { %v2806_v27 = vpop.eup %2805 }
 0x1f3   : > { %v390_v29 = vmul.f32 %v2806_v27, %v382_v4 }
 0x1f5   : > { %v395_v31 = vmul.f32 %v2377_v28, %v390_v29 }
 0x1f7   : > { %v400_v32 = vadd.f32 %v2378_v30, %v395_v31 }
 0x1f9   : > { %2379 = vmatmul.mubr.msk.f32.vlgmr.msra.gmra.mrb[0].mxu1 %vm376_vm0, %v400_v32 }
 0x1fa   : > { %2475 = vmatprep.mubr.msk.f32.mxu1 %vm3093_vm1, %v3092_v14 }
 0x2cc   : > { %v478_v33 = vpop.f32.mrb[0].mxu1 }
 0x2cd   : > { %484 = vst.msk [vmem:[#allocation2] sm:$0xff] %vm483_vm2, %v478_v33  ;;  %652 = vrot.lane.b32.xlu1 %v478_v33, %s3094_s11  ;;  %486 = vrot.lane.b32.xlu0 %v478_v33, %s3095_s28  ;;  %v3437_v34 = vpop.f32.mrb[1].mxu1 }
 0x2d1   : > { %650 = vrot.lane.b32.xlu1 %v478_v33, %s3096_s16  ;;  %820 = vrot.lane.b32.xlu0 %v478_v33, %s3097_s20 }
 0x2d4   : > { %v3490_v28 = vld [vmem:[#allocation2] sm:$0xff] }
 0x2d5   : > { %822 = vrot.lane.b32.xlu1 %v478_v33, %s3098_s4  ;;  %989 = vrot.lane.b32.xlu0 %v478_v33, %s3099_s8 }
 0x2d9   : > { %991 = vrot.lane.b32.xlu1 %v478_v33, %s3100_s13 }
 0x2f4   : > { %1178 = vadd.xlane.f32.xlu0 %v1177_v41 }
 0x2fd   : > { %1175 = vadd.xlane.f32.xlu1 %v1174_v44 }
 0x30e   : > { %738 = vrot.lane.b32.xlu1 %v3437_v34, %s3096_s16 }
 0x33f   : > { %v653_v45 = vpop.permute.xlu1 %652  ;;  %v487_v46 = vpop.permute.xlu0 %486 }
 0x340   : > { %2474 = vmatpush3.xpose.msk.msra.mxu1 %vm488_vm3, %v487_v46  ;;  %2484 = vmatpush3.xpose.msk.msra.mxu0 %vm488_vm3, %v653_v45 }
 0x341   : > { %2478 = vmatprep.subr.mxu1 %v3092_v14  ;;  %2493 = vmatprep.subr.mxu0 %v3092_v14 }
 0x343   : > { %v651_v47 = vpop.permute.xlu1 %650  ;;  %2476 = vmatmul.mubr.msk.f32.vlgmr.msra.gmra.mrb[2].mxu1 %vm488_vm3, %v478_v33  ;;  %v821_v51 = vpop.permute.xlu0 %820 }
 0x344   : > { %2479 = vmatpush3.msra.mxu1 %v3437_v34  ;;  %2486 = vmatmul.mubr.msk.f32.vlgmr.msra.gmra.mrb[0].mxu0 %vm488_vm3, %v651_v47 }
 0x345   : > { %2495 = vmatprep.mubr.msk.f32.mxu0 %vm3093_vm1, %v3092_v14  ;;  %2480 = vmatprep.mubr.msk.f32.mxu1 %vm3093_vm1, %v3092_v14 }
 0x346   : > { %2488 = vmatprep.subr.mxu1 %v3092_v14 }
 0x347   : > { %v823_v50 = vpop.permute.xlu1 %822  ;;  %v990_v57 = vpop.permute.xlu0 %989 }
 0x348   : > { %2494 = vmatpush3.xpose.msk.msra.mxu0 %vm488_vm3, %v823_v50 }
 0x349   : > { %2503 = vmatprep.subr.mxu0 %v3092_v14 }
 0x34b   : > { %v992_v55 = vpop.permute.xlu1 %991  ;;  %2496 = vmatmul.mubr.msk.f32.vlgmr.msra.gmra.mrb[2].mxu0 %vm488_vm3, %v821_v51 }
 0x34c   : > { %2504 = vmatpush3.xpose.msk.msra.mxu0 %vm488_vm3, %v992_v55  ;;  %2505 = vmatprep.mubr.msk.f32.mxu0 %vm3093_vm1, %v3092_v14 }
 0x34d   : > { %2608 = vmatprep.subr.bf16.mxu0 %v2607_v52 }
 0x34f   : > { %2506 = vmatmul.mubr.msk.f32.vlgmr.msra.gmra.mrb[4].mxu0 %vm488_vm3, %v990_v57 }
 0x350   : > { %2610 = vmatpush3.bf16.msra.mxu0 %v2607_v52 }
 0x351   : > { %2612 = vmatprep.subr.bf16.mxu0 %v2611_v56 }
 0x354   : > { %2614 = vmatpush3.bf16.msra.mxu0 %v2611_v56 }
 0x355   : > { %2619 = vmatprep.subr.bf16.mxu0 %v3101_v23 }
 0x381   : > { %v1179_v58 = vpop.xlane.xlu0 %1178 }
 0x382   : > { %v1181_v59 = vmul.f32 0.03125, %v1179_v58 }
 0x384   : > { %v1183_v60 = vadd.f32 1e-05, %v1181_v59 }
 0x386   : > { %2807 = vrsqrt.f32 %v1183_v60 }
 0x38a   : > { %v1176_v61 = vpop.xlane.xlu1 %1175 }
 0x38b   : > { %v1180_v62 = vmul.f32 0.03125, %v1176_v61 }
 0x38d   : > { %v1182_v63 = vadd.f32 1e-05, %v1180_v62 }
 0x38e   : > { %v739_v32 = vpop.permute.xlu1 %738 }
 0x38f   : > { %2809 = vrsqrt.f32 %v1182_v63 }
 0x390   : > { %v2808_v0 = vpop.eup %2807 }
 0x391   : > { %v1187_v1 = vmul.f32 %v2808_v0, %v1171_v38 }
 0x393   : > { %v1193_v5 = vmul.f32 %v2392_v2, %v1187_v1  ;;  %v3102_v1 = vmov 0  }
 0x394   : > { %2773 = vset.pattern.permute.xlu0 %v3102_v1  ;;  %2774 = vset.pattern.permute.xlu1 %v3102_v1 }
 0x395   : > { %v1199_v9 = vadd.f32 %v2393_v6, %v1193_v5 }
 0x399   : > { %v2810_v3 = vpop.eup %2809 }
 0x39a   : > { %v1186_v4 = vmul.f32 %v2810_v3, %v1170_v42 }
 0x39c   : > { %v1192_v7 = vmul.f32 %v2392_v2, %v1186_v4 }
 0x39e   : > { %v1198_v8 = vadd.f32 %v2393_v6, %v1192_v7 }
 0x3a0   : > { %2521 = vmatprep.mubr.msk.f32.mxu0 %vm376_vm0, %v1198_v8 }
 0x3a1   : > { %2522 = vmatmul.mubr.msk.f32.vlgmr.msra.gmra.mrb[6].mxu0 %vm376_vm0, %v1199_v9 }
 0x3a2   : > { %2535 = vmatprep.mubr.msk.f32.mxu0 %vm3093_vm1, %v3092_v14 }
 0x416   : > { %v559_v10 = vpop.f32.mrb[2].mxu1 }
 0x417   : > { %v2477_v11 = vpop.f32.mrb[3].mxu1  ;;  %v724_v12 = vpop.f32.mrb[0].mxu0  ;;  %v564_v13 = vsel %vm563_vm4, %v559_v10, -inf }
 0x418   : > { %v2487_v15 = vpop.f32.mrb[1].mxu0  ;;  %565 = vmax.xlane.f32.xlu0 %v564_v13  ;;  %v728_v16 = vsel %vm563_vm4, %v724_v12, -inf }
 0x41c   : > { %729 = vmax.xlane.f32.xlu0 %v728_v16 }
 0x41e   : > { %v894_v17 = vpop.f32.mrb[2].mxu0 }
 0x41f   : > { %v2497_v18 = vpop.f32.mrb[3].mxu0  ;;  %v898_v19 = vsel %vm563_vm4, %v894_v17, -inf }
 0x420   : > { %899 = vmax.xlane.f32.xlu1 %v898_v19 }
 0x422   : > { %v1063_v20 = vpop.f32.mrb[4].mxu0 }
 0x423   : > { %v2507_v21 = vpop.f32.mrb[5].mxu0  ;;  %v1067_v22 = vsel %vm563_vm4, %v1063_v20, -inf }
 0x424   : > { %1068 = vmax.xlane.f32.xlu0 %v1067_v22 }
 0x431   : > { %1076 = vrot.lane.b32.xlu1 %v3437_v34, %s3099_s8 }
 0x43a   : > { %907 = vrot.lane.b32.xlu0 %v3437_v34, %s3097_s20 }
 0x474   : > { %v2523_v24 = vpop.f32.mrb[6].mxu0 }
 0x475   : > { %v1276_v25 = vpop.f32.mrb[7].mxu0 }
 0x476   : > { %v3486_v26 = vpack.i.bf16 %v2523_v24, %v1276_v25  ;;  %v2616_v27 = vpack.c.bf16 %v2523_v24, %v1276_v25 }
 0x478   : > { %2769 = vrot.lane.b32.xlu1 %v3486_v26, %s3096_s16 }
 0x47c   : > { %1479 = vrot.lane.b32.xlu1 %v3490_v28, %s3096_s16 }
 0x4a5   : > { %v566_v29 = vpop.xlane.xlu0 %565 }
 0x4a6   : > { %v567_v30 = vsub.f32 %v559_v10, %v566_v29  ;;  %647 = vst.msk [vmem:[#allocation3] sm:$0xff] %vm646_vm5, %v566_v29 }
 0x4a8   : > { %v568_v31 = vmul.f32 1.442695, %v567_v30 }
 0x4a9   : > { %v730_v33 = vpop.xlane.xlu0 %729 }
 0x4aa   : > { %2811 = vpow2.f32 %v568_v31  ;;  %v731_v34 = vsub.f32 %v724_v12, %v730_v33  ;;  %815 = vst.msk [vmem:[#allocation3 + $0x8] sm:$0xff] %vm646_vm5, %v730_v33 }
 0x4ac   : > { %v732_v35 = vmul.f32 1.442695, %v731_v34 }
 0x4ad   : > { %v900_v36 = vpop.xlane.xlu1 %899  ;;  %v3550_v5 = vld [vmem:[#allocation3] sm:$0xff] }
 0x4ae   : > { %2813 = vpow2.f32 %v732_v35  ;;  %v901_v37 = vsub.f32 %v894_v17, %v900_v36  ;;  %984 = vst.msk [vmem:[#allocation3 + $0x10] sm:$0xff] %vm646_vm5, %v900_v36 }
 0x4b0   : > { %v902_v38 = vmul.f32 1.442695, %v901_v37 }
 0x4b1   : > { %v1069_v39 = vpop.xlane.xlu0 %1068  ;;  %v1077_v46 = vpop.permute.xlu1 %1076  ;;  %v3560_v9 = vld [vmem:[#allocation3 + $0x8] sm:$0xff] }
 0x4b2   : > { %2815 = vpow2.f32 %v902_v38  ;;  %v1070_v40 = vsub.f32 %v1063_v20, %v1069_v39  ;;  %1153 = vst.msk [vmem:[#allocation3 + $0x18] sm:$0xff] %vm646_vm5, %v1069_v39 }
 0x4b4   : > { %v3498_v41 = vpop.eup %2811  ;;  %v1071_v42 = vmul.f32 1.442695, %v1070_v40 }
 0x4b5   : > { %2481 = vmatmul.mubr.msk.f32.vlgmr.msra.gmra.mrb[4].mxu1 %vm563_vm4, %v3498_v41  ;;  %v908_v44 = vpop.permute.xlu0 %907  ;;  %v570_v48 = vsel %vm563_vm4, %v3498_v41, 0.0 }
 0x4b6   : > { %2817 = vpow2.f32 %v1071_v42  ;;  %2489 = vmatpush3.msra.mxu1 %v739_v32  ;;  %2490 = vmatprep.mubr.msk.f32.mxu1 %vm3093_vm1, %v3092_v14 }
 0x4b7   : > { %2498 = vmatprep.subr.mxu1 %v3092_v14 }
 0x4b8   : > { %v3505_v43 = vpop.eup %2813 }
 0x4b9   : > { %2491 = vmatmul.mubr.msk.f32.vlgmr.msra.gmra.mrb[6].mxu1 %vm563_vm4, %v3505_v43  ;;  %v734_v41 = vsel %vm563_vm4, %v3505_v43, 0.0 }
 0x4ba   : > { %2499 = vmatpush3.msra.mxu1 %v908_v44  ;;  %2500 = vmatprep.mubr.msk.f32.mxu1 %vm3093_vm1, %v3092_v14 }
 0x4bb   : > { %2508 = vmatprep.subr.mxu1 %v3092_v14 }
 0x4bc   : > { %v3512_v45 = vpop.eup %2815 }
 0x4bd   : > { %2501 = vmatmul.mubr.msk.f32.vlgmr.msra.gmra.mrb[8].mxu1 %vm563_vm4, %v3512_v45 }
 0x4be   : > { %2509 = vmatpush3.msra.mxu1 %v1077_v46  ;;  %2510 = vmatprep.mubr.msk.f32.mxu1 %vm3093_vm1, %v3092_v14 }
 0x4bf   : > { %2615 = vmatprep.subr.bf16.mxu1 %v3101_v23 }
 0x4c0   : > { %v3519_v47 = vpop.eup %2817 }
 0x4c1   : > { %2511 = vmatmul.mubr.msk.f32.vlgmr.msra.gmra.mrb[10].mxu1 %vm563_vm4, %v3519_v47 }
 0x4c2   : > { %2528 = vmatprep.mubr.msk.f32.mxu1 %vm3093_vm1, %v3092_v14 }
 0x4c5   : > { %2618 = vmatpush3.bf16.xpose.msk.msra.mxu1 %vm3525_vm6, %v2616_v27 }
 0x4c6   : > { %2622 = vmatprep.subr.bf16.mxu1 %v3101_v23 }
 0x4cc   : > { %2529 = vmatmul.mubr.msk.f32.vlgmr.msra.gmra.mrb[12].mxu1 %vm488_vm3, %v3490_v28 }
 0x4cd   : > { %2542 = vmatprep.mubr.msk.f32.mxu1 %vm3093_vm1, %v3092_v14 }
 0x4ea   : > { %v2770_v49 = vpop.permute.xlu1 %2769 }
 0x4eb   : > { %v2772_v50 = vunpack.i.h.bf16 %v2770_v49  ;;  %v2771_v51 = vunpack.i.l.bf16 %v2770_v49 }
 0x4ed   : > { %v2623_v52 = vpack.c.bf16 %v2772_v50, %v2771_v51  ;;  %v3603_v50 = vld [vmem:[#allocation3 + $0x10] sm:$0xff] }
 0x4ee   : > { %v1480_v53 = vpop.permute.xlu1 %1479 }
 0x4ef   : > { %2625 = vmatpush3.bf16.xpose.msk.msra.mxu1 %vm3525_vm6, %v2623_v52 }
 0x4f0   : > { %2633 = vmatprep.subr.bf16.mxu1 %v3101_v23 }
 0x4f6   : > { %2543 = vmatmul.mubr.msk.f32.vlgmr.msra.gmra.mrb[14].mxu1 %vm488_vm3, %v1480_v53 }
 0x4f7   : > { %2563 = vmatprep.mubr.msk.f32.mxu1 %vm3093_vm1, %v3092_v14 }
 0x588   : > { %v642_v54 = vpop.f32.mrb[4].mxu1 }
 0x589   : > { %649 = vst.msk [vmem:[#allocation5] sm:$0xff] %vm488_vm3, %v642_v54  ;;  %v2482_v55 = vpop.f32.mrb[5].mxu1 }
 0x58c   : > { %v810_v56 = vpop.f32.mrb[6].mxu1 }
 0x58d   : > { %819 = vst.msk [vmem:[#allocation5 + $0x8] sm:$0xff] %vm488_vm3, %v810_v56  ;;  %v2492_v57 = vpop.f32.mrb[7].mxu1 }
 0x590   : > { %v979_v58 = vpop.f32.mrb[8].mxu1 }
 0x591   : > { %988 = vst.msk [vmem:[#allocation5 + $0x10] sm:$0xff] %vm488_vm3, %v979_v58  ;;  %v2502_v59 = vpop.f32.mrb[9].mxu1 }
 0x594   : > { %v1148_v60 = vpop.f32.mrb[10].mxu1 }
 0x595   : > { %1157 = vst.msk [vmem:[#allocation5 + $0x18] sm:$0xff] %vm488_vm3, %v1148_v60  ;;  %v2512_v61 = vpop.f32.mrb[11].mxu1 }
 0x59f   : > { %v1362_v62 = vpop.f32.mrb[12].mxu1 }
 0x5a0   : > { %v2530_v63 = vpop.f32.mrb[13].mxu1  ;;  %v1369_v0 = vsel %vm488_vm3, %v1362_v62, -inf }
 0x5a1   : > { %1370 = vmax.xlane.f32.xlu0 %v1369_v0 }
 0x5c9   : > { %v1557_v2 = vpop.f32.mrb[14].mxu1 }
 0x5ca   : > { %v2544_v3 = vpop.f32.mrb[15].mxu1  ;;  %v1567_v4 = vsel %vm488_vm3, %v1557_v2, -inf }
 0x5cb   : > { %1568 = vmax.xlane.f32.xlu1 %v1567_v4 }
 0x62e   : > { %v1371_v6 = vpop.xlane.xlu0 %1370 }
 0x62f   : > { %v3553_v7 = vmax.f32 %v3550_v5, %v1371_v6 }
 0x631   : > { %v1373_v8 = vsub.f32 %v3550_v5, %v3553_v7  ;;  %1476 = vst.msk [vmem:[#allocation3] sm:$0xff] %vm646_vm5, %v3553_v7  ;;  %1378 = vperm.xlu0 %2773, %v3553_v7   ;;  %v1763_v5 = vld [vmem:[#allocation5 + $0x10] sm:$0xff] }
 0x658   : > { %v1569_v10 = vpop.xlane.xlu1 %1568 }
 0x659   : > { %v3563_v11 = vmax.f32 %v3560_v9, %v1569_v10 }
 0x65b   : > { %v1571_v12 = vsub.f32 %v3560_v9, %v3563_v11  ;;  %1673 = vst.msk [vmem:[#allocation3 + $0x8] sm:$0xff] %vm646_vm5, %v3563_v11  ;;  %1576 = vperm.xlu1 %2774, %v3563_v11   ;;  %v1073_v9 = vsel %vm563_vm4, %v3519_v47, 0.0 }
 0x65f   : > { %2776 = vrot.lane.b32.xlu1 %v3486_v26, %s3095_s28  ;;  %s2993_s28 = scalar_lea.vmem %s2992_s5, 256 }
 0x663   : > { %2781 = vrot.lane.b32.xlu1 %v3486_v26, %s3094_s11 }
 0x667   : > { %2786 = vrot.lane.b32.xlu1 %v3486_v26, %s3097_s20 }
 0x66b   : > { %1676 = vrot.lane.b32.xlu1 %v3490_v28, %s3097_s20 }
 0x6b0   : > { %v1379_v13 = vpop.permute.xlu0 %1378 }
 0x6b1   : > { %v1381_v15 = vsub.f32 %v1362_v62, %v1379_v13  ;;  %v904_v13 = vsel %vm563_vm4, %v3512_v45, 0.0 }
 0x6b3   : > { %v1382_v16 = vmul.f32 1.442695, %v1381_v15  ;;  %v1572_v15 = vmul.f32 1.442695, %v1571_v12 }
 0x6b5   : > { %2819 = vpow2.f32 %v1382_v16 }
 0x6bf   : > { %v3579_v30 = vpop.eup %2819 }
 0x6da   : > { %v1577_v17 = vpop.permute.xlu1 %1576 }
 0x6db   : > { %v1579_v18 = vsub.f32 %v1557_v2, %v1577_v17  ;;  %v1956_v17 = vld [vmem:[#allocation3 + $0x18] sm:$0xff] }
 0x6dd   : > { %v1580_v19 = vmul.f32 1.442695, %v1579_v18 }
 0x6de   : > { %v2777_v20 = vpop.permute.xlu1 %2776 }
 0x6df   : > { %2821 = vpow2.f32 %v1580_v19  ;;  %v2779_v21 = vunpack.i.h.bf16 %v2777_v20  ;;  %v2778_v22 = vunpack.i.l.bf16 %v2777_v20 }
 0x6e1   : > { %v2620_v24 = vpack.c.bf16 %v2779_v21, %v2778_v22 }
 0x6e2   : > { %v2782_v25 = vpop.permute.xlu1 %2781 }
 0x6e3   : > { %v2784_v27 = vunpack.i.h.bf16 %v2782_v25  ;;  %v2783_v29 = vunpack.i.l.bf16 %v2782_v25  ;;  %2621 = vmatpush3.bf16.msra.mxu0 %v2620_v24 }
 0x6e4   : > { %2626 = vmatprep.subr.bf16.mxu0 %v3101_v23 }
 0x6e5   : > { %v2627_v31 = vpack.c.bf16 %v2784_v27, %v2783_v29  ;;  %v1566_v27 = vld [vmem:[#allocation5 + $0x8] sm:$0xff] }
 0x6e6   : > { %2536 = vmatmul.mubr.msk.f32.vlgmr.msra.gmra.mrb[8].mxu0 %vm488_vm3, %v3579_v30  ;;  %v2787_v32 = vpop.permute.xlu1 %2786 }
 0x6e7   : > { %2628 = vmatpush3.bf16.msra.mxu0 %v2627_v31  ;;  %2549 = vmatprep.mubr.msk.f32.mxu0 %vm3093_vm1, %v3092_v14  ;;  %v2789_v34 = vunpack.i.h.bf16 %v2787_v32  ;;  %v2788_v35 = vunpack.i.l.bf16 %v2787_v32 }
 0x6e8   : > { %2629 = vmatprep.subr.bf16.mxu0 %v3101_v23 }
 0x6e9   : > { %v3586_v33 = vpop.eup %2821  ;;  %v2630_v36 = vpack.c.bf16 %v2789_v34, %v2788_v35 }
 0x6ea   : > { %2550 = vmatmul.mubr.msk.f32.vlgmr.msra.gmra.mrb[10].mxu0 %vm488_vm3, %v3586_v33  ;;  %v1677_v37 = vpop.permute.xlu1 %1676  ;;  %v1583_v11 = vsel %vm488_vm3, %v3586_v33, 0.0 }
 0x6eb   : > { %2556 = vmatprep.mubr.msk.f32.mxu0 %vm3093_vm1, %v3092_v14 }
 0x6f0   : > { %2632 = vmatpush3.bf16.xpose.msk.msra.mxu0 %vm3525_vm6, %v2630_v36  ;;  %v1385_v36 = vsel %vm488_vm3, %v3579_v30, 0.0 }
 0x6f1   : > { %2640 = vmatprep.subr.bf16.mxu0 %v3101_v23 }
 0x6f7   : > { %2557 = vmatmul.mubr.msk.f32.vlgmr.msra.gmra.mrb[12].mxu0 %vm488_vm3, %v1677_v37 }
 0x6f8   : > { %2577 = vmatprep.mubr.msk.f32.mxu0 %vm3093_vm1, %v3092_v14 }
 0x7b9   : > { %v3598_v38 = vpop.f32.mrb[8].mxu0 }
 0x7ba   : > { %v2537_v39 = vpop.f32.mrb[9].mxu0 }
 0x7bd   : > { %v3600_v40 = vpop.f32.mrb[10].mxu0 }
 0x7be   : > { %v2551_v42 = vpop.f32.mrb[11].mxu0 }
 0x7ca   : > { %v1754_v44 = vpop.f32.mrb[12].mxu0 }
 0x7cb   : > { %v2558_v46 = vpop.f32.mrb[13].mxu0  ;;  %v1764_v49 = vsel %vm488_vm3, %v1754_v44, -inf }
 0x7cc   : > { %1765 = vmax.xlane.f32.xlu1 %v1764_v49 }
 0x859   : > { %v1766_v51 = vpop.xlane.xlu1 %1765 }
 0x85a   : > { %v3606_v52 = vmax.f32 %v3603_v50, %v1766_v51 }
 0x85c   : > { %v1768_v53 = vsub.f32 %v3603_v50, %v3606_v52  ;;  %1870 = vst.msk [vmem:[#allocation3 + $0x10] sm:$0xff] %vm646_vm5, %v3606_v52  ;;  %1773 = vperm.xlu0 %2773, %v3606_v52  }
 0x85e   : > { %v1769_v37 = vmul.f32 1.442695, %v1768_v53 }
 0x860   : > { %2791 = vrot.lane.b32.xlu0 %v3486_v26, %s3098_s4 }
 0x864   : > { %2796 = vrot.lane.b32.xlu0 %v3486_v26, %s3099_s8 }
 0x868   : > { %1873 = vrot.lane.b32.xlu0 %v3490_v28, %s3099_s8 }
 0x8db   : > { %v1774_v54 = vpop.permute.xlu0 %1773 }
 0x8dc   : > { %v1776_v55 = vsub.f32 %v1754_v44, %v1774_v54 }
 0x8de   : > { %v1777_v56 = vmul.f32 1.442695, %v1776_v55 }
 0x8df   : > { %v2792_v57 = vpop.permute.xlu0 %2791 }
 0x8e0   : > { %2823 = vpow2.f32 %v1777_v56  ;;  %v2794_v58 = vunpack.i.h.bf16 %v2792_v57  ;;  %v2793_v59 = vunpack.i.l.bf16 %v2792_v57  ;;  %v1374_v57 = vmul.f32 1.442695, %v1373_v8 }
 0x8e1   : > { %2825 = vpow2.f32 %v1572_v15 }
 0x8e2   : > { %v2634_v60 = vpack.c.bf16 %v2794_v58, %v2793_v59 }
 0x8e3   : > { %v2797_v61 = vpop.permute.xlu0 %2796 }
 0x8e4   : > { %2635 = vmatpush3.bf16.msra.mxu1 %v2634_v60  ;;  %v2799_v62 = vunpack.i.h.bf16 %v2797_v61  ;;  %v2798_v63 = vunpack.i.l.bf16 %v2797_v61 }
 0x8e5   : > { %2636 = vmatprep.subr.bf16.mxu1 %v3101_v23 }
 0x8e6   : > { %v2637_v1 = vpack.c.bf16 %v2799_v62, %v2798_v63 }
 0x8e7   : > { %v1874_v28 = vpop.permute.xlu0 %1873 }
 0x8ea   : > { %v2824_v0 = vpop.eup %2823 }
 0x8eb   : > { %2564 = vmatmul.mubr.msk.f32.vlgmr.msra.gmra.mrb[16].mxu1 %vm488_vm3, %v2824_v0  ;;  %v2826_v16 = vpop.eup %2825  ;;  %v1780_v12 = vsel %vm488_vm3, %v2824_v0, 0.0 }
 0x8ec   : > { %2570 = vmatprep.mubr.msk.f32.mxu1 %vm3093_vm1, %v3092_v14 }
 0x8ed   : > { %2639 = vmatpush3.bf16.xpose.msk.msra.mxu1 %vm3525_vm6, %v2637_v1 }
 0x8f4   : > { %2571 = vmatmul.mubr.msk.f32.vlgmr.msra.gmra.mrb[18].mxu1 %vm488_vm3, %v1874_v28 }
 0x9be   : > { %v3626_v2 = vpop.f32.mrb[16].mxu1 }
 0x9bf   : > { %v2565_v3 = vpop.f32.mrb[17].mxu1 }
 0x9c7   : > { %v1951_v4 = vpop.f32.mrb[18].mxu1 }
 0x9c8   : > { %v2572_v6 = vpop.f32.mrb[19].mxu1  ;;  %v1961_v10 = vsel %vm488_vm3, %v1951_v4, -inf }
 0x9c9   : > { %1962 = vmax.xlane.f32.xlu0 %v1961_v10 }
 0x9df   : > { %2801 = vrot.lane.b32.xlu0 %v3486_v26, %s3100_s13 }
 0x9fe   : > { %905 = vadd.xlane.f32.xlu0 %v904_v13 }
 0xa02   : > { %571 = vadd.xlane.f32.xlu0 %v570_v48 }
 0xa18   : > { %1589 = vperm.xlu0 %2773, %v2826_v16  }
 0xa56   : > { %v1963_v18 = vpop.xlane.xlu0 %1962 }
 0xa57   : > { %v1964_v19 = vmax.f32 %v1956_v17, %v1963_v18  ;;  %v2131_v18 = vld [vmem:[#allocation14 + $0x10] sm:$0xff] }
 0xa59   : > { %v1965_v20 = vsub.f32 %v1956_v17, %v1964_v19  ;;  %2067 = vst.msk [vmem:[#allocation3 + $0x18] sm:$0xff] %vm646_vm5, %v1964_v19  ;;  %1970 = vperm.xlu1 %2774, %v1964_v19   ;;  %v2130_v17 = vld [vmem:[#allocation14 + $0x8] sm:$0xff] }
 0xa5a   : > { %v2802_v26 = vpop.permute.xlu0 %2801 }
 0xa5b   : > { %v2804_v45 = vunpack.i.h.bf16 %v2802_v26  ;;  %v2803_v21 = vunpack.i.l.bf16 %v2802_v26  ;;  %v1966_v39 = vmul.f32 1.442695, %v1965_v20  ;;  %v2132_v20 = vld [vmem:[#allocation14 + $0x18] sm:$0xff] }
 0xa5c   : > { %v2647_v26 = vpack.c.bf16 %v2132_v20, %v2131_v18 }
 0xa5d   : > { %v2641_v22 = vpack.c.bf16 %v2804_v45, %v2803_v21  ;;  %v2133_v45 = vld [vmem:[#allocation14 + $0x20] sm:$0xff] }
 0xa5f   : > { %2642 = vmatpush3.bf16.msra.mxu0 %v2641_v22 }
 0xa60   : > { %2643 = vmatprep.subr.bf16.mxu0 %v3101_v23 }
 0xa7d   : > { %735 = vadd.xlane.f32.xlu1 %v734_v41 }
 0xa81   : > { %1074 = vadd.xlane.f32.xlu1 %v1073_v9 }
 0xa85   : > { %1584 = vadd.xlane.f32.xlu1 %v1583_v11  ;;  %v2135_v11 = vld [vmem:[#allocation14 + $0x30] sm:$0xff] }
 0xa89   : > { %1781 = vadd.xlane.f32.xlu1 %v1780_v12  ;;  %v2136_v12 = vld [vmem:[#allocation14 + $0x38] sm:$0xff] }
 0xa8b   : > { %v906_v24 = vpop.xlane.xlu0 %905 }
 0xa8c   : > { %986 = vst.msk [vmem:[#allocation4 + $0x10] sm:$0xff] %vm646_vm5, %v906_v24 }
 0xa8f   : > { %v572_v25 = vpop.xlane.xlu0 %571 }
 0xa90   : > { %648 = vst.msk [vmem:[#allocation4] sm:$0xff] %vm646_vm5, %v572_v25 }
 0xa93   : > { %v1761_v49 = vld [vmem:[#allocation4 + $0x10] sm:$0xff] }
 0xa97   : > { %v1590_v43 = vpop.permute.xlu0 %1589  ;;  %v1367_v0 = vld [vmem:[#allocation4] sm:$0xff] }
 0xa98   : > { %v1592_v29 = vmul.f32 %v1590_v43, %v1566_v27 }
 0xa9a   : > { %v1672_v31 = vadd.f32 %v3600_v40, %v1592_v29  ;;  %v2653_v29 = vpack.c.bf16 %v2136_v12, %v2135_v11 }
 0xa9c   : > { %1675 = vst.msk [vmem:[#allocation5 + $0x8] sm:$0xff] %vm488_vm3, %v1672_v31  ;;  %v1368_v31 = vld [vmem:[#allocation5] sm:$0xff] }
 0xaa3   : > { %v2086_v41 = vld [vmem:[#allocation5 + $0x8] sm:$0xff] }
 0xad8   : > { %v1971_v47 = vpop.permute.xlu1 %1970 }
 0xad9   : > { %v1973_v32 = vsub.f32 %v1951_v4, %v1971_v47 }
 0xadb   : > { %v1974_v33 = vmul.f32 1.442695, %v1973_v32 }
 0xadd   : > { %2827 = vpow2.f32 %v1974_v33 }
 0xade   : > { %2829 = vpow2.f32 %v1769_v37 }
 0xadf   : > { %2831 = vpow2.f32 %v1966_v39 }
 0xae7   : > { %v2828_v34 = vpop.eup %2827 }
 0xae8   : > { %2578 = vmatmul.mubr.msk.f32.vlgmr.msra.gmra.mrb[14].mxu0 %vm488_vm3, %v2828_v34  ;;  %v1977_v35 = vsel %vm488_vm3, %v2828_v34, 0.0  ;;  %v2830_v40 = vpop.eup %2829  ;;  %v1960_v34 = vld [vmem:[#allocation5 + $0x18] sm:$0xff] }
 0xae9   : > { %1978 = vadd.xlane.f32.xlu1 %v1977_v35  ;;  %2596 = vmatprep.mubr.msk.f32.mxu0 %vm3093_vm1, %v3092_v14  ;;  %v2832_v42 = vpop.eup %2831  ;;  %v1779_v50 = vmul.f32 %v2830_v40, %v1761_v49 }
 0xaed   : > { %1386 = vadd.xlane.f32.xlu1 %v1385_v36 }
 0xafe   : > { %1786 = vperm.xlu1 %2774, %v2830_v40  }
 0xb02   : > { %1983 = vperm.xlu1 %2774, %v2832_v42  }
 0xb0a   : > { %v736_v44 = vpop.xlane.xlu1 %735 }
 0xb0b   : > { %817 = vst.msk [vmem:[#allocation4 + $0x8] sm:$0xff] %vm646_vm5, %v736_v44 }
 0xb0e   : > { %v1075_v46 = vpop.xlane.xlu1 %1074 }
 0xb0f   : > { %1155 = vst.msk [vmem:[#allocation4 + $0x18] sm:$0xff] %vm646_vm5, %v1075_v46 }
 0xb12   : > { %v1564_v14 = vld [vmem:[#allocation4 + $0x8] sm:$0xff]  ;;  %v1585_v30 = vpop.xlane.xlu1 %1584 }
 0xb13   : > { %v1582_v51 = vmul.f32 %v2826_v16, %v1564_v14  ;;  %v2129_v16 = vld [vmem:[#allocation14] sm:$0xff] }
 0xb14   : > { %v2644_v19 = vpack.c.bf16 %v2130_v17, %v2129_v16 }
 0xb15   : > { %v1586_v54 = vadd.f32 %v1585_v30, %v1582_v51 }
 0xb16   : > { %v1782_v52 = vpop.xlane.xlu1 %1781  ;;  %v1958_v61 = vld [vmem:[#allocation4 + $0x18] sm:$0xff]  ;;  %2645 = vmatpush3.bf16.msra.mxu0 %v2644_v19 }
 0xb17   : > { %1674 = vst.msk [vmem:[#allocation4 + $0x8] sm:$0xff] %vm646_vm5, %v1586_v54  ;;  %v1783_v53 = vadd.f32 %v1782_v52, %v1779_v50  ;;  %v1976_v62 = vmul.f32 %v2832_v42, %v1958_v61  ;;  %2646 = vmatprep.subr.bf16.mxu0 %v3101_v23 }
 0xb19   : > { %1871 = vst.msk [vmem:[#allocation4 + $0x10] sm:$0xff] %vm646_vm5, %v1783_v53 }
 0xb1a   : > { %2648 = vmatpush3.bf16.msra.mxu0 %v2647_v26 }
 0xb1b   : > { %2649 = vmatprep.subr.bf16.mxu0 %v3101_v23 }
 0xb1e   : > { %v2083_v55 = vld [vmem:[#allocation4 + $0x8] sm:$0xff] }
 0xb1f   : > { %2833 = vrcp.f32 %v2083_v55 }
 0xb20   : > { %v2093_v56 = vld [vmem:[#allocation4 + $0x10] sm:$0xff] }
 0xb21   : > { %2835 = vrcp.f32 %v2093_v56 }
 0xb22   : > { %2837 = vpow2.f32 %v1374_v57 }
 0xb29   : > { %v2834_v58 = vpop.eup %2833 }
 0xb2a   : > { %2089 = vperm.xlu0 %2773, %v2834_v58  }
 0xb2b   : > { %v2836_v59 = vpop.eup %2835 }
 0xb2c   : > { %2099 = vperm.xlu1 %2774, %v2836_v59   ;;  %v2838_v60 = vpop.eup %2837 }
 0xb2d   : > { %v1384_v28 = vmul.f32 %v2838_v60, %v1367_v0 }
 0xb30   : > { %1391 = vperm.xlu1 %2774, %v2838_v60  }
 0xb76   : > { %v1979_v63 = vpop.xlane.xlu1 %1978 }
 0xb77   : > { %v1980_v1 = vadd.f32 %v1979_v63, %v1976_v62 }
 0xb79   : > { %2068 = vst.msk [vmem:[#allocation4 + $0x18] sm:$0xff] %vm646_vm5, %v1980_v1 }
 0xb7a   : > { %v1387_v3 = vpop.xlane.xlu1 %1386 }
 0xb7b   : > { %v1388_v4 = vadd.f32 %v1387_v3, %v1384_v28 }
 0xb7d   : > { %1477 = vst.msk [vmem:[#allocation4] sm:$0xff] %vm646_vm5, %v1388_v4 }
 0xb7e   : > { %v1787_v7 = vpop.permute.xlu1 %1786 }
 0xb7f   : > { %v1789_v8 = vmul.f32 %v1787_v7, %v1763_v5 }
 0xb80   : > { %v2103_v6 = vld [vmem:[#allocation4 + $0x18] sm:$0xff] }
 0xb81   : > { %v1869_v10 = vadd.f32 %v3626_v2, %v1789_v8  ;;  %2839 = vrcp.f32 %v2103_v6  ;;  %v2134_v2 = vld [vmem:[#allocation14 + $0x28] sm:$0xff] }
 0xb82   : > { %v1984_v21 = vpop.permute.xlu1 %1983  ;;  %v2650_v22 = vpack.c.bf16 %v2134_v2, %v2133_v45 }
 0xb83   : > { %1872 = vst.msk [vmem:[#allocation5 + $0x10] sm:$0xff] %vm488_vm3, %v1869_v10  ;;  %v1986_v35 = vmul.f32 %v1984_v21, %v1960_v34 }
 0xb84   : > { %v2073_v13 = vld [vmem:[#allocation4] sm:$0xff]  ;;  %2651 = vmatpush3.bf16.msra.mxu0 %v2650_v22 }
 0xb85   : > { %2841 = vrcp.f32 %v2073_v13  ;;  %2652 = vmatprep.subr.bf16.mxu0 %v3101_v23 }
 0xb88   : > { %2654 = vmatpush3.bf16.msra.mxu0 %v2653_v29 }
 0xb8a   : > { %v2096_v25 = vld [vmem:[#allocation5 + $0x10] sm:$0xff] }
 0xb8b   : > { %v2840_v48 = vpop.eup %2839 }
 0xb8c   : > { %2109 = vperm.xlu0 %2773, %v2840_v48  }
 0xb8f   : > { %v2842_v15 = vpop.eup %2841 }
 0xb90   : > { %2079 = vperm.xlu0 %2773, %v2842_v15  }
 0xba9   : > { %v2090_v9 = vpop.permute.xlu0 %2089 }
 0xbaa   : > { %v2092_v24 = vmul.f32 %v2090_v9, %v2086_v41 }
 0xbab   : > { %v2100_v27 = vpop.permute.xlu1 %2099 }
 0xbac   : > { %v2102_v43 = vmul.f32 %v2100_v27, %v2096_v25  ;;  %2114 = vrot.lane.b32.xlu1 %v2092_v24, %s3100_s13 }
 0xbae   : > { %2118 = vrot.lane.b32.xlu0 %v2102_v43, %s3098_s4 }
 0xbaf   : > { %v1392_v47 = vpop.permute.xlu1 %1391 }
 0xbb0   : > { %v1394_v32 = vmul.f32 %v1392_v47, %v1368_v31 }
 0xbb2   : > { %v1474_v33 = vadd.f32 %v3598_v38, %v1394_v32 }
 0xbb4   : > { %1478 = vst.msk [vmem:[#allocation5] sm:$0xff] %vm488_vm3, %v1474_v33 }
 0xbbb   : > { %v2062_v36 = vpop.f32.mrb[14].mxu0  ;;  %v2076_v46 = vld [vmem:[#allocation5] sm:$0xff] }
 0xbbc   : > { %v2066_v37 = vadd.f32 %v2062_v36, %v1986_v35  ;;  %v2579_v39 = vpop.f32.mrb[15].mxu0 }
 0xbbe   : > { %2069 = vst.msk [vmem:[#allocation5 + $0x18] sm:$0xff] %vm488_vm3, %v2066_v37 }
 0xbc5   : > { %v2106_v23 = vld [vmem:[#allocation5 + $0x18] sm:$0xff] }
 0xc0b   : > { %v2110_v40 = vpop.permute.xlu0 %2109 }
 0xc0c   : > { %v2112_v42 = vmul.f32 %v2110_v40, %v2106_v23 }
 0xc0e   : > { %2122 = vrot.lane.b32.xlu1 %v2112_v42, %s3094_s11  ;;  %s2987_s11 = scalar_lea.vmem %s3686_s7, 128 }
 0xc0f   : > { %v2080_v44 = vpop.permute.xlu0 %2079  ;;  %p2988_p0 = scmp.ne.s32.totalorder %s3686_s7, %s2987_s11  ;;  %p2995_p13 = scmp.lt.s32.totalorder %s2993_s28, %s2987_s11 }
 0xc10   : > { %v2082_v38 = vmul.f32 %v2080_v44, %v2076_v46 }
 0xc11   : > { %p2989_p4 = pnand %p2988_p0, %p3783_p1  ;;  %p2996_p10 = por %p2995_p13, %p2994_p2 }
 0xc13   : > { %p2990_p8 = pneg %p2989_p4 }
 0xc15   : > { %p2997_p11 = pnand %p2996_p10, %p2990_p8 }
 0xc1e   : > { %v2115_v14 = vpop.permute.xlu1 %2114 }
 0xc1f   : > { %v2125_v30 = vsel %vm488_vm3, %v2082_v38, %v2115_v14 }
 0xc20   : > { %v2119_v49 = vpop.permute.xlu0 %2118 }
 0xc21   : > { %v2126_v51 = vsel %vm376_vm0, %v2125_v30, %v2119_v49 }
 0xc80   : > { %v2123_v54 = vpop.permute.xlu1 %2122 }
 0xc81   : > { %v2128_v50 = vsel %vm2127_vm7, %v2126_v51, %v2123_v54 }
 0xc82   : > { %2597 = vmatmul.mubr.msk.f32.vlgmr.msra.gmra.mrb[16].mxu0 %vm483_vm2, %v2128_v50 }
 0xd55   : > { %v2207_v52 = vpop.f32.mrb[16].mxu0 }
 0xd56   : > { %2211 = vst [vmem:[%s365_s0] sm:$0xff] %v2207_v52  ;;  %v2598_v53 = vpop.f32.mrb[17].mxu0 }
 0xd57   : > { %3000 = shalt.err (!%p2997_p11)
}
 0xd58   : > { %s3001_s18 = scalar_lea.hbm %s3691_s9, 128  ;;  %s3005_s4 = scalar_lea.hbm %s3744_s6, 256 }
 0xd59   : > { %p3002_p6 = scmp.ne.s32.totalorder %s3691_s9, %s3001_s18  ;;  %p3006_p12 = scmp.lt.u32.totalorder %s3691_s9, %s3744_s6 }
 0xd5a   : > { %p3007_p5 = scmp.lt.u32.totalorder %s3005_s4, %s3001_s18  ;;  %p3009_p0 = scmp.lt.u32.totalorder %s3001_s18, %s3691_s9 }
 0xd5b   : > { %p3003_p3 = pnand %p3002_p6, %p3783_p1 }
 0xd5c   : > { %p3008_p9 = por %p3007_p5, %p3006_p12 }
 0xd5d   : > { %p3004_p7 = pneg %p3003_p3 }
 0xd5e   : > { %p3010_p4 = por %p3009_p0, %p3008_p9 }
 0xd60   : > { %p3011_p8 = pnand %p3010_p4, %p3004_p7 }
 0xd62   : > { %3014 = shalt.err (!%p3011_p8)
}
 0xd63   : > { %2671 = dma.vmem_to_hbm [thread:$0]  (%p3783_p1), %s3686_s7, 128, %s3691_s9, %s2213_s12  }
 0xd64 PF: > { %s3784_s3 = sld [smem:[#allocation21_spill]]  ;;  %s2238_s17 = sand.u32 1, %s3061_s21  }
 0xd65   : > { %p3786_p13 = scmp.ge.s32.totalorder %s3081_s26, 2  ;;  %s2239_s10 = scalar_lea.sflag [#allocation8], %s2238_s17 }
 0xd6a   : > { %p3785_p2 = scmp.ne.s32.totalorder %s3784_s3, 0 }
 0xd6c   : > { %p2691_p10 = pnand %p3786_p13, %p3785_p2 }
 0xd6e   : > { %3056 = dma.done.wait (!%p2691_p10), %s2239_s10, 128  }
 0xd6f   : > { %3058 = vsyncadd (!%p2691_p10), %s2239_s10, 4294967168  ;;  %s26_s26 = sadd.s32 1, %s3081_s26   ;;  %s3787_s14 = sld [smem:[#allocation22_spill]] }
 0xd70   : > { %p23_p11 = scmp.ge.s32.totalorder %s26_s26, 4   ;;  %s3788_s21 = smov %s3065_s22 }
 0xd71   : > { %s3789_s22 = smov %s3069_s23  ;;  %s3790_s23 = smov %s3307_s19 }
 0xd72   : > { %s3791_s24 = smov %s3077_s25  ;;  %25 = sbr.rel (!%p23_p11) target bundleno = 14 (0xe), region = 140 }
 0xd75   : > { %s3792_s25 = smov %s3787_s14 }
 0xd79   :  { %2244 = vsyncpa [#allocation7], 1 }
 0xd7a   :  { %2246 = vsyncpa [#allocation7 + $0x1], 1 }
 0xd7b   :  { %2247 = vsyncpa [#allocation10], 1 }
 0xd7c   :  { %2249 = vsyncpa [#allocation10 + $0x1], 1 }
 0xd7d   :  { %2250 = vsyncpa [#allocation13], 1 }
 0xd7e   :  { %2251 = vsyncpa [#allocation8], 1 }
 0xd7f   :  { %2253 = vsyncpa [#allocation8 + $0x1], 1 }

</bundles_post_ra>
